<compile_context>
chip_gen: v7x
topology: tpu7x:2x2x1
jax: 0.10.0
libtpu: 0.0.40
codegen_flags: <defaults>
</compile_context>

<pallas_src>
import jax
import jax.numpy as jnp
from jax.experimental import pallas as pl
from jax.experimental.pallas import tpu as pltpu

POS_EMBED = 3
COND = 69
WIDTH = 128
D_IN = COND + POS_EMBED  # 72


def _round_up(x, m):
    return (x + m - 1) // m * m


def _tpu_meta():
    """(vmem_capacity_bytes, tensorcores_sharing_the_grid, device_kind)."""
    vmem_bytes = 128 << 20
    try:
        vmem_bytes = int(pltpu.get_tpu_info().vmem_capacity_bytes)
    except Exception:
        pass
    kind = ""
    try:
        kind = jax.devices()[0].device_kind.lower()
    except Exception:
        pass
    num_tc = 2 if (("v7" in kind) or ("v5p" in kind) or ("v4" in kind)) else 1
    return vmem_bytes, num_tc, kind


def _pick_tile(n, num_tc, cap):
    """Largest useful row tile: per-step overhead (~0.35 us) and per-step MXU
    weight pushes dominate small tiles.  Single TC -> one tile when it fits;
    multiple TCs -> step count kept a multiple of the core count."""
    cap = max(8, cap - cap % 8)
    if n <= 8:
        return n                       # single block equal to the full dim
    if num_tc <= 1:
        return n if n <= cap else cap  # sequential grid: no benefit to splitting
    per_core = -(-n // num_tc)
    steps = num_tc * max(1, -(-per_core // cap))
    tile = _round_up(-(-n // steps), 8)
    return min(tile, cap)


def _nonrigid_kernel(cond_ref, pe_ref, xyz_ref,
                     wic_ref, wipe_ref, bin_ref,
                     wh_ref, bh_ref, w6_ref, b6_ref,
                     xyz_out_ref, off_out_ref):
    f32, bf16 = jnp.float32, jnp.bfloat16

    cond = cond_ref[...].astype(bf16)   # (tile, 69)   bf16 cast in-kernel (VPU, hidden under MXU)
    pe = pe_ref[...].astype(bf16)       # (tile, 3)

    # Fused input stage: layer 0 and the skip pos_embed term in one 256-wide pass.
    #   lanes [0:128]   = cond @ w0_c + pe @ w0_pe + b0   (layer-0 pre-activation)
    #   lanes [128:256] = pe @ w4_pe                       (skip-concat term, carried)
    h256 = (jnp.dot(cond, wic_ref[...], preferred_element_type=f32)
            + jnp.dot(pe, wipe_ref[...], preferred_element_type=f32)
            + bin_ref[...])
    skip = h256[:, WIDTH:]                                   # f32 (tile, 128)
    h = jnp.maximum(h256[:, :WIDTH], 0.0).astype(bf16)

    # block_mlps[2], [4], [6]: Linear(128 -> 128) + ReLU
    for j in range(3):
        h = jnp.dot(h, wh_ref[j], preferred_element_type=f32) + bh_ref[j:j + 1, :]
        h = jnp.maximum(h, 0.0).astype(bf16)

    # block_mlps[8] (skip): Linear(131 -> 128) on cat([h, pos_embed])
    #   == h @ w4_h + (pos_embed @ w4_pe)   — second term already in `skip`.
    h = jnp.dot(h, wh_ref[3], preferred_element_type=f32) + skip + bh_ref[3:4, :]
    h = jnp.maximum(h, 0.0).astype(bf16)

    # block_mlps[10]: Linear(128 -> 128) + ReLU
    h = jnp.dot(h, wh_ref[4], preferred_element_type=f32) + bh_ref[4:5, :]
    h = jnp.maximum(h, 0.0).astype(bf16)

    # block_mlps[12]: Linear(128 -> 3), bf16 operands / f32 accumulation.
    # Weight is zero-padded to 8 lanes; take lanes 0:3 for the result.
    trans8 = jnp.dot(h, w6_ref[...], preferred_element_type=f32) + b6_ref[...]
    trans = trans8[:, :POS_EMBED]
    off_out_ref[...] = trans.astype(off_out_ref.dtype)
    xyz_out_ref[...] = (xyz_ref[...].astype(f32) + trans).astype(xyz_out_ref.dtype)


def pack_params(params):
    """Pack module-style params (PyTorch layout) into the kernel layout."""
    (w0, b0, w1, b1, w2, b2, w3, b3, w4, b4, w5, b5, w6, b6) = params
    bf16, f32 = jnp.bfloat16, jnp.float32
    w0c, w0p = w0[:COND], w0[COND:]           # layer-0 concat split: cond rows / pos_embed rows
    w4h, w4p = w4[:WIDTH], w4[WIDTH:]         # skip concat split:    hidden rows / pos_embed rows

    # Fused 256-wide input weights (lanes 0:128 = layer 0, lanes 128:256 = skip pe term).
    w_in_c = jnp.concatenate([w0c, jnp.zeros((COND, WIDTH), f32)], axis=1).astype(bf16)   # (69, 256)
    w_in_pe = jnp.concatenate([w0p, w4p], axis=1).astype(bf16)                             # (3, 256)
    b_in = jnp.concatenate([b0, jnp.zeros((WIDTH,), f32)])[None, :].astype(f32)            # (1, 256)

    wh = jnp.stack([w1, w2, w3, w4h, w5]).astype(bf16)      # (5, 128, 128)
    bh = jnp.stack([b1, b2, b3, b4, b5]).astype(f32)        # (5, 128)

    w6p = jnp.concatenate([w6, jnp.zeros((WIDTH, 5), f32)], axis=1).astype(bf16)  # (128, 8)
    b6p = jnp.concatenate([b6, jnp.zeros((5,), f32)])[None, :].astype(f32)        # (1, 8)
    return dict(w_in_c=w_in_c, w_in_pe=w_in_pe, b_in=b_in,
                wh=wh, bh=bh, w6p=w6p, b6p=b6p)


def nonrigid_mlp(pos_embed, pos_xyz, condition_code, packed, *, tile_n=None):
    N = pos_embed.shape[0]
    vmem_bytes, num_tc, kind = _tpu_meta()

    # Per-generation tile cap: v7x has 64 MiB VMEM -> cap 4096; v5e/v6e (128 MiB)
    # -> cap 8192.  `tile_n` overrides for sweeping.
    if tile_n is None:
        cap = 4096 if (vmem_bytes <= (64 << 20) or "v7" in kind) else 8192
    else:
        cap = int(tile_n)
    tile = _pick_tile(N, num_tc, cap)
    grid = pl.cdiv(N, tile)   # ragged last block: Pallas masks OOB output rows

    def row_spec(d):
        return pl.BlockSpec((tile, d), lambda i: (i, 0))

    def full_spec(shape):
        nd = len(shape)
        return pl.BlockSpec(shape, lambda i, nd=nd: (0,) * nd)

    in_specs = [row_spec(COND), row_spec(POS_EMBED), row_spec(POS_EMBED),
                full_spec(packed["w_in_c"].shape),
                full_spec(packed["w_in_pe"].shape),
                full_spec(packed["b_in"].shape),
                full_spec(packed["wh"].shape),
                full_spec(packed["bh"].shape),
                full_spec(packed["w6p"].shape),
                full_spec(packed["b6p"].shape)]
    out_specs = [row_spec(POS_EMBED), row_spec(POS_EMBED)]
    out_shapes = (jax.ShapeDtypeStruct((N, POS_EMBED), pos_xyz.dtype),   # xyz
                  jax.ShapeDtypeStruct((N, POS_EMBED), jnp.float32))     # offsets

    vmem_limit = int(min(vmem_bytes * 3 // 4, 100 << 20))

    xyz, offsets = pl.pallas_call(
        _nonrigid_kernel,
        out_shape=out_shapes,
        grid_spec=pltpu.PrefetchScalarGridSpec(
            num_scalar_prefetch=0,
            grid=(grid,),
            in_specs=in_specs,
            out_specs=out_specs,
        ),
        compiler_params=pltpu.CompilerParams(
            dimension_semantics=("parallel",),
            vmem_limit_bytes=vmem_limit),
    )(condition_code, pos_embed, pos_xyz,
      packed["w_in_c"], packed["w_in_pe"], packed["b_in"],
      packed["wh"], packed["bh"], packed["w6p"], packed["b6p"])

    return {"xyz": xyz, "offsets": offsets}


def init_params(key):
    """Module-style params: xavier-uniform(gain=sqrt(2)) weights; last layer
    uniform(-1e-5, 1e-5). The module zero-inits biases — small nonzero values
    are used here purely so the check exercises the kernel's bias path."""
    ks = jax.random.split(key, 14)
    gain = 2.0 ** 0.5  # nn.init.calculate_gain('relu')

    def xavier(k, fan_in, fan_out, g):
        bound = g * (6.0 / (fan_in + fan_out)) ** 0.5
        return jax.random.uniform(k, (fan_in, fan_out), jnp.float32, -bound, bound)

    w0 = xavier(ks[0], D_IN, WIDTH, gain)
    w1 = xavier(ks[1], WIDTH, WIDTH, gain)
    w2 = xavier(ks[2], WIDTH, WIDTH, gain)
    w3 = xavier(ks[3], WIDTH, WIDTH, gain)
    w4 = xavier(ks[4], WIDTH + POS_EMBED, WIDTH, gain)   # skip: cat([h, pos_embed])
    w5 = xavier(ks[5], WIDTH, WIDTH, gain)
    w6 = jax.random.uniform(ks[6], (WIDTH, 3), jnp.float32, -1e-5, 1e-5)

    def bias(k, n, scale):
        return scale * jax.random.normal(k, (n,), jnp.float32)

    b0, b1, b2, b3, b4, b5 = (bias(ks[7 + i], WIDTH, 0.1) for i in range(6))
    b6 = bias(ks[13], 3, 1e-5)
    return (w0, b0, w1, b1, w2, b2, w3, b3, w4, b4, w5, b5, w6, b6)


def reference_forward(pos_embed, pos_xyz, condition_code, params):
    """Pure-JAX f32 replica of the PyTorch forward (explicit concats)."""
    (w0, b0, w1, b1, w2, b2, w3, b3, w4, b4, w5, b5, w6, b6) = params
    h = jnp.concatenate([condition_code, pos_embed], axis=-1)
    h = jnp.maximum(h @ w0 + b0, 0.0)
    h = jnp.maximum(h @ w1 + b1, 0.0)
    h = jnp.maximum(h @ w2 + b2, 0.0)
    h = jnp.maximum(h @ w3 + b3, 0.0)
    h = jnp.concatenate([h, pos_embed], axis=-1)  # layers_to_cat_inputs == [8]
    h = jnp.maximum(h @ w4 + b4, 0.0)
    h = jnp.maximum(h @ w5 + b5, 0.0)
    trans = h @ w6 + b6
    return {"xyz": pos_xyz + trans, "offsets": trans}


if __name__ == "__main__":
    key = jax.random.PRNGKey(0)
    k_param, k_pe, k_xyz, k_cond = jax.random.split(key, 4)

    N = 300  # deliberately not 8-aligned: exercises the ragged-block masking path
    pos_embed = jax.random.normal(k_pe, (N, POS_EMBED), jnp.float32)
    pos_xyz = jax.random.normal(k_xyz, (N, POS_EMBED), jnp.float32)
    condition_code = jax.random.normal(k_cond, (N, COND), jnp.float32)

    params = init_params(k_param)
    packed = pack_params(params)

    out = nonrigid_mlp(pos_embed, pos_xyz, condition_code, packed)
    jax.block_until_ready(out)

    ref = reference_forward(pos_embed, pos_xyz, condition_code, params)
    # bf16 matmul operands with f32 accumulation; offsets are O(1e-4) (last
    # layer weights ~1e-5), so 2e-4 abs tolerance leaves >100x margin over the
    # bf16 error.  (Re-check tolerance if condition codes are much larger in
    # production, per review note.)
    assert jnp.allclose(out["offsets"], ref["offsets"], atol=2e-4, rtol=0.0)
    assert jnp.allclose(out["xyz"], ref["xyz"], atol=2e-4, rtol=1e-4)
    assert out["xyz"].shape == (N, 3) and out["offsets"].shape == (N, 3)

    print("KERNEL_OK")
</pallas_src>

<mosaic_0001>
module attributes {stable_mosaic.version = 11 : i64} {
  func.func @_nonrigid_kernel(%arg0: i32, %arg1: memref<300x69xf32, #tpu.memory_space<vmem>>, %arg2: memref<300x3xf32, #tpu.memory_space<vmem>>, %arg3: memref<300x3xf32, #tpu.memory_space<vmem>>, %arg4: memref<69x256xbf16, #tpu.memory_space<vmem>>, %arg5: memref<3x256xbf16, #tpu.memory_space<vmem>>, %arg6: memref<1x256xf32, #tpu.memory_space<vmem>>, %arg7: memref<5x128x128xbf16, #tpu.memory_space<vmem>>, %arg8: memref<5x128xf32, #tpu.memory_space<vmem>>, %arg9: memref<128x8xbf16, #tpu.memory_space<vmem>>, %arg10: memref<1x8xf32, #tpu.memory_space<vmem>>, %arg11: memref<300x3xf32, #tpu.memory_space<vmem>>, %arg12: memref<300x3xf32, #tpu.memory_space<vmem>>) attributes {dimension_semantics = [#tpu.dimension_semantics<parallel>], iteration_bounds = array<i64: 1>, scalar_prefetch = 0 : i64, scratch_operands = 0 : i64, tpu.core_type = #tpu.core_type<tc>, window_params = [{transform_indices = @transform_0, window_bounds = array<i64: 300, 69>}, {transform_indices = @transform_1, window_bounds = array<i64: 300, 3>}, {transform_indices = @transform_2, window_bounds = array<i64: 300, 3>}, {pipeline_mode = #tpu.pipeline_mode<synchronous>, transform_indices = @transform_3, window_bounds = array<i64: 69, 256>}, {pipeline_mode = #tpu.pipeline_mode<synchronous>, transform_indices = @transform_4, window_bounds = array<i64: 3, 256>}, {pipeline_mode = #tpu.pipeline_mode<synchronous>, transform_indices = @transform_5, window_bounds = array<i64: 1, 256>}, {pipeline_mode = #tpu.pipeline_mode<synchronous>, transform_indices = @transform_6, window_bounds = array<i64: 5, 128, 128>}, {pipeline_mode = #tpu.pipeline_mode<synchronous>, transform_indices = @transform_7, window_bounds = array<i64: 5, 128>}, {pipeline_mode = #tpu.pipeline_mode<synchronous>, transform_indices = @transform_8, window_bounds = array<i64: 128, 8>}, {pipeline_mode = #tpu.pipeline_mode<synchronous>, transform_indices = @transform_9, window_bounds = array<i64: 1, 8>}, {transform_indices = @transform_10, window_bounds = array<i64: 300, 3>}, {transform_indices = @transform_11, window_bounds = array<i64: 300, 3>}]} {
    %c0 = arith.constant 0 : index
    %c0_0 = arith.constant 0 : index
    %0 = vector.load %arg1[%c0, %c0_0] : memref<300x69xf32, #tpu.memory_space<vmem>>, vector<300x69xf32>
    %1 = arith.truncf %0 : vector<300x69xf32> to vector<300x69xbf16>
    %c0_1 = arith.constant 0 : index
    %c0_2 = arith.constant 0 : index
    %2 = vector.load %arg2[%c0_1, %c0_2] : memref<300x3xf32, #tpu.memory_space<vmem>>, vector<300x3xf32>
    %3 = arith.truncf %2 : vector<300x3xf32> to vector<300x3xbf16>
    %c0_3 = arith.constant 0 : index
    %c0_4 = arith.constant 0 : index
    %4 = vector.load %arg4[%c0_3, %c0_4] : memref<69x256xbf16, #tpu.memory_space<vmem>>, vector<69x256xbf16>
    %cst = arith.constant dense<0.000000e+00> : vector<300x256xf32>
    %5 = tpu.matmul %1, %4, %cst {dimension_numbers = #tpu.dot_dimension_numbers<[1], [0], [0], [1], [0, 0, 1, 1], [], []>} : vector<300x69xbf16>, vector<69x256xbf16>, vector<300x256xf32> -> vector<300x256xf32>
    %c0_5 = arith.constant 0 : index
    %c0_6 = arith.constant 0 : index
    %6 = vector.load %arg5[%c0_5, %c0_6] : memref<3x256xbf16, #tpu.memory_space<vmem>>, vector<3x256xbf16>
    %cst_7 = arith.constant dense<0.000000e+00> : vector<300x256xf32>
    %7 = tpu.matmul %3, %6, %cst_7 {dimension_numbers = #tpu.dot_dimension_numbers<[1], [0], [0], [1], [0, 0, 1, 1], [], []>} : vector<300x3xbf16>, vector<3x256xbf16>, vector<300x256xf32> -> vector<300x256xf32>
    %8 = arith.addf %5, %7 : vector<300x256xf32>
    %c0_8 = arith.constant 0 : index
    %c0_9 = arith.constant 0 : index
    %9 = vector.load %arg6[%c0_8, %c0_9] : memref<1x256xf32, #tpu.memory_space<vmem>>, vector<1x256xf32>
    %10 = vector.broadcast %9 : vector<1x256xf32> to vector<300x256xf32>
    %11 = arith.addf %8, %10 : vector<300x256xf32>
    %12 = vector.extract_strided_slice %11 {offsets = [0, 128], sizes = [300, 128], strides = [1, 1]} : vector<300x256xf32> to vector<300x128xf32>
    %13 = vector.extract_strided_slice %11 {offsets = [0, 0], sizes = [300, 128], strides = [1, 1]} : vector<300x256xf32> to vector<300x128xf32>
    %cst_10 = arith.constant 0.000000e+00 : f32
    %14 = vector.broadcast %cst_10 : f32 to vector<300x128xf32>
    %15 = arith.maximumf %13, %14 : vector<300x128xf32>
    %16 = arith.truncf %15 : vector<300x128xf32> to vector<300x128xbf16>
    %c0_11 = arith.constant 0 : index
    %c0_12 = arith.constant 0 : index
    %c0_13 = arith.constant 0 : index
    %17 = vector.load %arg7[%c0_11, %c0_12, %c0_13] : memref<5x128x128xbf16, #tpu.memory_space<vmem>>, vector<1x128x128xbf16>
    %18 = vector.shape_cast %17 : vector<1x128x128xbf16> to vector<128x128xbf16>
    %cst_14 = arith.constant dense<0.000000e+00> : vector<300x128xf32>
    %19 = tpu.matmul %16, %18, %cst_14 {dimension_numbers = #tpu.dot_dimension_numbers<[1], [0], [0], [1], [0, 0, 1, 1], [], []>} : vector<300x128xbf16>, vector<128x128xbf16>, vector<300x128xf32> -> vector<300x128xf32>
    %c0_15 = arith.constant 0 : index
    %c0_16 = arith.constant 0 : index
    %20 = vector.load %arg8[%c0_15, %c0_16] : memref<5x128xf32, #tpu.memory_space<vmem>>, vector<1x128xf32>
    %21 = vector.broadcast %20 : vector<1x128xf32> to vector<300x128xf32>
    %22 = arith.addf %19, %21 : vector<300x128xf32>
    %cst_17 = arith.constant 0.000000e+00 : f32
    %23 = vector.broadcast %cst_17 : f32 to vector<300x128xf32>
    %24 = arith.maximumf %22, %23 : vector<300x128xf32>
    %25 = arith.truncf %24 : vector<300x128xf32> to vector<300x128xbf16>
    %c1 = arith.constant 1 : index
    %c0_18 = arith.constant 0 : index
    %c0_19 = arith.constant 0 : index
    %26 = vector.load %arg7[%c1, %c0_18, %c0_19] : memref<5x128x128xbf16, #tpu.memory_space<vmem>>, vector<1x128x128xbf16>
    %27 = vector.shape_cast %26 : vector<1x128x128xbf16> to vector<128x128xbf16>
    %cst_20 = arith.constant dense<0.000000e+00> : vector<300x128xf32>
    %28 = tpu.matmul %25, %27, %cst_20 {dimension_numbers = #tpu.dot_dimension_numbers<[1], [0], [0], [1], [0, 0, 1, 1], [], []>} : vector<300x128xbf16>, vector<128x128xbf16>, vector<300x128xf32> -> vector<300x128xf32>
    %c1_21 = arith.constant 1 : index
    %c0_22 = arith.constant 0 : index
    %29 = vector.load %arg8[%c1_21, %c0_22] : memref<5x128xf32, #tpu.memory_space<vmem>>, vector<1x128xf32>
    %30 = vector.broadcast %29 : vector<1x128xf32> to vector<300x128xf32>
    %31 = arith.addf %28, %30 : vector<300x128xf32>
    %cst_23 = arith.constant 0.000000e+00 : f32
    %32 = vector.broadcast %cst_23 : f32 to vector<300x128xf32>
    %33 = arith.maximumf %31, %32 : vector<300x128xf32>
    %34 = arith.truncf %33 : vector<300x128xf32> to vector<300x128xbf16>
    %c2 = arith.constant 2 : index
    %c0_24 = arith.constant 0 : index
    %c0_25 = arith.constant 0 : index
    %35 = vector.load %arg7[%c2, %c0_24, %c0_25] : memref<5x128x128xbf16, #tpu.memory_space<vmem>>, vector<1x128x128xbf16>
    %36 = vector.shape_cast %35 : vector<1x128x128xbf16> to vector<128x128xbf16>
    %cst_26 = arith.constant dense<0.000000e+00> : vector<300x128xf32>
    %37 = tpu.matmul %34, %36, %cst_26 {dimension_numbers = #tpu.dot_dimension_numbers<[1], [0], [0], [1], [0, 0, 1, 1], [], []>} : vector<300x128xbf16>, vector<128x128xbf16>, vector<300x128xf32> -> vector<300x128xf32>
    %c2_27 = arith.constant 2 : index
    %c0_28 = arith.constant 0 : index
    %38 = vector.load %arg8[%c2_27, %c0_28] : memref<5x128xf32, #tpu.memory_space<vmem>>, vector<1x128xf32>
    %39 = vector.broadcast %38 : vector<1x128xf32> to vector<300x128xf32>
    %40 = arith.addf %37, %39 : vector<300x128xf32>
    %cst_29 = arith.constant 0.000000e+00 : f32
    %41 = vector.broadcast %cst_29 : f32 to vector<300x128xf32>
    %42 = arith.maximumf %40, %41 : vector<300x128xf32>
    %43 = arith.truncf %42 : vector<300x128xf32> to vector<300x128xbf16>
    %c3 = arith.constant 3 : index
    %c0_30 = arith.constant 0 : index
    %c0_31 = arith.constant 0 : index
    %44 = vector.load %arg7[%c3, %c0_30, %c0_31] : memref<5x128x128xbf16, #tpu.memory_space<vmem>>, vector<1x128x128xbf16>
    %45 = vector.shape_cast %44 : vector<1x128x128xbf16> to vector<128x128xbf16>
    %cst_32 = arith.constant dense<0.000000e+00> : vector<300x128xf32>
    %46 = tpu.matmul %43, %45, %cst_32 {dimension_numbers = #tpu.dot_dimension_numbers<[1], [0], [0], [1], [0, 0, 1, 1], [], []>} : vector<300x128xbf16>, vector<128x128xbf16>, vector<300x128xf32> -> vector<300x128xf32>
    %47 = arith.addf %46, %12 : vector<300x128xf32>
    %c3_33 = arith.constant 3 : index
    %c0_34 = arith.constant 0 : index
    %48 = vector.load %arg8[%c3_33, %c0_34] : memref<5x128xf32, #tpu.memory_space<vmem>>, vector<1x128xf32>
    %49 = vector.broadcast %48 : vector<1x128xf32> to vector<300x128xf32>
    %50 = arith.addf %47, %49 : vector<300x128xf32>
    %cst_35 = arith.constant 0.000000e+00 : f32
    %51 = vector.broadcast %cst_35 : f32 to vector<300x128xf32>
    %52 = arith.maximumf %50, %51 : vector<300x128xf32>
    %53 = arith.truncf %52 : vector<300x128xf32> to vector<300x128xbf16>
    %c4 = arith.constant 4 : index
    %c0_36 = arith.constant 0 : index
    %c0_37 = arith.constant 0 : index
    %54 = vector.load %arg7[%c4, %c0_36, %c0_37] : memref<5x128x128xbf16, #tpu.memory_space<vmem>>, vector<1x128x128xbf16>
    %55 = vector.shape_cast %54 : vector<1x128x128xbf16> to vector<128x128xbf16>
    %cst_38 = arith.constant dense<0.000000e+00> : vector<300x128xf32>
    %56 = tpu.matmul %53, %55, %cst_38 {dimension_numbers = #tpu.dot_dimension_numbers<[1], [0], [0], [1], [0, 0, 1, 1], [], []>} : vector<300x128xbf16>, vector<128x128xbf16>, vector<300x128xf32> -> vector<300x128xf32>
    %c4_39 = arith.constant 4 : index
    %c0_40 = arith.constant 0 : index
    %57 = vector.load %arg8[%c4_39, %c0_40] : memref<5x128xf32, #tpu.memory_space<vmem>>, vector<1x128xf32>
    %58 = vector.broadcast %57 : vector<1x128xf32> to vector<300x128xf32>
    %59 = arith.addf %56, %58 : vector<300x128xf32>
    %cst_41 = arith.constant 0.000000e+00 : f32
    %60 = vector.broadcast %cst_41 : f32 to vector<300x128xf32>
    %61 = arith.maximumf %59, %60 : vector<300x128xf32>
    %62 = arith.truncf %61 : vector<300x128xf32> to vector<300x128xbf16>
    %c0_42 = arith.constant 0 : index
    %c0_43 = arith.constant 0 : index
    %63 = vector.load %arg9[%c0_42, %c0_43] : memref<128x8xbf16, #tpu.memory_space<vmem>>, vector<128x8xbf16>
    %cst_44 = arith.constant dense<0.000000e+00> : vector<300x8xf32>
    %64 = tpu.matmul %62, %63, %cst_44 {dimension_numbers = #tpu.dot_dimension_numbers<[1], [0], [0], [1], [0, 0, 1, 1], [], []>} : vector<300x128xbf16>, vector<128x8xbf16>, vector<300x8xf32> -> vector<300x8xf32>
    %c0_45 = arith.constant 0 : index
    %c0_46 = arith.constant 0 : index
    %65 = vector.load %arg10[%c0_45, %c0_46] : memref<1x8xf32, #tpu.memory_space<vmem>>, vector<1x8xf32>
    %66 = vector.broadcast %65 : vector<1x8xf32> to vector<300x8xf32>
    %67 = arith.addf %64, %66 : vector<300x8xf32>
    %68 = vector.extract_strided_slice %67 {offsets = [0, 0], sizes = [300, 3], strides = [1, 1]} : vector<300x8xf32> to vector<300x3xf32>
    %c0_47 = arith.constant 0 : index
    %c0_48 = arith.constant 0 : index
    %69 = vector.load %arg12[%c0_47, %c0_48] : memref<300x3xf32, #tpu.memory_space<vmem>>, vector<300x3xf32>
    tpu.vector_store %arg12[%c0_47, %c0_48], %68 {strides = array<i32>} : memref<300x3xf32, #tpu.memory_space<vmem>>, vector<300x3xf32>,
    %c0_49 = arith.constant 0 : index
    %c0_50 = arith.constant 0 : index
    %70 = vector.load %arg3[%c0_49, %c0_50] : memref<300x3xf32, #tpu.memory_space<vmem>>, vector<300x3xf32>
    %71 = arith.addf %70, %68 : vector<300x3xf32>
    %c0_51 = arith.constant 0 : index
    %c0_52 = arith.constant 0 : index
    %72 = vector.load %arg11[%c0_51, %c0_52] : memref<300x3xf32, #tpu.memory_space<vmem>>, vector<300x3xf32>
    tpu.vector_store %arg11[%c0_51, %c0_52], %71 {strides = array<i32>} : memref<300x3xf32, #tpu.memory_space<vmem>>, vector<300x3xf32>,
    return
  }
  func.func @transform_0(%arg0: i32) -> (i32, i32) {
    %c0_i32 = arith.constant 0 : i32
    %c0_i32_0 = arith.constant 0 : i32
    return %arg0, %c0_i32 : i32, i32
  }
  func.func @transform_1(%arg0: i32) -> (i32, i32) {
    %c0_i32 = arith.constant 0 : i32
    %c0_i32_0 = arith.constant 0 : i32
    return %arg0, %c0_i32 : i32, i32
  }
  func.func @transform_2(%arg0: i32) -> (i32, i32) {
    %c0_i32 = arith.constant 0 : i32
    %c0_i32_0 = arith.constant 0 : i32
    return %arg0, %c0_i32 : i32, i32
  }
  func.func @transform_3(%arg0: i32) -> (i32, i32) {
    %c0_i32 = arith.constant 0 : i32
    %c0_i32_0 = arith.constant 0 : i32
    %c0_i32_1 = arith.constant 0 : i32
    return %c0_i32, %c0_i32_0 : i32, i32
  }
  func.func @transform_4(%arg0: i32) -> (i32, i32) {
    %c0_i32 = arith.constant 0 : i32
    %c0_i32_0 = arith.constant 0 : i32
    %c0_i32_1 = arith.constant 0 : i32
    return %c0_i32, %c0_i32_0 : i32, i32
  }
  func.func @transform_5(%arg0: i32) -> (i32, i32) {
    %c0_i32 = arith.constant 0 : i32
    %c0_i32_0 = arith.constant 0 : i32
    %c0_i32_1 = arith.constant 0 : i32
    return %c0_i32, %c0_i32_0 : i32, i32
  }
  func.func @transform_6(%arg0: i32) -> (i32, i32, i32) {
    %c0_i32 = arith.constant 0 : i32
    %c0_i32_0 = arith.constant 0 : i32
    %c0_i32_1 = arith.constant 0 : i32
    %c0_i32_2 = arith.constant 0 : i32
    return %c0_i32, %c0_i32_0, %c0_i32_1 : i32, i32, i32
  }
  func.func @transform_7(%arg0: i32) -> (i32, i32) {
    %c0_i32 = arith.constant 0 : i32
    %c0_i32_0 = arith.constant 0 : i32
    %c0_i32_1 = arith.constant 0 : i32
    return %c0_i32, %c0_i32_0 : i32, i32
  }
  func.func @transform_8(%arg0: i32) -> (i32, i32) {
    %c0_i32 = arith.constant 0 : i32
    %c0_i32_0 = arith.constant 0 : i32
    %c0_i32_1 = arith.constant 0 : i32
    return %c0_i32, %c0_i32_0 : i32, i32
  }
  func.func @transform_9(%arg0: i32) -> (i32, i32) {
    %c0_i32 = arith.constant 0 : i32
    %c0_i32_0 = arith.constant 0 : i32
    %c0_i32_1 = arith.constant 0 : i32
    return %c0_i32, %c0_i32_0 : i32, i32
  }
  func.func @transform_10(%arg0: i32) -> (i32, i32) {
    %c0_i32 = arith.constant 0 : i32
    %c0_i32_0 = arith.constant 0 : i32
    return %arg0, %c0_i32 : i32, i32
  }
  func.func @transform_11(%arg0: i32) -> (i32, i32) {
    %c0_i32 = arith.constant 0 : i32
    %c0_i32_0 = arith.constant 0 : i32
    return %arg0, %c0_i32 : i32, i32
  }
}

</mosaic_0001>

<bundles_post_ra>
// kernel: tpu_custom_call.1
= control target key start
LH: loop header
LB: loop body
LE: loop exit
PB: predicated region body
PF: predicated region fallthrough
CT: control target
= control target key end

     0   :  { %17 = vsyncpa [#allocation3], 0  ;;  %s5529_s0 = inlined_call_operand.hbm [shape: f32[300,69], index: 0, kind: input, shape index: {}]   ;;  %s5530_s1 = inlined_call_operand.hbm [shape: f32[300,3], index: 1, kind: input, shape index: {}]   ;;  %s5531_s2 = inlined_call_operand.hbm [shape: f32[300,3], index: 2, kind: input, shape index: {}]   ;;  %s5532_s3 = inlined_call_operand.hbm [shape: bf16[69,256], index: 3, kind: input, shape index: {}]   ;;  %s5533_s4 = inlined_call_operand.hbm [shape: bf16[3,256], index: 4, kind: input, shape index: {}]   ;;  %s5534_s5 = inlined_call_operand.hbm [shape: f32[1,256], index: 5, kind: input, shape index: {}]   ;;  %s5535_s6 = inlined_call_operand.hbm [shape: bf16[5,128,128], index: 6, kind: input, shape index: {}]   ;;  %s5536_s7 = inlined_call_operand.hbm [shape: f32[5,128], index: 7, kind: input, shape index: {}]   ;;  %s5537_s8 = inlined_call_operand.hbm [shape: bf16[128,8], index: 8, kind: input, shape index: {}]   ;;  %s5538_s9 = inlined_call_operand.hbm [shape: f32[1,8], index: 9, kind: input, shape index: {}]   ;;  %s5539_s10 = inlined_call_operand.hbm [shape: f32[300,3], index: 10, kind: output, shape index: {0}]   ;;  %s5540_s11 = inlined_call_operand.hbm [shape: f32[300,3], index: 11, kind: output, shape index: {1}]  }
   0x1   :  { %18 = vsyncpa [#allocation6], 0 }
   0x2   :  { %19 = vsyncpa [#allocation9], 0 }
   0x3   :  { %20 = vsyncpa [#allocation12], 0 }
   0x4   :  { %21 = vsyncpa [#allocation15], 0 }
   0x5   :  { %22 = vsyncpa [#allocation18], 0 }
   0x6   :  { %23 = vsyncpa [#allocation4], 0 }
   0x7   :  { %24 = vsyncpa [#allocation21], 0  ;;  %s4387_s17 = smov [#allocation5]   ;;  %s4388_s19 = smov [#allocation8]  }
   0x8   :  { %s42_s18 = sshll.u32 %s4387_s17, 4  ;;  %s66_s20 = sshll.u32 %s4388_s19, 4  ;;  %s43_s18 = int_to_ptr.vmem [resolvable:$true] %s42_s18  ;;  %s4467_s20 = int_to_ptr.vmem [resolvable:$true] %s66_s20 }
   0x9   :  { %s4107_s23 = scalar_lea.hbm %s5530_s1, 4864 }
   0xa   :  { %p4108_p0 = scmp.ne.s32.totalorder %s5530_s1, %s4107_s23  ;;  %p4111_p1 = scmp.lt.u32.totalorder %s4107_s23, %s5530_s1 }
   0xc   :  { %p4113_p2 = pnand %p4111_p1, %p4108_p0 }
   0xe   :  { %4116 = shalt.err (!%p4113_p2)
}
   0xf   :  { %s4117_s28 = scalar_lea.vmem %s43_s18, 4864  ;;  %p4122_p4 = scmp.lt.s32.totalorder %s43_s18, %s43_s18 }
  0x10   :  { %p4118_p3 = scmp.ne.s32.totalorder %s43_s18, %s4117_s28  ;;  %p4123_p5 = scmp.lt.s32.totalorder %s4117_s28, %s4117_s28 }
  0x12   :  { %p4124_p6 = por %p4123_p5, %p4122_p4 }
  0x14   :  { %p4125_p7 = pnand %p4124_p6, %p4118_p3 }
  0x16   :  { %4128 = shalt.err (!%p4125_p7)
}
  0x17   :  { %s4389_s29 = smov 128   ;;  %s4390_s30 = smov 8  }
  0x18   :  { %48 = dma.hbm_to_vmem [thread:$0]  %s5530_s1, 4864, %s43_s18, [#allocation6], %s4389_s29, %s4389_s29, %s4390_s30  }
  0x19   :  { %s4129_s16 = scalar_lea.hbm %s5532_s3, 1152 }
  0x1a   :  { %p4130_p8 = scmp.ne.s32.totalorder %s5532_s3, %s4129_s16  ;;  %p4133_p9 = scmp.lt.u32.totalorder %s4129_s16, %s5532_s3 }
  0x1c   :  { %p4135_p10 = pnand %p4133_p9, %p4130_p8 }
  0x1e   :  { %4138 = shalt.err (!%p4135_p10)
}
  0x1f   :  { %s4139_s23 = scalar_lea.vmem %s4467_s20, 1152  ;;  %p4144_p12 = scmp.lt.s32.totalorder %s4467_s20, %s4467_s20 }
  0x20   :  { %p4140_p11 = scmp.ne.s32.totalorder %s4467_s20, %s4139_s23  ;;  %p4145_p13 = scmp.lt.s32.totalorder %s4139_s23, %s4139_s23 }
  0x22   :  { %p4146_p0 = por %p4145_p13, %p4144_p12 }
  0x24   :  { %p4147_p1 = pnand %p4146_p0, %p4140_p11 }
  0x26   :  { %4150 = shalt.err (!%p4147_p1)
}
  0x27   :  { %72 = dma.hbm_to_vmem [thread:$0]  %s5532_s3, 1152, %s4467_s20, [#allocation9], %s4389_s29, %s4389_s29, %s4390_s30  }
  0x28   :  { %s4391_s24 = smov [#allocation11]   ;;  %s4392_s26 = smov [#allocation14]  }
  0x29   :  { %s89_s25 = sshll.u32 %s4391_s24, 4  ;;  %s111_s27 = sshll.u32 %s4392_s26, 4  ;;  %s90_s25 = int_to_ptr.vmem [resolvable:$true] %s89_s25  ;;  %s112_s27 = int_to_ptr.vmem [resolvable:$true] %s111_s27 }
  0x2a   :  { %s4151_s13 = scalar_lea.hbm %s5534_s5, 32 }
  0x2b   :  { %p4152_p2 = scmp.ne.s32.totalorder %s5534_s5, %s4151_s13  ;;  %p4155_p3 = scmp.lt.u32.totalorder %s4151_s13, %s5534_s5 }
  0x2d   :  { %p4157_p4 = pnand %p4155_p3, %p4152_p2 }
  0x2f   :  { %4160 = shalt.err (!%p4157_p4)
}
  0x30   :  { %s4161_s3 = scalar_lea.vmem %s90_s25, 32  ;;  %p4166_p6 = scmp.lt.s32.totalorder %s90_s25, %s90_s25 }
  0x31   :  { %p4162_p5 = scmp.ne.s32.totalorder %s90_s25, %s4161_s3  ;;  %p4167_p7 = scmp.lt.s32.totalorder %s4161_s3, %s4161_s3 }
  0x33   :  { %p4168_p8 = por %p4167_p7, %p4166_p6 }
  0x35   :  { %p4169_p9 = pnand %p4168_p8, %p4162_p5 }
  0x37   :  { %4172 = shalt.err (!%p4169_p9)
}
  0x38   :  { %92 = dma.hbm_to_vmem [thread:$0]  %s5534_s5, 32, %s90_s25, [#allocation12]  }
  0x39   :  { %s4173_s23 = scalar_lea.hbm %s5536_s7, 128 }
  0x3a   :  { %p4174_p10 = scmp.ne.s32.totalorder %s5536_s7, %s4173_s23  ;;  %p4177_p11 = scmp.lt.u32.totalorder %s4173_s23, %s5536_s7 }
  0x3c   :  { %p4179_p12 = pnand %p4177_p11, %p4174_p10 }
  0x3e   :  { %4182 = shalt.err (!%p4179_p12)
}
  0x3f   :  { %s4183_s28 = scalar_lea.vmem %s112_s27, 128  ;;  %p4188_p0 = scmp.lt.s32.totalorder %s112_s27, %s112_s27 }
  0x40   :  { %p4184_p13 = scmp.ne.s32.totalorder %s112_s27, %s4183_s28  ;;  %p4189_p1 = scmp.lt.s32.totalorder %s4183_s28, %s4183_s28 }
  0x42   :  { %p4190_p2 = por %p4189_p1, %p4188_p0 }
  0x44   :  { %p4191_p3 = pnand %p4190_p2, %p4184_p13 }
  0x46   :  { %4194 = shalt.err (!%p4191_p3)
}
  0x47   :  { %114 = dma.hbm_to_vmem [thread:$0]  %s5536_s7, 128, %s112_s27, [#allocation15]  }
  0x48   :  { %s4393_s12 = smov [#allocation2]   ;;  %s4394_s14 = smov [#allocation7]  }
  0x49   :  { %s30_s13 = sshll.u32 %s4393_s12, 4  ;;  %s54_s15 = sshll.u32 %s4394_s14, 4  ;;  %s31_s13 = int_to_ptr.vmem [resolvable:$true] %s30_s13  ;;  %s4528_s15 = int_to_ptr.vmem [resolvable:$true] %s54_s15 }
  0x4a   :  { %s4195_s3 = scalar_lea.hbm %s5529_s0, 4864 }
  0x4b   :  { %p4196_p4 = scmp.ne.s32.totalorder %s5529_s0, %s4195_s3  ;;  %p4199_p5 = scmp.lt.u32.totalorder %s4195_s3, %s5529_s0 }
  0x4d   :  { %p4201_p6 = pnand %p4199_p5, %p4196_p4 }
  0x4f   :  { %4204 = shalt.err (!%p4201_p6)
}
  0x50   :  { %s4205_s7 = scalar_lea.vmem %s31_s13, 4864  ;;  %p4210_p8 = scmp.lt.s32.totalorder %s31_s13, %s31_s13 }
  0x51   :  { %p4206_p7 = scmp.ne.s32.totalorder %s31_s13, %s4205_s7  ;;  %p4211_p9 = scmp.lt.s32.totalorder %s4205_s7, %s4205_s7 }
  0x53   :  { %p4212_p10 = por %p4211_p9, %p4210_p8 }
  0x55   :  { %p4213_p11 = pnand %p4212_p10, %p4206_p7 }
  0x57   :  { %4216 = shalt.err (!%p4213_p11)
}
  0x58   :  { %36 = dma.hbm_to_vmem [thread:$0]  %s5529_s0, 4864, %s31_s13, [#allocation3], %s4389_s29, %s4389_s29, %s4390_s30  }
  0x59   :  { %s4217_s24 = scalar_lea.hbm %s5531_s2, 4864 }
  0x5a   :  { %p4218_p12 = scmp.ne.s32.totalorder %s5531_s2, %s4217_s24  ;;  %p4221_p13 = scmp.lt.u32.totalorder %s4217_s24, %s5531_s2 }
  0x5c   :  { %p4223_p0 = pnand %p4221_p13, %p4218_p12 }
  0x5e   :  { %4226 = shalt.err (!%p4223_p0)
}
  0x5f   :  { %s4227_s12 = scalar_lea.vmem %s4528_s15, 4864  ;;  %p4232_p2 = scmp.lt.s32.totalorder %s4528_s15, %s4528_s15 }
  0x60   :  { %p4228_p1 = scmp.ne.s32.totalorder %s4528_s15, %s4227_s12  ;;  %p4233_p3 = scmp.lt.s32.totalorder %s4227_s12, %s4227_s12 }
  0x62   :  { %p4234_p4 = por %p4233_p3, %p4232_p2 }
  0x64   :  { %p4235_p5 = pnand %p4234_p4, %p4228_p1 }
  0x66   :  { %4238 = shalt.err (!%p4235_p5)
}
  0x67   :  { %60 = dma.hbm_to_vmem [thread:$0]  %s5531_s2, 4864, %s4528_s15, [#allocation6], %s4389_s29, %s4389_s29, %s4390_s30  }
  0x68   :  { %s4395_s14 = smov [#allocation10]   ;;  %s4396_s17 = smov [#allocation13]  }
  0x69   :  { %s79_s16 = sshll.u32 %s4395_s14, 4  ;;  %s98_s3 = sshll.u32 %s4396_s17, 4  ;;  %s80_s16 = int_to_ptr.vmem [resolvable:$true] %s79_s16  ;;  %s4565_s3 = int_to_ptr.vmem [resolvable:$true] %s98_s3 }
  0x6a   :  { %s4239_s21 = scalar_lea.hbm %s5533_s4, 64 }
  0x6b   :  { %p4240_p6 = scmp.ne.s32.totalorder %s5533_s4, %s4239_s21  ;;  %p4243_p7 = scmp.lt.u32.totalorder %s4239_s21, %s5533_s4 }
  0x6d   :  { %p4245_p8 = pnand %p4243_p7, %p4240_p6 }
  0x6f   :  { %4248 = shalt.err (!%p4245_p8)
}
  0x70   :  { %s4249_s2 = scalar_lea.vmem %s80_s16, 64  ;;  %p4254_p10 = scmp.lt.s32.totalorder %s80_s16, %s80_s16 }
  0x71   :  { %p4250_p9 = scmp.ne.s32.totalorder %s80_s16, %s4249_s2  ;;  %p4255_p11 = scmp.lt.s32.totalorder %s4249_s2, %s4249_s2 }
  0x73   :  { %p4256_p12 = por %p4255_p11, %p4254_p10 }
  0x75   :  { %p4257_p13 = pnand %p4256_p12, %p4250_p9 }
  0x77   :  { %4260 = shalt.err (!%p4257_p13)
}
  0x78   :  { %82 = dma.hbm_to_vmem [thread:$0]  %s5533_s4, 64, %s80_s16, [#allocation9]  }
  0x79   :  { %s4261_s26 = scalar_lea.hbm %s5535_s6, 5120 }
  0x7a   :  { %p4262_p0 = scmp.ne.s32.totalorder %s5535_s6, %s4261_s26  ;;  %p4265_p1 = scmp.lt.u32.totalorder %s4261_s26, %s5535_s6 }
  0x7c   :  { %p4267_p2 = pnand %p4265_p1, %p4262_p0 }
  0x7e   :  { %4270 = shalt.err (!%p4267_p2)
}
  0x7f   :  { %s4271_s0 = scalar_lea.vmem %s4565_s3, 5120  ;;  %p4276_p4 = scmp.lt.s32.totalorder %s4565_s3, %s4565_s3 }
  0x80   :  { %p4272_p3 = scmp.ne.s32.totalorder %s4565_s3, %s4271_s0  ;;  %p4277_p5 = scmp.lt.s32.totalorder %s4271_s0, %s4271_s0 }
  0x82   :  { %p4278_p6 = por %p4277_p5, %p4276_p4 }
  0x84   :  { %p4279_p7 = pnand %p4278_p6, %p4272_p3 }
  0x86   :  { %4282 = shalt.err (!%p4279_p7)
}
  0x87   :  { %s4397_s4 = smov 64   ;;  %s4398_s13 = smov 4  }
  0x88   :  { %104 = dma.hbm_to_vmem [thread:$0]  %s5535_s6, 5120, %s4565_s3, [#allocation12], %s4397_s4, %s4397_s4, %s4398_s13  }
  0x89   :  { %s4399_s17 = smov [#allocation16]   ;;  %s4400_s19 = smov [#allocation17]  }
  0x8a   :  { %s120_s20 = sshll.u32 %s4399_s17, 4  ;;  %s133_s21 = sshll.u32 %s4400_s19, 4  ;;  %s121_s20 = int_to_ptr.vmem [resolvable:$true] %s120_s20  ;;  %s134_s21 = int_to_ptr.vmem [resolvable:$true] %s133_s21 }
  0x8b   :  { %s4283_s27 = scalar_lea.hbm %s5537_s8, 1024 }
  0x8c   :  { %p4284_p8 = scmp.ne.s32.totalorder %s5537_s8, %s4283_s27  ;;  %p4287_p9 = scmp.lt.u32.totalorder %s4283_s27, %s5537_s8 }
  0x8e   :  { %p4289_p10 = pnand %p4287_p9, %p4284_p8 }
  0x90   :  { %4292 = shalt.err (!%p4289_p10)
}
  0x91   :  { %s4293_s6 = scalar_lea.vmem %s121_s20, 1024  ;;  %p4298_p12 = scmp.lt.s32.totalorder %s121_s20, %s121_s20 }
  0x92   :  { %p4294_p11 = scmp.ne.s32.totalorder %s121_s20, %s4293_s6  ;;  %p4299_p13 = scmp.lt.s32.totalorder %s4293_s6, %s4293_s6 }
  0x94   :  { %p4300_p0 = por %p4299_p13, %p4298_p12 }
  0x96   :  { %p4301_p1 = pnand %p4300_p0, %p4294_p11 }
  0x98   :  { %4304 = shalt.err (!%p4301_p1)
}
  0x99   :  { %126 = dma.hbm_to_vmem [thread:$0]  %s5537_s8, 1024, %s121_s20, [#allocation15], %s4397_s4, %s4397_s4, %s4398_s13  }
  0x9a   :  { %s4305_s28 = scalar_lea.hbm %s5538_s9, 16 }
  0x9b   :  { %p4306_p2 = scmp.ne.s32.totalorder %s5538_s9, %s4305_s28  ;;  %p4309_p3 = scmp.lt.u32.totalorder %s4305_s28, %s5538_s9 }
  0x9d   :  { %p4311_p4 = pnand %p4309_p3, %p4306_p2 }
  0x9f   :  { %4314 = shalt.err (!%p4311_p4)
}
  0xa0   :  { %s4315_s14 = scalar_lea.vmem %s134_s21, 16  ;;  %s4319_s16 = scalar_lea.vmem %s134_s21, 32 }
  0xa1   :  { %p4316_p5 = scmp.ne.s32.totalorder %s134_s21, %s4315_s14  ;;  %p4320_p6 = scmp.lt.s32.totalorder %s134_s21, %s134_s21 }
  0xa2   :  { %p4321_p7 = scmp.lt.s32.totalorder %s4319_s16, %s4315_s14 }
  0xa4   :  { %p4322_p8 = por %p4321_p7, %p4320_p6 }
  0xa6   :  { %p4323_p9 = pnand %p4322_p8, %p4316_p5 }
  0xa8   :  { %4326 = shalt.err (!%p4323_p9)
}
  0xa9   :  { %136 = dma.hbm_to_vmem [thread:$0]  %s5538_s9, 16, %s134_s21, [#allocation18]  }
  0xaa   :  { %4371 = dma.done.wait [#allocation3], 4864  }
  0xab   :  { %4372 = vsyncadd [#allocation3], 4294962432 }
  0xac   :  { %4373 = dma.done.wait [#allocation6], 9728  }
  0xad   :  { %4374 = vsyncadd [#allocation6], 4294957568 }
  0xae   :  { %4375 = dma.done.wait [#allocation9], 1216  }
  0xaf   :  { %4376 = vsyncadd [#allocation9], 4294966080 }
  0xb0   :  { %4377 = dma.done.wait [#allocation12], 5152  }
  0xb1   :  { %4378 = vsyncadd [#allocation12], 4294962144 }
  0xb2   :  { %4379 = dma.done.wait [#allocation15], 1152  }
  0xb3   :  { %4380 = vsyncadd [#allocation15], 4294966144 }
  0xb4   :  { %4381 = dma.done.wait [#allocation18], 16  }
  0xb5   :  { %4382 = vsyncadd [#allocation18], 4294967280  ;;  %vm359_vm0 = vcmask 1040384   ;;  %v4401_v0 = vmov 0   ;;  %vm360_vm1 = vcmask 1041408   ;;  %v4402_v1 = vmov 65535  }
  0xb6   :  { %401 = vmatprep.mubr.bf16.mxu0 %v4401_v0  ;;  %v361_v2 = vsel %vm359_vm0, 4294967295, %v4402_v1  ;;  %v3116_v4 = vld.sshfl [vmem:[#allocation10] sm:$0x33 pattern:$0x76325410]  ;;  %v225_v7 = vld [vmem:[#allocation5] sm:$0xff] }
  0xb7   :  { %v362_v3 = vsel %vm360_vm1, %v361_v2, 0  ;;  %v300_v5 = vcombine.high %v3116_v4, %v3116_v4  ;;  %v226_v8 = vld [vmem:[#allocation5 + $0x8] sm:$0xff]  ;;  %vm301_vm2 = vcmask 23552   ;;  %v4051_v13 = vld [vmem:[#allocation8 + $0x14] ss:$8 sps:$4 sm:$0xff]   ;;  %vm695_vm3 = vcmask 1042432  }
  0xb8   :  { %v364_v6 = vand.u32 %v3116_v4, %v362_v3  ;;  %v4048_v10 = vld [vmem:[#allocation8 + $0x4] ss:$8 sps:$4 sm:$0xff]   ;;  %v263_v11 = vpack.c.bf16 %v226_v8, %v225_v7  ;;  %v4046_v12 = vld [vmem:[#allocation8] ss:$8 sps:$4 sm:$0xff]   ;;  %v227_v14 = vld [vmem:[#allocation5 + $0x10] sm:$0xff]  ;;  %v696_v19 = vsel %vm360_vm1, 4294967295, %v4402_v1 }
  0xb9   :  { %v367_v9 = vand.u32 %v362_v3, %v300_v5  ;;  %v228_v15 = vld [vmem:[#allocation5 + $0x18] sm:$0xff]  ;;  %v4054_v17 = vld [vmem:[#allocation8 + $0x24] ss:$8 sps:$4 sm:$0xff]   ;;  %v4052_v21 = vld [vmem:[#allocation8 + $0x20] ss:$8 sps:$4 sm:$0xff]   ;;  %v697_v24 = vsel %vm695_vm3, %v696_v19, 0 }
  0xba   :  { %v4049_v16 = vld [vmem:[#allocation8 + $0x10] ss:$8 sps:$4 sm:$0xff]   ;;  %v290_v18 = vld [vmem:[#allocation8 + $0x40] sm:$0x77]  ;;  %v264_v20 = vpack.c.bf16 %v228_v15, %v227_v14  ;;  %v4057_v22 = vld [vmem:[#allocation8 + $0x34] ss:$8 sps:$4 sm:$0xff]  }
  0xbb   :  { %369 = vmatprep.subr.bf16.mxu0 %v367_v9  ;;  %v3145_v23 = vcombine.high %v290_v18, %v290_v18  ;;  %v3144_v25 = vcombine.low %v290_v18, %v290_v18  ;;  %v229_v26 = vld [vmem:[#allocation5 + $0x20] sm:$0xff]  ;;  %v230_v27 = vld [vmem:[#allocation5 + $0x28] sm:$0xff]  ;;  %v4055_v28 = vld [vmem:[#allocation8 + $0x30] ss:$8 sps:$4 sm:$0xff]   ;;  %vm637_vm4 = vcmask 564224   ;;  %vm4404_vm5 = vmmov 0  }
  0xbc   :  { %370 = vmatpush1.bf16.msra.mxu0 %v364_v6  ;;  %v265_v30 = vpack.c.bf16 %v230_v27, %v229_v26  ;;  %v231_v32 = vld [vmem:[#allocation5 + $0x30] sm:$0xff]  ;;  %v232_v33 = vld [vmem:[#allocation5 + $0x38] sm:$0xff]  ;;  %v233_v35 = vld [vmem:[#allocation5 + $0x40] sm:$0xff]  ;;  %s4405_s9 = smov [#allocation20]   ;;  %vm2962_vm6 = vcmask 19456   ;;  %s4406_s17 = smov [#allocation19]  }
  0xbd   :  { %704 = vmatprep.subr.bf16.mxu0 %v4048_v10  ;;  %v702_v29 = vand.u32 %v3145_v23, %v697_v24  ;;  %v699_v31 = vand.u32 %v3144_v25, %v697_v24  ;;  %v266_v34 = vpack.c.bf16 %v232_v33, %v231_v32  ;;  %v234_v36 = vld [vmem:[#allocation5 + $0x48] sm:$0xff]  ;;  %v235_v38 = vld [vmem:[#allocation5 + $0x50] sm:$0xff]  ;;  %v236_v39 = vld [vmem:[#allocation5 + $0x58] sm:$0xff]  ;;  %s3095_s13 = sshll.u32 %s4405_s9, 4  ;;  %s3083_s20 = sshll.u32 %s4406_s17, 4  ;;  %s3096_s13 = int_to_ptr.vmem [resolvable:$true] %s3095_s13  ;;  %s5491_s20 = int_to_ptr.vmem [resolvable:$true] %s3083_s20 }
  0xbe   :  { %v267_v37 = vpack.c.bf16 %v234_v36, %v233_v35  ;;  %v268_v40 = vpack.c.bf16 %v236_v39, %v235_v38  ;;  %v237_v41 = vld [vmem:[#allocation5 + $0x60] sm:$0xff]  ;;  %v238_v42 = vld [vmem:[#allocation5 + $0x68] sm:$0xff]  ;;  %v239_v44 = vld [vmem:[#allocation5 + $0x70] sm:$0xff]  ;;  %s4327_s19 = scalar_lea.vmem %s3096_s13, 4864  ;;  %p4332_p11 = scmp.lt.s32.totalorder %s3096_s13, %s3096_s13 }
  0xbf   :  { %3117 = vmatmul.mubr.msk.bf16.vlgmr.msra.gmra.mrb[0].mxu0 %vm301_vm2, %v263_v11  ;;  %v269_v43 = vpack.c.bf16 %v238_v42, %v237_v41  ;;  %v240_v45 = vld [vmem:[#allocation5 + $0x78] sm:$0xff]  ;;  %v241_v47 = vld [vmem:[#allocation5 + $0x80] sm:$0xff]  ;;  %v242_v48 = vld [vmem:[#allocation5 + $0x88] sm:$0xff]  ;;  %p4328_p10 = scmp.ne.s32.totalorder %s3096_s13, %s4327_s19  ;;  %p4333_p12 = scmp.lt.s32.totalorder %s4327_s19, %s4327_s19 }
  0xc0   :  { %705 = vmatpush1.bf16.msra.mxu0 %v4046_v12  ;;  %411 = vmatprep.mubr.bf16.mxu0 %v4401_v0  ;;  %v270_v46 = vpack.c.bf16 %v240_v45, %v239_v44  ;;  %v271_v49 = vpack.c.bf16 %v242_v48, %v241_v47  ;;  %v243_v50 = vld [vmem:[#allocation5 + $0x90] sm:$0xff]  ;;  %v244_v51 = vld [vmem:[#allocation5 + $0x98] sm:$0xff]  ;;  %v245_v53 = vld [vmem:[#allocation5 + $0xa0] sm:$0xff] }
  0xc1   :  { %706 = vmatprep.subr.bf16.mxu0 %v4051_v13  ;;  %v272_v52 = vpack.c.bf16 %v244_v51, %v243_v50  ;;  %v246_v54 = vld [vmem:[#allocation5 + $0xa8] sm:$0xff]  ;;  %v247_v56 = vld [vmem:[#allocation5 + $0xb0] sm:$0xff]  ;;  %v248_v57 = vld [vmem:[#allocation5 + $0xb8] sm:$0xff]  ;;  %p4334_p13 = por %p4333_p12, %p4332_p11 }
  0xc2   :  { %v273_v55 = vpack.c.bf16 %v246_v54, %v245_v53  ;;  %v274_v58 = vpack.c.bf16 %v248_v57, %v247_v56  ;;  %v249_v59 = vld [vmem:[#allocation5 + $0xc0] sm:$0xff]  ;;  %v250_v60 = vld [vmem:[#allocation5 + $0xc8] sm:$0xff]  ;;  %v251_v62 = vld [vmem:[#allocation5 + $0xd0] sm:$0xff]  ;;  %v929_v57 = vlaneseq }
  0xc3   :  { %v275_v61 = vpack.c.bf16 %v250_v60, %v249_v59  ;;  %v252_v63 = vld [vmem:[#allocation5 + $0xd8] sm:$0xff]  ;;  %v253_v2 = vld [vmem:[#allocation5 + $0xe0] sm:$0xff]  ;;  %v254_v3 = vld [vmem:[#allocation5 + $0xe8] sm:$0xff]  ;;  %p4335_p0 = pnand %p4334_p13, %p4328_p10 }
  0xc4   :  { %707 = vmatpush1.bf16.msra.mxu0 %v4049_v16  ;;  %v276_v1 = vpack.c.bf16 %v252_v63, %v251_v62  ;;  %v277_v4 = vpack.c.bf16 %v254_v3, %v253_v2  ;;  %v255_v5 = vld [vmem:[#allocation5 + $0xf0] sm:$0xff]  ;;  %v256_v6 = vld [vmem:[#allocation5 + $0xf8] sm:$0xff]  ;;  %v257_v8 = vld [vmem:[#allocation5 + $0x100] sm:$0xff] }
  0xc5   :  { %708 = vmatprep.subr.bf16.mxu0 %v4054_v17  ;;  %v278_v7 = vpack.c.bf16 %v256_v6, %v255_v5  ;;  %v258_v9 = vld [vmem:[#allocation5 + $0x108] sm:$0xff]  ;;  %v259_v11 = vld [vmem:[#allocation5 + $0x110] sm:$0xff]  ;;  %v260_v12 = vld [vmem:[#allocation5 + $0x118] sm:$0xff] }
  0xc6   :  { %v279_v10 = vpack.c.bf16 %v258_v9, %v257_v8  ;;  %v280_v13 = vpack.c.bf16 %v260_v12, %v259_v11  ;;  %v261_v14 = vld [vmem:[#allocation5 + $0x120] sm:$0xff]  ;;  %v262_v15 = vld [vmem:[#allocation5 + $0x128] sm:$0xf]  ;;  %v168_v17 = vld [vmem:[#allocation2] sm:$0xff] }
  0xc7   :  { %3118 = vmatmul.mubr.msk.bf16.gmra.mrb[4].mxu0 %vm301_vm2, %v264_v20  ;;  %v281_v16 = vpack.c.bf16 %v262_v15, %v261_v14  ;;  %v169_v18 = vld [vmem:[#allocation2 + $0x8] sm:$0xff]  ;;  %v170_v20 = vld [vmem:[#allocation2 + $0x10] sm:$0xff]  ;;  %v172_v23 = vld [vmem:[#allocation2 + $0x20] sm:$0xff] }
  0xc8   :  { %421 = vmatprep.mubr.bf16.mxu0 %v4401_v0  ;;  %709 = vmatpush1.bf16.msra.mxu0 %v4052_v21  ;;  %v206_v19 = vpack.c.bf16 %v169_v18, %v168_v17  ;;  %v171_v21 = vld [vmem:[#allocation2 + $0x18] sm:$0xff]  ;;  %v173_v24 = vld [vmem:[#allocation2 + $0x28] sm:$0xff]  ;;  %v174_v27 = vld [vmem:[#allocation2 + $0x30] sm:$0xff] }
  0xc9   :  { %710 = vmatprep.subr.bf16.mxu0 %v4057_v22  ;;  %v207_v22 = vpack.c.bf16 %v171_v21, %v170_v20  ;;  %v208_v25 = vpack.c.bf16 %v173_v24, %v172_v23  ;;  %v4059_v26 = vld [vmem:[#allocation13] sm:$0xff]   ;;  %v4061_v32 = vld [vmem:[#allocation13 + $0x10] sm:$0xff]   ;;  %v4062_v35 = vld [vmem:[#allocation13 + $0x18] sm:$0xff]  }
  0xca   :  { %v176_v33 = vld [vmem:[#allocation2 + $0x40] sm:$0xff]  ;;  %v178_v38 = vld [vmem:[#allocation2 + $0x50] sm:$0xff]  ;;  %v179_v39 = vld [vmem:[#allocation2 + $0x58] sm:$0xff] }
  0xcb   :  { %v211_v41 = vpack.c.bf16 %v179_v39, %v178_v38  ;;  %v180_v42 = vld [vmem:[#allocation2 + $0x60] sm:$0xff]  ;;  %v182_v45 = vld [vmem:[#allocation2 + $0x70] sm:$0xff]  ;;  %v191_v60 = vld [vmem:[#allocation2 + $0xb8] sm:$0xff] }
  0xcc   :  { %711 = vmatpush1.bf16.msra.mxu0 %v4055_v28  ;;  %v175_v28 = vld [vmem:[#allocation2 + $0x38] sm:$0xff]  ;;  %v184_v48 = vld [vmem:[#allocation2 + $0x80] sm:$0xff]  ;;  %v186_v51 = vld [vmem:[#allocation2 + $0x90] sm:$0xff] }
  0xcd   :  { %712 = vmatprep.subr.bf16.mxu0 %v702_v29  ;;  %v4403_v29 = vmov 0.0   ;;  %v188_v54 = vld [vmem:[#allocation2 + $0xa0] sm:$0xff]  ;;  %v190_v59 = vld [vmem:[#allocation2 + $0xb0] sm:$0xff]  ;;  %v193_v5 = vld [vmem:[#allocation2 + $0xc8] sm:$0xff] }
  0xce   :  { %3381 = vmatprep.subr.bf16.mxu1 %v4403_v29  ;;  %v217_v2 = vpack.c.bf16 %v191_v60, %v190_v59  ;;  %v4066_v3 = vld [vmem:[#allocation13 + $0x38] sm:$0xff]   ;;  %3397 = vmatprep.mubr.msk.bf16.mxu1 %vm4404_vm5, %v4403_v29  ;;  %v197_v11 = vld [vmem:[#allocation2 + $0xe8] sm:$0xff] }
  0xcf   :  { %3119 = vmatmul.mubr.msk.bf16.gmra.mrb[8].mxu0 %vm301_vm2, %v265_v30  ;;  %3382 = vmatpush3.bf16.msra.mxu1 %v4059_v26  ;;  %v4060_v30 = vld [vmem:[#allocation13 + $0x8] sm:$0xff]   ;;  %v195_v8 = vld [vmem:[#allocation2 + $0xd8] sm:$0xff] }
  0xd0   :  { %431 = vmatprep.mubr.bf16.mxu0 %v4401_v0  ;;  %713 = vmatpush1.bf16.msra.mxu0 %v699_v31  ;;  %v209_v31 = vpack.c.bf16 %v175_v28, %v174_v27  ;;  %v199_v14 = vld [vmem:[#allocation2 + $0xf8] sm:$0xff]  ;;  %v201_v17 = vld [vmem:[#allocation2 + $0x108] sm:$0xff] }
  0xd1   :  { %3565 = vmatprep.subr.bf16.mxu0 %v4403_v29  ;;  %3383 = vmatprep.subr.bf16.mxu1 %v4403_v29  ;;  %v203_v20 = vld [vmem:[#allocation2 + $0x118] sm:$0xff]  ;;  %v205_v23 = vld [vmem:[#allocation2 + $0x128] sm:$0xf] }
  0xd3   :  { %3384 = vmatpush3.bf16.msra.mxu1 %v4060_v30 }
  0xd4   :  { %3385 = vmatprep.subr.bf16.mxu1 %v4403_v29 }
  0xd7   :  { %3120 = vmatmul.mubr.msk.bf16.gmra.mrb[12].mxu0 %vm301_vm2, %v266_v34  ;;  %v177_v34 = vld [vmem:[#allocation2 + $0x48] sm:$0xff]  ;;  %3386 = vmatpush3.bf16.msra.mxu1 %v4061_v32 }
  0xd8   :  { %441 = vmatprep.mubr.bf16.mxu0 %v4401_v0  ;;  %3387 = vmatprep.subr.bf16.mxu1 %v4403_v29  ;;  %v210_v36 = vpack.c.bf16 %v177_v34, %v176_v33 }
  0xdb   :  { %3388 = vmatpush3.bf16.msra.mxu1 %v4062_v35  ;;  %v4067_v35 = vld [vmem:[#allocation13 + $0x40] sm:$0xff]  }
  0xdc   :  { %3389 = vmatprep.subr.bf16.mxu1 %v4403_v29 }
  0xdf   :  { %3121 = vmatmul.mubr.msk.bf16.gmra.mrb[16].mxu0 %vm301_vm2, %v267_v37  ;;  %v4063_v37 = vld [vmem:[#allocation13 + $0x20] sm:$0xff]  }
  0xe0   :  { %451 = vmatprep.mubr.bf16.mxu0 %v4401_v0  ;;  %3390 = vmatpush3.bf16.msra.mxu1 %v4063_v37 }
  0xe1   :  { %3391 = vmatprep.subr.bf16.mxu1 %v4403_v29 }
  0xe7   :  { %3122 = vmatmul.mubr.msk.bf16.gmra.mrb[20].mxu0 %vm301_vm2, %v268_v40  ;;  %v4064_v40 = vld [vmem:[#allocation13 + $0x28] sm:$0xff]  }
  0xe8   :  { %461 = vmatprep.mubr.bf16.mxu0 %v4401_v0  ;;  %3392 = vmatpush3.bf16.msra.mxu1 %v4064_v40 }
  0xe9   :  { %3393 = vmatprep.subr.bf16.mxu1 %v4403_v29 }
  0xef   :  { %3123 = vmatmul.mubr.msk.bf16.gmra.mrb[24].mxu0 %vm301_vm2, %v269_v43  ;;  %v181_v43 = vld [vmem:[#allocation2 + $0x68] sm:$0xff] }
  0xf0   :  { %471 = vmatprep.mubr.bf16.mxu0 %v4401_v0  ;;  %v212_v44 = vpack.c.bf16 %v181_v43, %v180_v42 }
  0xf7   :  { %3124 = vmatmul.mubr.msk.bf16.gmra.mrb[28].mxu0 %vm301_vm2, %v270_v46  ;;  %v183_v46 = vld [vmem:[#allocation2 + $0x78] sm:$0xff] }
  0xf8   :  { %481 = vmatprep.mubr.bf16.mxu0 %v4401_v0  ;;  %v213_v47 = vpack.c.bf16 %v183_v46, %v182_v45  ;;  %v4069_v46 = vld [vmem:[#allocation13 + $0x50] sm:$0xff]  }
  0xff   :  { %3125 = vmatmul.mubr.msk.bf16.gmra.mrb[32].mxu0 %vm301_vm2, %v271_v49  ;;  %v185_v49 = vld [vmem:[#allocation2 + $0x88] sm:$0xff] }
 0x100   :  { %491 = vmatprep.mubr.bf16.mxu0 %v4401_v0  ;;  %v214_v50 = vpack.c.bf16 %v185_v49, %v184_v48 }
 0x107   :  { %3126 = vmatmul.mubr.msk.bf16.gmra.mrb[36].mxu0 %vm301_vm2, %v272_v52  ;;  %v187_v52 = vld [vmem:[#allocation2 + $0x98] sm:$0xff] }
 0x108   :  { %501 = vmatprep.mubr.bf16.mxu0 %v4401_v0  ;;  %v215_v53 = vpack.c.bf16 %v187_v52, %v186_v51  ;;  %v4070_v52 = vld [vmem:[#allocation13 + $0x58] sm:$0xff]  }
 0x10f   :  { %3127 = vmatmul.mubr.msk.bf16.gmra.mrb[40].mxu0 %vm301_vm2, %v273_v55  ;;  %v189_v55 = vld [vmem:[#allocation2 + $0xa8] sm:$0xff] }
 0x110   :  { %511 = vmatprep.mubr.bf16.mxu0 %v4401_v0  ;;  %v216_v56 = vpack.c.bf16 %v189_v55, %v188_v54 }
 0x117   :  { %3128 = vmatmul.mubr.msk.bf16.gmra.mrb[44].mxu0 %vm301_vm2, %v274_v58  ;;  %v930_v58 = vshrl.u32 %v929_v57, 7 }
 0x118   :  { %521 = vmatprep.mubr.bf16.mxu0 %v4401_v0 }
 0x119   :  { %v935_v62 = vsub.s32 1, %v930_v58 }
 0x11f   :  { %3129 = vmatmul.mubr.msk.bf16.gmra.mrb[48].mxu0 %vm301_vm2, %v275_v61  ;;  %v927_v61 = vld [vmem:[#allocation11] sm:$0x3] }
 0x120   :  { %531 = vmatprep.mubr.bf16.mxu0 %v4401_v0  ;;  %v4691_v63 = vrot.slane %v927_v61, %v935_v62 }
 0x127   :  { %3130 = vmatmul.mubr.msk.bf16.gmra.mrb[52].mxu0 %vm301_vm2, %v276_v1  ;;  %v4065_v1 = vld [vmem:[#allocation13 + $0x30] sm:$0xff]  }
 0x128   :  { %541 = vmatprep.mubr.bf16.mxu0 %v4401_v0  ;;  %3394 = vmatpush3.bf16.msra.mxu1 %v4065_v1 }
 0x129   :  { %3395 = vmatprep.subr.bf16.mxu1 %v4403_v29 }
 0x12c   :  { %3396 = vmatpush3.bf16.msra.mxu1 %v4066_v3  ;;  %v4072_v3 = vld [vmem:[#allocation13 + $0x68] sm:$0xff]  }
 0x12d   :  { %3473 = vmatprep.subr.bf16.mxu1 %v4403_v29 }
 0x12f   :  { %3131 = vmatmul.mubr.msk.bf16.gmra.mrb[56].mxu0 %vm301_vm2, %v277_v4  ;;  %v192_v4 = vld [vmem:[#allocation2 + $0xc0] sm:$0xff] }
 0x130   :  { %551 = vmatprep.mubr.bf16.mxu0 %v4401_v0  ;;  %v218_v6 = vpack.c.bf16 %v193_v5, %v192_v4 }
 0x137   :  { %3132 = vmatmul.mubr.msk.bf16.gmra.mrb[60].mxu0 %vm301_vm2, %v278_v7  ;;  %v194_v7 = vld [vmem:[#allocation2 + $0xd0] sm:$0xff] }
 0x138   :  { %561 = vmatprep.mubr.bf16.mxu0 %v4401_v0  ;;  %v219_v9 = vpack.c.bf16 %v195_v8, %v194_v7  ;;  %v4073_v7 = vld [vmem:[#allocation13 + $0x70] sm:$0xff]  }
 0x13f   :  { %3133 = vmatmul.mubr.msk.bf16.gmra.mrb[64].mxu0 %vm301_vm2, %v279_v10  ;;  %v196_v10 = vld [vmem:[#allocation2 + $0xe0] sm:$0xff] }
 0x140   :  { %571 = vmatprep.mubr.bf16.mxu0 %v4401_v0  ;;  %v220_v12 = vpack.c.bf16 %v197_v11, %v196_v10 }
 0x147   :  { %3134 = vmatmul.mubr.msk.bf16.gmra.mrb[68].mxu0 %vm301_vm2, %v280_v13  ;;  %v198_v13 = vld [vmem:[#allocation2 + $0xf0] sm:$0xff] }
 0x148   :  { %581 = vmatprep.mubr.bf16.mxu0 %v4401_v0  ;;  %v221_v15 = vpack.c.bf16 %v199_v14, %v198_v13  ;;  %v4074_v14 = vld [vmem:[#allocation13 + $0x78] sm:$0xff]  }
 0x14f   :  { %3135 = vmatmul.mubr.msk.bf16.gmra.mrb[72].mxu0 %vm301_vm2, %v281_v16  ;;  %v200_v16 = vld [vmem:[#allocation2 + $0x100] sm:$0xff] }
 0x150   :  { %736 = vmatprep.mubr.bf16.mxu0 %v4401_v0  ;;  %v222_v18 = vpack.c.bf16 %v201_v17, %v200_v16 }
 0x157   :  { %3146 = vmatmul.mubr.msk.bf16.vlgmr.msra.gmra.mrb[0].mxu0 %vm637_vm4, %v206_v19  ;;  %v202_v19 = vld [vmem:[#allocation2 + $0x110] sm:$0xff] }
 0x158   :  { %746 = vmatprep.mubr.bf16.mxu0 %v4401_v0  ;;  %v223_v21 = vpack.c.bf16 %v203_v20, %v202_v19 }
 0x15f   :  { %3147 = vmatmul.mubr.msk.bf16.gmra.mrb[4].mxu0 %vm637_vm4, %v207_v22  ;;  %v204_v22 = vld [vmem:[#allocation2 + $0x120] sm:$0xff] }
 0x160   :  { %756 = vmatprep.mubr.bf16.mxu0 %v4401_v0  ;;  %v224_v24 = vpack.c.bf16 %v205_v23, %v204_v22 }
 0x167   :  { %3148 = vmatmul.mubr.msk.bf16.gmra.mrb[8].mxu0 %vm637_vm4, %v208_v25  ;;  %v931_v25 = vsub.s32 0, %v930_v58 }
 0x168   :  { %766 = vmatprep.mubr.bf16.mxu0 %v4401_v0 }
 0x169   :  { %v4714_v26 = vrot.slane %v927_v61, %v931_v25  ;;  %v4071_v61 = vld [vmem:[#allocation13 + $0x60] sm:$0xff]  }
 0x16f   :  { %3149 = vmatmul.mubr.msk.bf16.gmra.mrb[12].mxu0 %vm637_vm4, %v209_v31 }
 0x170   :  { %776 = vmatprep.mubr.bf16.mxu0 %v4401_v0 }
 0x177   :  { %3150 = vmatmul.mubr.msk.bf16.gmra.mrb[16].mxu0 %vm637_vm4, %v210_v36 }
 0x178   :  { %786 = vmatprep.mubr.bf16.mxu0 %v4401_v0 }
 0x17f   :  { %3151 = vmatmul.mubr.msk.bf16.gmra.mrb[20].mxu0 %vm637_vm4, %v211_v41  ;;  %v4068_v41 = vld [vmem:[#allocation13 + $0x48] sm:$0xff]  }
 0x180   :  { %796 = vmatprep.mubr.bf16.mxu0 %v4401_v0 }
 0x187   :  { %3152 = vmatmul.mubr.msk.bf16.gmra.mrb[24].mxu0 %vm637_vm4, %v212_v44 }
 0x188   :  { %806 = vmatprep.mubr.bf16.mxu0 %v4401_v0 }
 0x18f   :  { %3153 = vmatmul.mubr.msk.bf16.gmra.mrb[28].mxu0 %vm637_vm4, %v213_v47 }
 0x190   :  { %816 = vmatprep.mubr.bf16.mxu0 %v4401_v0 }
 0x197   :  { %3154 = vmatmul.mubr.msk.bf16.gmra.mrb[32].mxu0 %vm637_vm4, %v214_v50 }
 0x198   :  { %826 = vmatprep.mubr.bf16.mxu0 %v4401_v0 }
 0x19f   :  { %3155 = vmatmul.mubr.msk.bf16.gmra.mrb[36].mxu0 %vm637_vm4, %v215_v53 }
 0x1a0   :  { %836 = vmatprep.mubr.bf16.mxu0 %v4401_v0 }
 0x1a7   :  { %3156 = vmatmul.mubr.msk.bf16.gmra.mrb[40].mxu0 %vm637_vm4, %v216_v56 }
 0x1a8   :  { %846 = vmatprep.mubr.bf16.mxu0 %v4401_v0 }
 0x1af   :  { %3157 = vmatmul.mubr.msk.bf16.gmra.mrb[44].mxu0 %vm637_vm4, %v217_v2 }
 0x1b0   :  { %856 = vmatprep.mubr.bf16.mxu0 %v4401_v0 }
 0x1b7   :  { %3158 = vmatmul.mubr.msk.bf16.gmra.mrb[48].mxu0 %vm637_vm4, %v218_v6 }
 0x1b8   :  { %866 = vmatprep.mubr.bf16.mxu0 %v4401_v0 }
 0x1bf   :  { %3159 = vmatmul.mubr.msk.bf16.gmra.mrb[52].mxu0 %vm637_vm4, %v219_v9 }
 0x1c0   :  { %876 = vmatprep.mubr.bf16.mxu0 %v4401_v0 }
 0x1c7   :  { %3160 = vmatmul.mubr.msk.bf16.gmra.mrb[56].mxu0 %vm637_vm4, %v220_v12 }
 0x1c8   :  { %886 = vmatprep.mubr.bf16.mxu0 %v4401_v0 }
 0x1cf   :  { %3161 = vmatmul.mubr.msk.bf16.gmra.mrb[60].mxu0 %vm637_vm4, %v221_v15 }
 0x1d0   :  { %896 = vmatprep.mubr.bf16.mxu0 %v4401_v0 }
 0x1d7   :  { %3162 = vmatmul.mubr.msk.bf16.gmra.mrb[64].mxu0 %vm637_vm4, %v222_v18 }
 0x1d8   :  { %906 = vmatprep.mubr.bf16.mxu0 %v4401_v0 }
 0x1df   :  { %3163 = vmatmul.mubr.msk.bf16.gmra.mrb[68].mxu0 %vm637_vm4, %v223_v21 }
 0x1e0   :  { %916 = vmatprep.mubr.bf16.mxu0 %v4401_v0 }
 0x1e7   :  { %3164 = vmatmul.mubr.msk.bf16.gmra.mrb[72].mxu0 %vm637_vm4, %v224_v24 }
 0x1e8   :  { %3581 = vmatprep.mubr.msk.bf16.mxu0 %vm4404_vm5, %v4403_v29 }
 0x22a   :  { %v738_v27 = vpop.f32.mrb[0].mxu0 }
 0x22b   :  { %v939_v28 = vadd.f32 %v4714_v26, %v738_v27  ;;  %v4717_v30 = vpop.f32.mrb[1].mxu0 }
 0x22c   :  { %v742_v31 = vpop.f32.mrb[2].mxu0 }
 0x22d   :  { %v941_v32 = vadd.f32 %v4714_v26, %v742_v31  ;;  %v4720_v0 = vpop.f32.mrb[3].mxu0  ;;  %v1015_v33 = vmax.f32 %v939_v28, 0.0 }
 0x22f   :  { %v1016_v34 = vmax.f32 %v941_v32, 0.0 }
 0x231   :  { %v1053_v36 = vpack.c.bf16 %v1016_v34, %v1015_v33 }
 0x232   :  { %v748_v37 = vpop.f32.mrb[4].mxu0 }
 0x233   :  { %v943_v38 = vadd.f32 %v4714_v26, %v748_v37  ;;  %v4723_v39 = vpop.f32.mrb[5].mxu0  ;;  %3398 = vmatmul.mubr.bf16.vlgmr.msra.gmra.mrb[0].mxu1 %v1053_v36 }
 0x234   :  { %v752_v40 = vpop.f32.mrb[6].mxu0  ;;  %3401 = vmatprep.mubr.msk.bf16.mxu1 %vm4404_vm5, %v4403_v29  ;;  %3474 = vmatpush3.bf16.msra.mxu1 %v4067_v35 }
 0x235   :  { %v945_v42 = vadd.f32 %v4714_v26, %v752_v40  ;;  %v4728_v43 = vpop.f32.mrb[7].mxu0  ;;  %3475 = vmatprep.subr.bf16.mxu1 %v4403_v29  ;;  %v1017_v44 = vmax.f32 %v943_v38, 0.0 }
 0x237   :  { %v1018_v45 = vmax.f32 %v945_v42, 0.0 }
 0x238   :  { %3476 = vmatpush3.bf16.msra.mxu1 %v4068_v41 }
 0x239   :  { %v1054_v47 = vpack.c.bf16 %v1018_v45, %v1017_v44  ;;  %3477 = vmatprep.subr.bf16.mxu1 %v4403_v29 }
 0x23a   :  { %v758_v48 = vpop.f32.mrb[8].mxu0 }
 0x23b   :  { %v947_v49 = vadd.f32 %v4714_v26, %v758_v48  ;;  %v4733_v50 = vpop.f32.mrb[9].mxu0  ;;  %3402 = vmatmul.mubr.bf16.gmra.mrb[4].mxu1 %v1054_v47 }
 0x23c   :  { %v762_v51 = vpop.f32.mrb[10].mxu0  ;;  %3405 = vmatprep.mubr.msk.bf16.mxu1 %vm4404_vm5, %v4403_v29  ;;  %3478 = vmatpush3.bf16.msra.mxu1 %v4069_v46 }
 0x23d   :  { %v949_v53 = vadd.f32 %v4714_v26, %v762_v51  ;;  %v4738_v54 = vpop.f32.mrb[11].mxu0  ;;  %3479 = vmatprep.subr.bf16.mxu1 %v4403_v29  ;;  %v1019_v55 = vmax.f32 %v947_v49, 0.0 }
 0x23f   :  { %v1020_v56 = vmax.f32 %v949_v53, 0.0 }
 0x240   :  { %3480 = vmatpush3.bf16.msra.mxu1 %v4070_v52 }
 0x241   :  { %v1055_v57 = vpack.c.bf16 %v1020_v56, %v1019_v55  ;;  %3481 = vmatprep.subr.bf16.mxu1 %v4403_v29 }
 0x242   :  { %v768_v58 = vpop.f32.mrb[12].mxu0 }
 0x243   :  { %v951_v59 = vadd.f32 %v4714_v26, %v768_v58  ;;  %v4743_v60 = vpop.f32.mrb[13].mxu0  ;;  %3406 = vmatmul.mubr.bf16.gmra.mrb[8].mxu1 %v1055_v57 }
 0x244   :  { %v772_v62 = vpop.f32.mrb[14].mxu0  ;;  %3409 = vmatprep.mubr.msk.bf16.mxu1 %vm4404_vm5, %v4403_v29  ;;  %3482 = vmatpush3.bf16.msra.mxu1 %v4071_v61 }
 0x245   :  { %v953_v1 = vadd.f32 %v4714_v26, %v772_v62  ;;  %v4748_v2 = vpop.f32.mrb[15].mxu0  ;;  %3483 = vmatprep.subr.bf16.mxu1 %v4403_v29  ;;  %v1021_v4 = vmax.f32 %v951_v59, 0.0 }
 0x247   :  { %v1022_v5 = vmax.f32 %v953_v1, 0.0 }
 0x248   :  { %3484 = vmatpush3.bf16.msra.mxu1 %v4072_v3 }
 0x249   :  { %v1056_v6 = vpack.c.bf16 %v1022_v5, %v1021_v4  ;;  %3485 = vmatprep.subr.bf16.mxu1 %v4403_v29 }
 0x24a   :  { %v778_v8 = vpop.f32.mrb[16].mxu0 }
 0x24b   :  { %v955_v9 = vadd.f32 %v4714_v26, %v778_v8  ;;  %v4753_v10 = vpop.f32.mrb[17].mxu0  ;;  %3410 = vmatmul.mubr.bf16.gmra.mrb[12].mxu1 %v1056_v6 }
 0x24c   :  { %v782_v11 = vpop.f32.mrb[18].mxu0  ;;  %3413 = vmatprep.mubr.msk.bf16.mxu1 %vm4404_vm5, %v4403_v29  ;;  %3486 = vmatpush3.bf16.msra.mxu1 %v4073_v7 }
 0x24d   :  { %v957_v12 = vadd.f32 %v4714_v26, %v782_v11  ;;  %v4758_v13 = vpop.f32.mrb[19].mxu0  ;;  %3487 = vmatprep.subr.bf16.mxu1 %v4403_v29  ;;  %v1023_v15 = vmax.f32 %v955_v9, 0.0 }
 0x24f   :  { %v1024_v16 = vmax.f32 %v957_v12, 0.0 }
 0x250   :  { %3488 = vmatpush3.bf16.msra.mxu1 %v4074_v14 }
 0x251   :  { %v1057_v17 = vpack.c.bf16 %v1024_v16, %v1023_v15  ;;  %3657 = vmatprep.subr.bf16.mxu1 %v4403_v29 }
 0x252   :  { %v788_v18 = vpop.f32.mrb[20].mxu0 }
 0x253   :  { %v959_v19 = vadd.f32 %v4714_v26, %v788_v18  ;;  %v4763_v20 = vpop.f32.mrb[21].mxu0  ;;  %3414 = vmatmul.mubr.bf16.gmra.mrb[16].mxu1 %v1057_v17 }
 0x254   :  { %v792_v21 = vpop.f32.mrb[22].mxu0  ;;  %3417 = vmatprep.mubr.msk.bf16.mxu1 %vm4404_vm5, %v4403_v29 }
 0x255   :  { %v961_v22 = vadd.f32 %v4714_v26, %v792_v21  ;;  %v4768_v23 = vpop.f32.mrb[23].mxu0  ;;  %v1025_v24 = vmax.f32 %v959_v19, 0.0 }
 0x257   :  { %v1026_v25 = vmax.f32 %v961_v22, 0.0 }
 0x259   :  { %v1058_v27 = vpack.c.bf16 %v1026_v25, %v1025_v24 }
 0x25a   :  { %v798_v28 = vpop.f32.mrb[24].mxu0 }
 0x25b   :  { %v963_v31 = vadd.f32 %v4714_v26, %v798_v28  ;;  %v4771_v32 = vpop.f32.mrb[25].mxu0  ;;  %3418 = vmatmul.mubr.bf16.gmra.mrb[20].mxu1 %v1058_v27 }
 0x25c   :  { %v802_v33 = vpop.f32.mrb[26].mxu0  ;;  %3421 = vmatprep.mubr.msk.bf16.mxu1 %vm4404_vm5, %v4403_v29 }
 0x25d   :  { %v965_v34 = vadd.f32 %v4714_v26, %v802_v33  ;;  %v4776_v35 = vpop.f32.mrb[27].mxu0  ;;  %v1027_v36 = vmax.f32 %v963_v31, 0.0 }
 0x25f   :  { %v1028_v37 = vmax.f32 %v965_v34, 0.0 }
 0x261   :  { %v1059_v38 = vpack.c.bf16 %v1028_v37, %v1027_v36 }
 0x262   :  { %v808_v40 = vpop.f32.mrb[28].mxu0 }
 0x263   :  { %v967_v41 = vadd.f32 %v4714_v26, %v808_v40  ;;  %v4779_v42 = vpop.f32.mrb[29].mxu0  ;;  %3422 = vmatmul.mubr.bf16.gmra.mrb[24].mxu1 %v1059_v38 }
 0x264   :  { %v812_v44 = vpop.f32.mrb[30].mxu0  ;;  %3425 = vmatprep.mubr.msk.bf16.mxu1 %vm4404_vm5, %v4403_v29 }
 0x265   :  { %v969_v45 = vadd.f32 %v4714_v26, %v812_v44  ;;  %v4784_v46 = vpop.f32.mrb[31].mxu0  ;;  %v1029_v47 = vmax.f32 %v967_v41, 0.0 }
 0x267   :  { %v1030_v48 = vmax.f32 %v969_v45, 0.0 }
 0x269   :  { %v1060_v49 = vpack.c.bf16 %v1030_v48, %v1029_v47 }
 0x26a   :  { %v818_v51 = vpop.f32.mrb[32].mxu0 }
 0x26b   :  { %v971_v52 = vadd.f32 %v4714_v26, %v818_v51  ;;  %v4787_v53 = vpop.f32.mrb[33].mxu0  ;;  %3426 = vmatmul.mubr.bf16.gmra.mrb[28].mxu1 %v1060_v49 }
 0x26c   :  { %v822_v55 = vpop.f32.mrb[34].mxu0  ;;  %3429 = vmatprep.mubr.msk.bf16.mxu1 %vm4404_vm5, %v4403_v29 }
 0x26d   :  { %v973_v56 = vadd.f32 %v4714_v26, %v822_v55  ;;  %v4792_v57 = vpop.f32.mrb[35].mxu0  ;;  %v1031_v58 = vmax.f32 %v971_v52, 0.0 }
 0x26f   :  { %v1032_v59 = vmax.f32 %v973_v56, 0.0 }
 0x271   :  { %v1061_v61 = vpack.c.bf16 %v1032_v59, %v1031_v58 }
 0x272   :  { %v828_v62 = vpop.f32.mrb[36].mxu0 }
 0x273   :  { %v975_v1 = vadd.f32 %v4714_v26, %v828_v62  ;;  %v4795_v3 = vpop.f32.mrb[37].mxu0  ;;  %3430 = vmatmul.mubr.bf16.gmra.mrb[32].mxu1 %v1061_v61 }
 0x274   :  { %v832_v4 = vpop.f32.mrb[38].mxu0  ;;  %3433 = vmatprep.mubr.msk.bf16.mxu1 %vm4404_vm5, %v4403_v29 }
 0x275   :  { %v977_v5 = vadd.f32 %v4714_v26, %v832_v4  ;;  %v4800_v6 = vpop.f32.mrb[39].mxu0  ;;  %v1033_v7 = vmax.f32 %v975_v1, 0.0 }
 0x277   :  { %v1034_v8 = vmax.f32 %v977_v5, 0.0 }
 0x279   :  { %v1062_v9 = vpack.c.bf16 %v1034_v8, %v1033_v7 }
 0x27a   :  { %v838_v11 = vpop.f32.mrb[40].mxu0 }
 0x27b   :  { %v979_v12 = vadd.f32 %v4714_v26, %v838_v11  ;;  %v4803_v14 = vpop.f32.mrb[41].mxu0  ;;  %3434 = vmatmul.mubr.bf16.gmra.mrb[36].mxu1 %v1062_v9 }
 0x27c   :  { %v842_v15 = vpop.f32.mrb[42].mxu0  ;;  %3437 = vmatprep.mubr.msk.bf16.mxu1 %vm4404_vm5, %v4403_v29 }
 0x27d   :  { %v981_v16 = vadd.f32 %v4714_v26, %v842_v15  ;;  %v4808_v17 = vpop.f32.mrb[43].mxu0  ;;  %v1035_v18 = vmax.f32 %v979_v12, 0.0 }
 0x27f   :  { %v1036_v19 = vmax.f32 %v981_v16, 0.0 }
 0x281   :  { %v1063_v21 = vpack.c.bf16 %v1036_v19, %v1035_v18 }
 0x282   :  { %v848_v22 = vpop.f32.mrb[44].mxu0 }
 0x283   :  { %v983_v24 = vadd.f32 %v4714_v26, %v848_v22  ;;  %v4811_v25 = vpop.f32.mrb[45].mxu0  ;;  %3438 = vmatmul.mubr.bf16.gmra.mrb[40].mxu1 %v1063_v21 }
 0x284   :  { %v852_v27 = vpop.f32.mrb[46].mxu0  ;;  %3441 = vmatprep.mubr.msk.bf16.mxu1 %vm4404_vm5, %v4403_v29 }
 0x285   :  { %v985_v28 = vadd.f32 %v4714_v26, %v852_v27  ;;  %v4816_v31 = vpop.f32.mrb[47].mxu0  ;;  %v1037_v33 = vmax.f32 %v983_v24, 0.0 }
 0x287   :  { %v1038_v34 = vmax.f32 %v985_v28, 0.0 }
 0x289   :  { %v1064_v36 = vpack.c.bf16 %v1038_v34, %v1037_v33 }
 0x28a   :  { %v858_v37 = vpop.f32.mrb[48].mxu0 }
 0x28b   :  { %v987_v38 = vadd.f32 %v4714_v26, %v858_v37  ;;  %v4819_v40 = vpop.f32.mrb[49].mxu0  ;;  %3442 = vmatmul.mubr.bf16.gmra.mrb[44].mxu1 %v1064_v36 }
 0x28c   :  { %v862_v41 = vpop.f32.mrb[50].mxu0  ;;  %3445 = vmatprep.mubr.msk.bf16.mxu1 %vm4404_vm5, %v4403_v29 }
 0x28d   :  { %v989_v44 = vadd.f32 %v4714_v26, %v862_v41  ;;  %v4824_v45 = vpop.f32.mrb[51].mxu0  ;;  %v1039_v47 = vmax.f32 %v987_v38, 0.0 }
 0x28f   :  { %v1040_v48 = vmax.f32 %v989_v44, 0.0 }
 0x291   :  { %v1065_v49 = vpack.c.bf16 %v1040_v48, %v1039_v47 }
 0x292   :  { %v868_v51 = vpop.f32.mrb[52].mxu0 }
 0x293   :  { %v991_v52 = vadd.f32 %v4714_v26, %v868_v51  ;;  %v4827_v55 = vpop.f32.mrb[53].mxu0  ;;  %3446 = vmatmul.mubr.bf16.gmra.mrb[48].mxu1 %v1065_v49 }
 0x294   :  { %v872_v56 = vpop.f32.mrb[54].mxu0  ;;  %3449 = vmatprep.mubr.msk.bf16.mxu1 %vm4404_vm5, %v4403_v29 }
 0x295   :  { %v993_v58 = vadd.f32 %v4714_v26, %v872_v56  ;;  %v4832_v59 = vpop.f32.mrb[55].mxu0  ;;  %v1041_v61 = vmax.f32 %v991_v52, 0.0 }
 0x297   :  { %v1042_v62 = vmax.f32 %v993_v58, 0.0 }
 0x299   :  { %v1066_v1 = vpack.c.bf16 %v1042_v62, %v1041_v61 }
 0x29a   :  { %v878_v4 = vpop.f32.mrb[56].mxu0 }
 0x29b   :  { %v995_v5 = vadd.f32 %v4714_v26, %v878_v4  ;;  %v4835_v7 = vpop.f32.mrb[57].mxu0  ;;  %3450 = vmatmul.mubr.bf16.gmra.mrb[52].mxu1 %v1066_v1 }
 0x29c   :  { %v882_v8 = vpop.f32.mrb[58].mxu0  ;;  %3453 = vmatprep.mubr.msk.bf16.mxu1 %vm4404_vm5, %v4403_v29 }
 0x29d   :  { %v997_v9 = vadd.f32 %v4714_v26, %v882_v8  ;;  %v4840_v11 = vpop.f32.mrb[59].mxu0  ;;  %v1043_v12 = vmax.f32 %v995_v5, 0.0 }
 0x29f   :  { %v1044_v15 = vmax.f32 %v997_v9, 0.0 }
 0x2a1   :  { %v1067_v16 = vpack.c.bf16 %v1044_v15, %v1043_v12 }
 0x2a2   :  { %v888_v18 = vpop.f32.mrb[60].mxu0 }
 0x2a3   :  { %v999_v19 = vadd.f32 %v4714_v26, %v888_v18  ;;  %v4843_v21 = vpop.f32.mrb[61].mxu0  ;;  %3454 = vmatmul.mubr.bf16.gmra.mrb[56].mxu1 %v1067_v16 }
 0x2a4   :  { %v892_v22 = vpop.f32.mrb[62].mxu0  ;;  %3457 = vmatprep.mubr.msk.bf16.mxu1 %vm4404_vm5, %v4403_v29 }
 0x2a5   :  { %v1001_v24 = vadd.f32 %v4714_v26, %v892_v22  ;;  %v4848_v27 = vpop.f32.mrb[63].mxu0  ;;  %v1045_v28 = vmax.f32 %v999_v19, 0.0 }
 0x2a7   :  { %v1046_v33 = vmax.f32 %v1001_v24, 0.0 }
 0x2a9   :  { %v1068_v34 = vpack.c.bf16 %v1046_v33, %v1045_v28  ;;  %v4075_v33 = vld [vmem:[#allocation13 + $0x80] sm:$0xff]  }
 0x2aa   :  { %v898_v36 = vpop.f32.mrb[64].mxu0  ;;  %3566 = vmatpush3.bf16.msra.mxu0 %v4075_v33 }
 0x2ab   :  { %v1003_v37 = vadd.f32 %v4714_v26, %v898_v36  ;;  %v4851_v38 = vpop.f32.mrb[65].mxu0  ;;  %3458 = vmatmul.mubr.bf16.gmra.mrb[60].mxu1 %v1068_v34  ;;  %3567 = vmatprep.subr.bf16.mxu0 %v4403_v29  ;;  %v4076_v34 = vld [vmem:[#allocation13 + $0x88] sm:$0xff]   ;;  %v4077_v36 = vld [vmem:[#allocation13 + $0x90] sm:$0xff]  }
 0x2ac   :  { %v902_v41 = vpop.f32.mrb[66].mxu0  ;;  %3461 = vmatprep.mubr.msk.bf16.mxu1 %vm4404_vm5, %v4403_v29 }
 0x2ad   :  { %v1005_v44 = vadd.f32 %v4714_v26, %v902_v41  ;;  %v4856_v47 = vpop.f32.mrb[67].mxu0  ;;  %v1047_v48 = vmax.f32 %v1003_v37, 0.0 }
 0x2ae   :  { %3568 = vmatpush3.bf16.msra.mxu0 %v4076_v34 }
 0x2af   :  { %v1048_v49 = vmax.f32 %v1005_v44, 0.0  ;;  %3569 = vmatprep.subr.bf16.mxu0 %v4403_v29 }
 0x2b1   :  { %v1069_v51 = vpack.c.bf16 %v1048_v49, %v1047_v48 }
 0x2b2   :  { %v908_v52 = vpop.f32.mrb[68].mxu0  ;;  %3570 = vmatpush3.bf16.msra.mxu0 %v4077_v36 }
 0x2b3   :  { %v1007_v56 = vadd.f32 %v4714_v26, %v908_v52  ;;  %v4859_v58 = vpop.f32.mrb[69].mxu0  ;;  %3462 = vmatmul.mubr.bf16.gmra.mrb[64].mxu1 %v1069_v51  ;;  %3571 = vmatprep.subr.bf16.mxu0 %v4403_v29 }
 0x2b4   :  { %v912_v61 = vpop.f32.mrb[70].mxu0  ;;  %3465 = vmatprep.mubr.msk.bf16.mxu1 %vm4404_vm5, %v4403_v29 }
 0x2b5   :  { %v1009_v62 = vadd.f32 %v4714_v26, %v912_v61  ;;  %v4864_v1 = vpop.f32.mrb[71].mxu0  ;;  %v1049_v4 = vmax.f32 %v1007_v56, 0.0 }
 0x2b7   :  { %v1050_v5 = vmax.f32 %v1009_v62, 0.0  ;;  %v4078_v62 = vld [vmem:[#allocation13 + $0x98] sm:$0xff]  }
 0x2b8   :  { %3572 = vmatpush3.bf16.msra.mxu0 %v4078_v62 }
 0x2b9   :  { %v1070_v8 = vpack.c.bf16 %v1050_v5, %v1049_v4  ;;  %3573 = vmatprep.subr.bf16.mxu0 %v4403_v29 }
 0x2ba   :  { %v918_v9 = vpop.f32.mrb[72].mxu0 }
 0x2bb   :  { %v1011_v12 = vadd.f32 %v4714_v26, %v918_v9  ;;  %v4867_v15 = vpop.f32.mrb[73].mxu0  ;;  %3466 = vmatmul.mubr.bf16.gmra.mrb[68].mxu1 %v1070_v8 }
 0x2bc   :  { %v922_v16 = vpop.f32.mrb[74].mxu0  ;;  %3469 = vmatprep.mubr.msk.bf16.mxu1 %vm4404_vm5, %v4403_v29 }
 0x2bd   :  { %v1013_v18 = vadd.f32 %v4714_v26, %v922_v16  ;;  %v4872_v19 = vpop.f32.mrb[75].mxu0  ;;  %v1051_v22 = vmax.f32 %v1011_v12, 0.0  ;;  %v4879_v26 = vld [vmem:[#allocation14] ss:$0 sm:$0xff] }
 0x2bf   :  { %v1052_v24 = vmax.f32 %v1013_v18, 0.0 }
 0x2c1   :  { %v1071_v28 = vpack.c.bf16 %v1052_v24, %v1051_v22 }
 0x2c3   :  { %3470 = vmatmul.mubr.bf16.gmra.mrb[72].mxu1 %v1071_v28 }
 0x2c4   :  { %3489 = vmatprep.mubr.msk.bf16.mxu1 %vm4404_vm5, %v4403_v29 }
 0x306   :  { %v1175_v37 = vpop.f32.mrb[0].mxu1 }
 0x307   :  { %v1176_v41 = vadd.f32 %v4879_v26, %v1175_v37  ;;  %v3399_v44 = vpop.f32.mrb[1].mxu1 }
 0x308   :  { %v1178_v48 = vpop.f32.mrb[2].mxu1 }
 0x309   :  { %v1179_v49 = vadd.f32 %v4879_v26, %v1178_v48  ;;  %v3400_v51 = vpop.f32.mrb[3].mxu1  ;;  %v1326_v52 = vmax.f32 %v1176_v41, 0.0 }
 0x30b   :  { %v1327_v56 = vmax.f32 %v1179_v49, 0.0 }
 0x30d   :  { %v1364_v61 = vpack.c.bf16 %v1327_v56, %v1326_v52 }
 0x30e   :  { %v1183_v4 = vpop.f32.mrb[4].mxu1 }
 0x30f   :  { %v1184_v5 = vadd.f32 %v4879_v26, %v1183_v4  ;;  %v3403_v8 = vpop.f32.mrb[5].mxu1  ;;  %3490 = vmatmul.mubr.bf16.vlgmr.msra.gmra.mrb[76].mxu1 %v1364_v61  ;;  %v4079_v61 = vld [vmem:[#allocation13 + $0xa0] sm:$0xff]  }
 0x310   :  { %v1186_v9 = vpop.f32.mrb[6].mxu1  ;;  %3493 = vmatprep.mubr.msk.bf16.mxu1 %vm4404_vm5, %v4403_v29  ;;  %3574 = vmatpush3.bf16.msra.mxu0 %v4079_v61  ;;  %v4080_v8 = vld [vmem:[#allocation13 + $0xa8] sm:$0xff]  }
 0x311   :  { %v1187_v12 = vadd.f32 %v4879_v26, %v1186_v9  ;;  %v3404_v16 = vpop.f32.mrb[7].mxu1  ;;  %v1328_v18 = vmax.f32 %v1184_v5, 0.0  ;;  %3575 = vmatprep.subr.bf16.mxu0 %v4403_v29 }
 0x313   :  { %v1329_v22 = vmax.f32 %v1187_v12, 0.0 }
 0x314   :  { %3576 = vmatpush3.bf16.msra.mxu0 %v4080_v8 }
 0x315   :  { %v1365_v24 = vpack.c.bf16 %v1329_v22, %v1328_v18  ;;  %v4081_v18 = vld [vmem:[#allocation13 + $0xb0] sm:$0xff]   ;;  %3577 = vmatprep.subr.bf16.mxu0 %v4403_v29 }
 0x316   :  { %v1191_v28 = vpop.f32.mrb[8].mxu1 }
 0x317   :  { %v1192_v33 = vadd.f32 %v4879_v26, %v1191_v28  ;;  %v3407_v34 = vpop.f32.mrb[9].mxu1  ;;  %3494 = vmatmul.mubr.bf16.gmra.mrb[80].mxu1 %v1365_v24 }
 0x318   :  { %v1194_v36 = vpop.f32.mrb[10].mxu1  ;;  %3497 = vmatprep.mubr.msk.bf16.mxu1 %vm4404_vm5, %v4403_v29  ;;  %3578 = vmatpush3.bf16.msra.mxu0 %v4081_v18 }
 0x319   :  { %v1195_v37 = vadd.f32 %v4879_v26, %v1194_v36  ;;  %v3408_v41 = vpop.f32.mrb[11].mxu1  ;;  %v1330_v44 = vmax.f32 %v1192_v33, 0.0  ;;  %3579 = vmatprep.subr.bf16.mxu0 %v4403_v29 }
 0x31b   :  { %v1331_v48 = vmax.f32 %v1195_v37, 0.0  ;;  %v4082_v37 = vld [vmem:[#allocation13 + $0xb8] sm:$0xff]  }
 0x31c   :  { %3580 = vmatpush3.bf16.msra.mxu0 %v4082_v37 }
 0x31d   :  { %v1366_v49 = vpack.c.bf16 %v1331_v48, %v1330_v44  ;;  %3749 = vmatprep.subr.bf16.mxu0 %v4403_v29 }
 0x31e   :  { %v1199_v51 = vpop.f32.mrb[12].mxu1 }
 0x31f   :  { %v1200_v52 = vadd.f32 %v4879_v26, %v1199_v51  ;;  %v3411_v56 = vpop.f32.mrb[13].mxu1  ;;  %3498 = vmatmul.mubr.bf16.gmra.mrb[84].mxu1 %v1366_v49 }
 0x320   :  { %v1202_v62 = vpop.f32.mrb[14].mxu1  ;;  %3501 = vmatprep.mubr.msk.bf16.mxu1 %vm4404_vm5, %v4403_v29 }
 0x321   :  { %v1203_v4 = vadd.f32 %v4879_v26, %v1202_v62  ;;  %v3412_v5 = vpop.f32.mrb[15].mxu1  ;;  %v1332_v9 = vmax.f32 %v1200_v52, 0.0 }
 0x323   :  { %v1333_v12 = vmax.f32 %v1203_v4, 0.0 }
 0x325   :  { %v1367_v16 = vpack.c.bf16 %v1333_v12, %v1332_v9 }
 0x326   :  { %v1207_v22 = vpop.f32.mrb[16].mxu1 }
 0x327   :  { %v1208_v24 = vadd.f32 %v4879_v26, %v1207_v22  ;;  %v3415_v28 = vpop.f32.mrb[17].mxu1  ;;  %3502 = vmatmul.mubr.bf16.gmra.mrb[88].mxu1 %v1367_v16 }
 0x328   :  { %v1210_v33 = vpop.f32.mrb[18].mxu1  ;;  %3505 = vmatprep.mubr.msk.bf16.mxu1 %vm4404_vm5, %v4403_v29 }
 0x329   :  { %v1211_v34 = vadd.f32 %v4879_v26, %v1210_v33  ;;  %v3416_v36 = vpop.f32.mrb[19].mxu1  ;;  %v1334_v41 = vmax.f32 %v1208_v24, 0.0 }
 0x32b   :  { %v1335_v44 = vmax.f32 %v1211_v34, 0.0 }
 0x32d   :  { %v1368_v48 = vpack.c.bf16 %v1335_v44, %v1334_v41 }
 0x32e   :  { %v1215_v49 = vpop.f32.mrb[20].mxu1 }
 0x32f   :  { %v1216_v51 = vadd.f32 %v4879_v26, %v1215_v49  ;;  %v3419_v52 = vpop.f32.mrb[21].mxu1  ;;  %3506 = vmatmul.mubr.bf16.gmra.mrb[92].mxu1 %v1368_v48 }
 0x330   :  { %v1218_v56 = vpop.f32.mrb[22].mxu1  ;;  %3509 = vmatprep.mubr.msk.bf16.mxu1 %vm4404_vm5, %v4403_v29 }
 0x331   :  { %v1219_v61 = vadd.f32 %v4879_v26, %v1218_v56  ;;  %v3420_v62 = vpop.f32.mrb[23].mxu1  ;;  %v1336_v4 = vmax.f32 %v1216_v51, 0.0 }
 0x333   :  { %v1337_v5 = vmax.f32 %v1219_v61, 0.0 }
 0x335   :  { %v1369_v8 = vpack.c.bf16 %v1337_v5, %v1336_v4 }
 0x336   :  { %v1223_v9 = vpop.f32.mrb[24].mxu1 }
 0x337   :  { %v1224_v12 = vadd.f32 %v4879_v26, %v1223_v9  ;;  %v3423_v16 = vpop.f32.mrb[25].mxu1  ;;  %3510 = vmatmul.mubr.bf16.gmra.mrb[96].mxu1 %v1369_v8 }
 0x338   :  { %v1226_v18 = vpop.f32.mrb[26].mxu1  ;;  %3513 = vmatprep.mubr.msk.bf16.mxu1 %vm4404_vm5, %v4403_v29 }
 0x339   :  { %v1227_v22 = vadd.f32 %v4879_v26, %v1226_v18  ;;  %v3424_v24 = vpop.f32.mrb[27].mxu1  ;;  %v1338_v28 = vmax.f32 %v1224_v12, 0.0 }
 0x33b   :  { %v1339_v33 = vmax.f32 %v1227_v22, 0.0 }
 0x33d   :  { %v1370_v34 = vpack.c.bf16 %v1339_v33, %v1338_v28 }
 0x33e   :  { %v1231_v36 = vpop.f32.mrb[28].mxu1 }
 0x33f   :  { %v1232_v37 = vadd.f32 %v4879_v26, %v1231_v36  ;;  %v3427_v41 = vpop.f32.mrb[29].mxu1  ;;  %3514 = vmatmul.mubr.bf16.gmra.mrb[100].mxu1 %v1370_v34 }
 0x340   :  { %v1234_v44 = vpop.f32.mrb[30].mxu1  ;;  %3517 = vmatprep.mubr.msk.bf16.mxu1 %vm4404_vm5, %v4403_v29 }
 0x341   :  { %v1235_v48 = vadd.f32 %v4879_v26, %v1234_v44  ;;  %v3428_v49 = vpop.f32.mrb[31].mxu1  ;;  %v1340_v51 = vmax.f32 %v1232_v37, 0.0 }
 0x343   :  { %v1341_v52 = vmax.f32 %v1235_v48, 0.0 }
 0x345   :  { %v1371_v56 = vpack.c.bf16 %v1341_v52, %v1340_v51 }
 0x346   :  { %v1239_v61 = vpop.f32.mrb[32].mxu1 }
 0x347   :  { %v1240_v62 = vadd.f32 %v4879_v26, %v1239_v61  ;;  %v3431_v4 = vpop.f32.mrb[33].mxu1  ;;  %3518 = vmatmul.mubr.bf16.gmra.mrb[104].mxu1 %v1371_v56 }
 0x348   :  { %v1242_v5 = vpop.f32.mrb[34].mxu1  ;;  %3521 = vmatprep.mubr.msk.bf16.mxu1 %vm4404_vm5, %v4403_v29 }
 0x349   :  { %v1243_v8 = vadd.f32 %v4879_v26, %v1242_v5  ;;  %v3432_v9 = vpop.f32.mrb[35].mxu1  ;;  %v1342_v12 = vmax.f32 %v1240_v62, 0.0 }
 0x34b   :  { %v1343_v16 = vmax.f32 %v1243_v8, 0.0 }
 0x34d   :  { %v1372_v18 = vpack.c.bf16 %v1343_v16, %v1342_v12 }
 0x34e   :  { %v1247_v22 = vpop.f32.mrb[36].mxu1 }
 0x34f   :  { %v1248_v24 = vadd.f32 %v4879_v26, %v1247_v22  ;;  %v3435_v28 = vpop.f32.mrb[37].mxu1  ;;  %3522 = vmatmul.mubr.bf16.gmra.mrb[108].mxu1 %v1372_v18 }
 0x350   :  { %v1250_v33 = vpop.f32.mrb[38].mxu1  ;;  %3525 = vmatprep.mubr.msk.bf16.mxu1 %vm4404_vm5, %v4403_v29 }
 0x351   :  { %v1251_v34 = vadd.f32 %v4879_v26, %v1250_v33  ;;  %v3436_v36 = vpop.f32.mrb[39].mxu1  ;;  %v1344_v37 = vmax.f32 %v1248_v24, 0.0 }
 0x353   :  { %v1345_v41 = vmax.f32 %v1251_v34, 0.0 }
 0x355   :  { %v1373_v44 = vpack.c.bf16 %v1345_v41, %v1344_v37 }
 0x356   :  { %v1255_v48 = vpop.f32.mrb[40].mxu1 }
 0x357   :  { %v1256_v49 = vadd.f32 %v4879_v26, %v1255_v48  ;;  %v3439_v51 = vpop.f32.mrb[41].mxu1  ;;  %3526 = vmatmul.mubr.bf16.gmra.mrb[112].mxu1 %v1373_v44 }
 0x358   :  { %v1258_v52 = vpop.f32.mrb[42].mxu1  ;;  %3529 = vmatprep.mubr.msk.bf16.mxu1 %vm4404_vm5, %v4403_v29 }
 0x359   :  { %v1259_v56 = vadd.f32 %v4879_v26, %v1258_v52  ;;  %v3440_v61 = vpop.f32.mrb[43].mxu1  ;;  %v1346_v62 = vmax.f32 %v1256_v49, 0.0 }
 0x35b   :  { %v1347_v4 = vmax.f32 %v1259_v56, 0.0 }
 0x35d   :  { %v1374_v5 = vpack.c.bf16 %v1347_v4, %v1346_v62 }
 0x35e   :  { %v1263_v8 = vpop.f32.mrb[44].mxu1 }
 0x35f   :  { %v1264_v9 = vadd.f32 %v4879_v26, %v1263_v8  ;;  %v3443_v12 = vpop.f32.mrb[45].mxu1  ;;  %3530 = vmatmul.mubr.bf16.gmra.mrb[116].mxu1 %v1374_v5 }
 0x360   :  { %v1266_v16 = vpop.f32.mrb[46].mxu1  ;;  %3533 = vmatprep.mubr.msk.bf16.mxu1 %vm4404_vm5, %v4403_v29 }
 0x361   :  { %v1267_v18 = vadd.f32 %v4879_v26, %v1266_v16  ;;  %v3444_v22 = vpop.f32.mrb[47].mxu1  ;;  %v1348_v24 = vmax.f32 %v1264_v9, 0.0 }
 0x363   :  { %v1349_v28 = vmax.f32 %v1267_v18, 0.0 }
 0x365   :  { %v1375_v33 = vpack.c.bf16 %v1349_v28, %v1348_v24 }
 0x366   :  { %v1271_v34 = vpop.f32.mrb[48].mxu1 }
 0x367   :  { %v1272_v36 = vadd.f32 %v4879_v26, %v1271_v34  ;;  %v3447_v37 = vpop.f32.mrb[49].mxu1  ;;  %3534 = vmatmul.mubr.bf16.gmra.mrb[120].mxu1 %v1375_v33 }
 0x368   :  { %v1274_v41 = vpop.f32.mrb[50].mxu1  ;;  %3537 = vmatprep.mubr.msk.bf16.mxu1 %vm4404_vm5, %v4403_v29 }
 0x369   :  { %v1275_v44 = vadd.f32 %v4879_v26, %v1274_v41  ;;  %v3448_v48 = vpop.f32.mrb[51].mxu1  ;;  %v1350_v49 = vmax.f32 %v1272_v36, 0.0 }
 0x36b   :  { %v1351_v51 = vmax.f32 %v1275_v44, 0.0 }
 0x36d   :  { %v1376_v52 = vpack.c.bf16 %v1351_v51, %v1350_v49 }
 0x36e   :  { %v1279_v56 = vpop.f32.mrb[52].mxu1 }
 0x36f   :  { %v1280_v61 = vadd.f32 %v4879_v26, %v1279_v56  ;;  %v3451_v62 = vpop.f32.mrb[53].mxu1  ;;  %3538 = vmatmul.mubr.bf16.gmra.mrb[124].mxu1 %v1376_v52 }
 0x370   :  { %v1282_v4 = vpop.f32.mrb[54].mxu1  ;;  %3541 = vmatprep.mubr.msk.bf16.mxu1 %vm4404_vm5, %v4403_v29 }
 0x371   :  { %v1283_v5 = vadd.f32 %v4879_v26, %v1282_v4  ;;  %v3452_v8 = vpop.f32.mrb[55].mxu1  ;;  %v1352_v9 = vmax.f32 %v1280_v61, 0.0 }
 0x373   :  { %v1353_v12 = vmax.f32 %v1283_v5, 0.0 }
 0x375   :  { %v1377_v16 = vpack.c.bf16 %v1353_v12, %v1352_v9 }
 0x376   :  { %v1287_v18 = vpop.f32.mrb[56].mxu1 }
 0x377   :  { %v1288_v22 = vadd.f32 %v4879_v26, %v1287_v18  ;;  %v3455_v24 = vpop.f32.mrb[57].mxu1  ;;  %3542 = vmatmul.mubr.bf16.gmra.mrb[128].mxu1 %v1377_v16 }
 0x378   :  { %v1290_v28 = vpop.f32.mrb[58].mxu1  ;;  %3545 = vmatprep.mubr.msk.bf16.mxu1 %vm4404_vm5, %v4403_v29 }
 0x379   :  { %v1291_v33 = vadd.f32 %v4879_v26, %v1290_v28  ;;  %v3456_v34 = vpop.f32.mrb[59].mxu1  ;;  %v1354_v36 = vmax.f32 %v1288_v22, 0.0 }
 0x37b   :  { %v1355_v37 = vmax.f32 %v1291_v33, 0.0 }
 0x37d   :  { %v1378_v41 = vpack.c.bf16 %v1355_v37, %v1354_v36 }
 0x37e   :  { %v1295_v44 = vpop.f32.mrb[60].mxu1 }
 0x37f   :  { %v1296_v48 = vadd.f32 %v4879_v26, %v1295_v44  ;;  %v3459_v49 = vpop.f32.mrb[61].mxu1  ;;  %3546 = vmatmul.mubr.bf16.gmra.mrb[132].mxu1 %v1378_v41 }
 0x380   :  { %v1298_v51 = vpop.f32.mrb[62].mxu1  ;;  %3549 = vmatprep.mubr.msk.bf16.mxu1 %vm4404_vm5, %v4403_v29 }
 0x381   :  { %v1299_v52 = vadd.f32 %v4879_v26, %v1298_v51  ;;  %v3460_v56 = vpop.f32.mrb[63].mxu1  ;;  %v1356_v61 = vmax.f32 %v1296_v48, 0.0 }
 0x383   :  { %v1357_v62 = vmax.f32 %v1299_v52, 0.0 }
 0x385   :  { %v1379_v4 = vpack.c.bf16 %v1357_v62, %v1356_v61 }
 0x386   :  { %v1303_v5 = vpop.f32.mrb[64].mxu1 }
 0x387   :  { %v1304_v8 = vadd.f32 %v4879_v26, %v1303_v5  ;;  %v3463_v9 = vpop.f32.mrb[65].mxu1  ;;  %3550 = vmatmul.mubr.bf16.gmra.mrb[136].mxu1 %v1379_v4 }
 0x388   :  { %v1306_v12 = vpop.f32.mrb[66].mxu1  ;;  %3553 = vmatprep.mubr.msk.bf16.mxu1 %vm4404_vm5, %v4403_v29 }
 0x389   :  { %v1307_v16 = vadd.f32 %v4879_v26, %v1306_v12  ;;  %v3464_v18 = vpop.f32.mrb[67].mxu1  ;;  %v1358_v22 = vmax.f32 %v1304_v8, 0.0 }
 0x38a   :  { %v4084_v18 = vld [vmem:[#allocation13 + $0xc8] sm:$0xff]  }
 0x38b   :  { %v1359_v24 = vmax.f32 %v1307_v16, 0.0  ;;  %v4083_v16 = vld [vmem:[#allocation13 + $0xc0] sm:$0xff]  }
 0x38c   :  { %3658 = vmatpush3.bf16.msra.mxu1 %v4083_v16 }
 0x38d   :  { %v1380_v28 = vpack.c.bf16 %v1359_v24, %v1358_v22  ;;  %3659 = vmatprep.subr.bf16.mxu1 %v4403_v29  ;;  %v4085_v22 = vld [vmem:[#allocation13 + $0xd0] sm:$0xff]  }
 0x38e   :  { %v1311_v33 = vpop.f32.mrb[68].mxu1 }
 0x38f   :  { %v1312_v34 = vadd.f32 %v4879_v26, %v1311_v33  ;;  %v3467_v36 = vpop.f32.mrb[69].mxu1  ;;  %3554 = vmatmul.mubr.bf16.gmra.mrb[140].mxu1 %v1380_v28 }
 0x390   :  { %v1314_v37 = vpop.f32.mrb[70].mxu1  ;;  %3557 = vmatprep.mubr.msk.bf16.mxu1 %vm4404_vm5, %v4403_v29  ;;  %3660 = vmatpush3.bf16.msra.mxu1 %v4084_v18 }
 0x391   :  { %v1315_v41 = vadd.f32 %v4879_v26, %v1314_v37  ;;  %v3468_v44 = vpop.f32.mrb[71].mxu1  ;;  %v1360_v48 = vmax.f32 %v1312_v34, 0.0  ;;  %3661 = vmatprep.subr.bf16.mxu1 %v4403_v29 }
 0x393   :  { %v1361_v49 = vmax.f32 %v1315_v41, 0.0 }
 0x394   :  { %3662 = vmatpush3.bf16.msra.mxu1 %v4085_v22 }
 0x395   :  { %v1381_v51 = vpack.c.bf16 %v1361_v49, %v1360_v48  ;;  %3663 = vmatprep.subr.bf16.mxu1 %v4403_v29  ;;  %v4086_v49 = vld [vmem:[#allocation13 + $0xd8] sm:$0xff]  }
 0x396   :  { %v1319_v52 = vpop.f32.mrb[72].mxu1 }
 0x397   :  { %v1320_v56 = vadd.f32 %v4879_v26, %v1319_v52  ;;  %v3471_v61 = vpop.f32.mrb[73].mxu1  ;;  %3558 = vmatmul.mubr.bf16.gmra.mrb[144].mxu1 %v1381_v51 }
 0x398   :  { %v1322_v62 = vpop.f32.mrb[74].mxu1  ;;  %3561 = vmatprep.mubr.msk.bf16.mxu1 %vm4404_vm5, %v4403_v29  ;;  %3664 = vmatpush3.bf16.msra.mxu1 %v4086_v49 }
 0x399   :  { %v1323_v4 = vadd.f32 %v4879_v26, %v1322_v62  ;;  %v3472_v5 = vpop.f32.mrb[75].mxu1  ;;  %v1362_v8 = vmax.f32 %v1320_v56, 0.0  ;;  %v4965_v26 = vld [vmem:[#allocation14 + $0x1] ss:$0 sm:$0xff]  ;;  %3665 = vmatprep.subr.bf16.mxu1 %v4403_v29 }
 0x39b   :  { %v1363_v9 = vmax.f32 %v1323_v4, 0.0 }
 0x39d   :  { %v1382_v12 = vpack.c.bf16 %v1363_v9, %v1362_v8 }
 0x39f   :  { %3562 = vmatmul.mubr.bf16.gmra.mrb[148].mxu1 %v1382_v12 }
 0x3a0   :  { %3673 = vmatprep.mubr.msk.bf16.mxu1 %vm4404_vm5, %v4403_v29 }
 0x3e2   :  { %v1487_v24 = vpop.f32.mrb[76].mxu1 }
 0x3e3   :  { %v1488_v28 = vadd.f32 %v4965_v26, %v1487_v24  ;;  %v3491_v33 = vpop.f32.mrb[77].mxu1 }
 0x3e4   :  { %v1490_v34 = vpop.f32.mrb[78].mxu1 }
 0x3e5   :  { %v1491_v36 = vadd.f32 %v4965_v26, %v1490_v34  ;;  %v3492_v37 = vpop.f32.mrb[79].mxu1  ;;  %v1638_v41 = vmax.f32 %v1488_v28, 0.0 }
 0x3e7   :  { %v1639_v44 = vmax.f32 %v1491_v36, 0.0 }
 0x3e9   :  { %v1676_v48 = vpack.c.bf16 %v1639_v44, %v1638_v41 }
 0x3ea   :  { %v1495_v51 = vpop.f32.mrb[80].mxu1 }
 0x3eb   :  { %v1496_v52 = vadd.f32 %v4965_v26, %v1495_v51  ;;  %v3495_v56 = vpop.f32.mrb[81].mxu1  ;;  %3582 = vmatmul.mubr.bf16.vlgmr.msra.gmra.mrb[76].mxu0 %v1676_v48  ;;  %v4087_v48 = vld [vmem:[#allocation13 + $0xe0] sm:$0xff]  }
 0x3ec   :  { %v1498_v61 = vpop.f32.mrb[82].mxu1  ;;  %3585 = vmatprep.mubr.msk.bf16.mxu0 %vm4404_vm5, %v4403_v29  ;;  %3666 = vmatpush3.bf16.msra.mxu1 %v4087_v48  ;;  %v4088_v56 = vld [vmem:[#allocation13 + $0xe8] sm:$0xff]  }
 0x3ed   :  { %v1499_v62 = vadd.f32 %v4965_v26, %v1498_v61  ;;  %v3496_v4 = vpop.f32.mrb[83].mxu1  ;;  %v1640_v5 = vmax.f32 %v1496_v52, 0.0  ;;  %3667 = vmatprep.subr.bf16.mxu1 %v4403_v29 }
 0x3ef   :  { %v1641_v8 = vmax.f32 %v1499_v62, 0.0 }
 0x3f0   :  { %3668 = vmatpush3.bf16.msra.mxu1 %v4088_v56 }
 0x3f1   :  { %v1677_v9 = vpack.c.bf16 %v1641_v8, %v1640_v5  ;;  %v4089_v5 = vld [vmem:[#allocation13 + $0xf0] sm:$0xff]   ;;  %3669 = vmatprep.subr.bf16.mxu1 %v4403_v29 }
 0x3f2   :  { %v1503_v12 = vpop.f32.mrb[84].mxu1 }
 0x3f3   :  { %v1504_v16 = vadd.f32 %v4965_v26, %v1503_v12  ;;  %v3499_v18 = vpop.f32.mrb[85].mxu1  ;;  %3586 = vmatmul.mubr.bf16.gmra.mrb[80].mxu0 %v1677_v9 }
 0x3f4   :  { %v1506_v22 = vpop.f32.mrb[86].mxu1  ;;  %3589 = vmatprep.mubr.msk.bf16.mxu0 %vm4404_vm5, %v4403_v29  ;;  %3670 = vmatpush3.bf16.msra.mxu1 %v4089_v5 }
 0x3f5   :  { %v1507_v24 = vadd.f32 %v4965_v26, %v1506_v22  ;;  %v3500_v28 = vpop.f32.mrb[87].mxu1  ;;  %v1642_v33 = vmax.f32 %v1504_v16, 0.0  ;;  %3671 = vmatprep.subr.bf16.mxu1 %v4403_v29 }
 0x3f7   :  { %v1643_v34 = vmax.f32 %v1507_v24, 0.0  ;;  %v4090_v24 = vld [vmem:[#allocation13 + $0xf8] sm:$0xff]  }
 0x3f8   :  { %3672 = vmatpush3.bf16.msra.mxu1 %v4090_v24 }
 0x3f9   :  { %v1678_v36 = vpack.c.bf16 %v1643_v34, %v1642_v33  ;;  %3933 = vmatprep.subr.bf16.mxu1 %v4403_v29 }
 0x3fa   :  { %v1511_v37 = vpop.f32.mrb[88].mxu1 }
 0x3fb   :  { %v1512_v41 = vadd.f32 %v4965_v26, %v1511_v37  ;;  %v3503_v44 = vpop.f32.mrb[89].mxu1  ;;  %3590 = vmatmul.mubr.bf16.gmra.mrb[84].mxu0 %v1678_v36 }
 0x3fc   :  { %v1514_v49 = vpop.f32.mrb[90].mxu1  ;;  %3593 = vmatprep.mubr.msk.bf16.mxu0 %vm4404_vm5, %v4403_v29 }
 0x3fd   :  { %v1515_v51 = vadd.f32 %v4965_v26, %v1514_v49  ;;  %v3504_v52 = vpop.f32.mrb[91].mxu1  ;;  %v1644_v61 = vmax.f32 %v1512_v41, 0.0 }
 0x3ff   :  { %v1645_v62 = vmax.f32 %v1515_v51, 0.0 }
 0x401   :  { %v1679_v4 = vpack.c.bf16 %v1645_v62, %v1644_v61 }
 0x402   :  { %v1519_v8 = vpop.f32.mrb[92].mxu1 }
 0x403   :  { %v1520_v9 = vadd.f32 %v4965_v26, %v1519_v8  ;;  %v3507_v12 = vpop.f32.mrb[93].mxu1  ;;  %3594 = vmatmul.mubr.bf16.gmra.mrb[88].mxu0 %v1679_v4 }
 0x404   :  { %v1522_v16 = vpop.f32.mrb[94].mxu1  ;;  %3597 = vmatprep.mubr.msk.bf16.mxu0 %vm4404_vm5, %v4403_v29 }
 0x405   :  { %v1523_v18 = vadd.f32 %v4965_v26, %v1522_v16  ;;  %v3508_v22 = vpop.f32.mrb[95].mxu1  ;;  %v1646_v28 = vmax.f32 %v1520_v9, 0.0 }
 0x407   :  { %v1647_v33 = vmax.f32 %v1523_v18, 0.0 }
 0x409   :  { %v1680_v34 = vpack.c.bf16 %v1647_v33, %v1646_v28 }
 0x40a   :  { %v1527_v36 = vpop.f32.mrb[96].mxu1 }
 0x40b   :  { %v1528_v37 = vadd.f32 %v4965_v26, %v1527_v36  ;;  %v3511_v41 = vpop.f32.mrb[97].mxu1  ;;  %3598 = vmatmul.mubr.bf16.gmra.mrb[92].mxu0 %v1680_v34 }
 0x40c   :  { %v1530_v44 = vpop.f32.mrb[98].mxu1  ;;  %3601 = vmatprep.mubr.msk.bf16.mxu0 %vm4404_vm5, %v4403_v29 }
 0x40d   :  { %v1531_v48 = vadd.f32 %v4965_v26, %v1530_v44  ;;  %v3512_v49 = vpop.f32.mrb[99].mxu1  ;;  %v1648_v51 = vmax.f32 %v1528_v37, 0.0 }
 0x40f   :  { %v1649_v52 = vmax.f32 %v1531_v48, 0.0 }
 0x411   :  { %v1681_v56 = vpack.c.bf16 %v1649_v52, %v1648_v51 }
 0x412   :  { %v1535_v61 = vpop.f32.mrb[100].mxu1 }
 0x413   :  { %v1536_v62 = vadd.f32 %v4965_v26, %v1535_v61  ;;  %v3515_v4 = vpop.f32.mrb[101].mxu1  ;;  %3602 = vmatmul.mubr.bf16.gmra.mrb[96].mxu0 %v1681_v56 }
 0x414   :  { %v1538_v5 = vpop.f32.mrb[102].mxu1  ;;  %3605 = vmatprep.mubr.msk.bf16.mxu0 %vm4404_vm5, %v4403_v29 }
 0x415   :  { %v1539_v8 = vadd.f32 %v4965_v26, %v1538_v5  ;;  %v3516_v9 = vpop.f32.mrb[103].mxu1  ;;  %v1650_v12 = vmax.f32 %v1536_v62, 0.0 }
 0x417   :  { %v1651_v16 = vmax.f32 %v1539_v8, 0.0 }
 0x419   :  { %v1682_v18 = vpack.c.bf16 %v1651_v16, %v1650_v12 }
 0x41a   :  { %v1543_v22 = vpop.f32.mrb[104].mxu1 }
 0x41b   :  { %v1544_v24 = vadd.f32 %v4965_v26, %v1543_v22  ;;  %v3519_v28 = vpop.f32.mrb[105].mxu1  ;;  %3606 = vmatmul.mubr.bf16.gmra.mrb[100].mxu0 %v1682_v18 }
 0x41c   :  { %v1546_v33 = vpop.f32.mrb[106].mxu1  ;;  %3609 = vmatprep.mubr.msk.bf16.mxu0 %vm4404_vm5, %v4403_v29 }
 0x41d   :  { %v1547_v34 = vadd.f32 %v4965_v26, %v1546_v33  ;;  %v3520_v36 = vpop.f32.mrb[107].mxu1  ;;  %v1652_v37 = vmax.f32 %v1544_v24, 0.0 }
 0x41f   :  { %v1653_v41 = vmax.f32 %v1547_v34, 0.0 }
 0x421   :  { %v1683_v44 = vpack.c.bf16 %v1653_v41, %v1652_v37 }
 0x422   :  { %v1551_v48 = vpop.f32.mrb[108].mxu1 }
 0x423   :  { %v1552_v49 = vadd.f32 %v4965_v26, %v1551_v48  ;;  %v3523_v51 = vpop.f32.mrb[109].mxu1  ;;  %3610 = vmatmul.mubr.bf16.gmra.mrb[104].mxu0 %v1683_v44 }
 0x424   :  { %v1554_v52 = vpop.f32.mrb[110].mxu1  ;;  %3613 = vmatprep.mubr.msk.bf16.mxu0 %vm4404_vm5, %v4403_v29 }
 0x425   :  { %v1555_v56 = vadd.f32 %v4965_v26, %v1554_v52  ;;  %v3524_v61 = vpop.f32.mrb[111].mxu1  ;;  %v1654_v62 = vmax.f32 %v1552_v49, 0.0 }
 0x427   :  { %v1655_v4 = vmax.f32 %v1555_v56, 0.0 }
 0x429   :  { %v1684_v5 = vpack.c.bf16 %v1655_v4, %v1654_v62 }
 0x42a   :  { %v1559_v8 = vpop.f32.mrb[112].mxu1 }
 0x42b   :  { %v1560_v9 = vadd.f32 %v4965_v26, %v1559_v8  ;;  %v3527_v12 = vpop.f32.mrb[113].mxu1  ;;  %3614 = vmatmul.mubr.bf16.gmra.mrb[108].mxu0 %v1684_v5 }
 0x42c   :  { %v1562_v16 = vpop.f32.mrb[114].mxu1  ;;  %3617 = vmatprep.mubr.msk.bf16.mxu0 %vm4404_vm5, %v4403_v29 }
 0x42d   :  { %v1563_v18 = vadd.f32 %v4965_v26, %v1562_v16  ;;  %v3528_v22 = vpop.f32.mrb[115].mxu1  ;;  %v1656_v24 = vmax.f32 %v1560_v9, 0.0 }
 0x42f   :  { %v1657_v28 = vmax.f32 %v1563_v18, 0.0 }
 0x431   :  { %v1685_v33 = vpack.c.bf16 %v1657_v28, %v1656_v24 }
 0x432   :  { %v1567_v34 = vpop.f32.mrb[116].mxu1 }
 0x433   :  { %v1568_v36 = vadd.f32 %v4965_v26, %v1567_v34  ;;  %v3531_v37 = vpop.f32.mrb[117].mxu1  ;;  %3618 = vmatmul.mubr.bf16.gmra.mrb[112].mxu0 %v1685_v33 }
 0x434   :  { %v1570_v41 = vpop.f32.mrb[118].mxu1  ;;  %3621 = vmatprep.mubr.msk.bf16.mxu0 %vm4404_vm5, %v4403_v29 }
 0x435   :  { %v1571_v44 = vadd.f32 %v4965_v26, %v1570_v41  ;;  %v3532_v48 = vpop.f32.mrb[119].mxu1  ;;  %v1658_v49 = vmax.f32 %v1568_v36, 0.0 }
 0x437   :  { %v1659_v51 = vmax.f32 %v1571_v44, 0.0 }
 0x439   :  { %v1686_v52 = vpack.c.bf16 %v1659_v51, %v1658_v49 }
 0x43a   :  { %v1575_v56 = vpop.f32.mrb[120].mxu1 }
 0x43b   :  { %v1576_v61 = vadd.f32 %v4965_v26, %v1575_v56  ;;  %v3535_v62 = vpop.f32.mrb[121].mxu1  ;;  %3622 = vmatmul.mubr.bf16.gmra.mrb[116].mxu0 %v1686_v52 }
 0x43c   :  { %v1578_v4 = vpop.f32.mrb[122].mxu1  ;;  %3625 = vmatprep.mubr.msk.bf16.mxu0 %vm4404_vm5, %v4403_v29 }
 0x43d   :  { %v1579_v5 = vadd.f32 %v4965_v26, %v1578_v4  ;;  %v3536_v8 = vpop.f32.mrb[123].mxu1  ;;  %v1660_v9 = vmax.f32 %v1576_v61, 0.0 }
 0x43f   :  { %v1661_v12 = vmax.f32 %v1579_v5, 0.0 }
 0x441   :  { %v1687_v16 = vpack.c.bf16 %v1661_v12, %v1660_v9 }
 0x442   :  { %v1583_v18 = vpop.f32.mrb[124].mxu1 }
 0x443   :  { %v1584_v22 = vadd.f32 %v4965_v26, %v1583_v18  ;;  %v3539_v24 = vpop.f32.mrb[125].mxu1  ;;  %3626 = vmatmul.mubr.bf16.gmra.mrb[120].mxu0 %v1687_v16 }
 0x444   :  { %v1586_v28 = vpop.f32.mrb[126].mxu1  ;;  %3629 = vmatprep.mubr.msk.bf16.mxu0 %vm4404_vm5, %v4403_v29 }
 0x445   :  { %v1587_v33 = vadd.f32 %v4965_v26, %v1586_v28  ;;  %v3540_v34 = vpop.f32.mrb[127].mxu1  ;;  %v1662_v36 = vmax.f32 %v1584_v22, 0.0 }
 0x447   :  { %v1663_v37 = vmax.f32 %v1587_v33, 0.0 }
 0x449   :  { %v1688_v41 = vpack.c.bf16 %v1663_v37, %v1662_v36 }
 0x44a   :  { %v1591_v44 = vpop.f32.mrb[128].mxu1 }
 0x44b   :  { %v1592_v48 = vadd.f32 %v4965_v26, %v1591_v44  ;;  %v3543_v49 = vpop.f32.mrb[129].mxu1  ;;  %3630 = vmatmul.mubr.bf16.gmra.mrb[124].mxu0 %v1688_v41 }
 0x44c   :  { %v1594_v51 = vpop.f32.mrb[130].mxu1  ;;  %3633 = vmatprep.mubr.msk.bf16.mxu0 %vm4404_vm5, %v4403_v29 }
 0x44d   :  { %v1595_v52 = vadd.f32 %v4965_v26, %v1594_v51  ;;  %v3544_v56 = vpop.f32.mrb[131].mxu1  ;;  %v1664_v61 = vmax.f32 %v1592_v48, 0.0 }
 0x44f   :  { %v1665_v62 = vmax.f32 %v1595_v52, 0.0 }
 0x451   :  { %v1689_v4 = vpack.c.bf16 %v1665_v62, %v1664_v61 }
 0x452   :  { %v1599_v5 = vpop.f32.mrb[132].mxu1 }
 0x453   :  { %v1600_v8 = vadd.f32 %v4965_v26, %v1599_v5  ;;  %v3547_v9 = vpop.f32.mrb[133].mxu1  ;;  %3634 = vmatmul.mubr.bf16.gmra.mrb[128].mxu0 %v1689_v4 }
 0x454   :  { %v1602_v12 = vpop.f32.mrb[134].mxu1  ;;  %3637 = vmatprep.mubr.msk.bf16.mxu0 %vm4404_vm5, %v4403_v29 }
 0x455   :  { %v1603_v16 = vadd.f32 %v4965_v26, %v1602_v12  ;;  %v3548_v18 = vpop.f32.mrb[135].mxu1  ;;  %v1666_v22 = vmax.f32 %v1600_v8, 0.0 }
 0x457   :  { %v1667_v24 = vmax.f32 %v1603_v16, 0.0 }
 0x459   :  { %v1690_v28 = vpack.c.bf16 %v1667_v24, %v1666_v22 }
 0x45a   :  { %v1607_v33 = vpop.f32.mrb[136].mxu1 }
 0x45b   :  { %v1608_v34 = vadd.f32 %v4965_v26, %v1607_v33  ;;  %v3551_v36 = vpop.f32.mrb[137].mxu1  ;;  %3638 = vmatmul.mubr.bf16.gmra.mrb[132].mxu0 %v1690_v28 }
 0x45c   :  { %v1610_v37 = vpop.f32.mrb[138].mxu1  ;;  %3641 = vmatprep.mubr.msk.bf16.mxu0 %vm4404_vm5, %v4403_v29 }
 0x45d   :  { %v1611_v41 = vadd.f32 %v4965_v26, %v1610_v37  ;;  %v3552_v44 = vpop.f32.mrb[139].mxu1  ;;  %v1668_v48 = vmax.f32 %v1608_v34, 0.0 }
 0x45f   :  { %v1669_v49 = vmax.f32 %v1611_v41, 0.0 }
 0x461   :  { %v1691_v51 = vpack.c.bf16 %v1669_v49, %v1668_v48 }
 0x462   :  { %v1615_v52 = vpop.f32.mrb[140].mxu1 }
 0x463   :  { %v1616_v56 = vadd.f32 %v4965_v26, %v1615_v52  ;;  %v3555_v61 = vpop.f32.mrb[141].mxu1  ;;  %3642 = vmatmul.mubr.bf16.gmra.mrb[136].mxu0 %v1691_v51 }
 0x464   :  { %v1618_v62 = vpop.f32.mrb[142].mxu1  ;;  %3645 = vmatprep.mubr.msk.bf16.mxu0 %vm4404_vm5, %v4403_v29 }
 0x465   :  { %v1619_v4 = vadd.f32 %v4965_v26, %v1618_v62  ;;  %v3556_v5 = vpop.f32.mrb[143].mxu1  ;;  %v1670_v8 = vmax.f32 %v1616_v56, 0.0 }
 0x466   :  { %v4092_v5 = vld [vmem:[#allocation13 + $0x108] sm:$0xff]  }
 0x467   :  { %v1671_v9 = vmax.f32 %v1619_v4, 0.0  ;;  %v4091_v4 = vld [vmem:[#allocation13 + $0x100] sm:$0xff]  }
 0x468   :  { %3750 = vmatpush3.bf16.msra.mxu0 %v4091_v4 }
 0x469   :  { %v1692_v12 = vpack.c.bf16 %v1671_v9, %v1670_v8  ;;  %3751 = vmatprep.subr.bf16.mxu0 %v4403_v29  ;;  %v4093_v8 = vld [vmem:[#allocation13 + $0x110] sm:$0xff]  }
 0x46a   :  { %v1623_v16 = vpop.f32.mrb[144].mxu1 }
 0x46b   :  { %v1624_v18 = vadd.f32 %v4965_v26, %v1623_v16  ;;  %v3559_v22 = vpop.f32.mrb[145].mxu1  ;;  %3646 = vmatmul.mubr.bf16.gmra.mrb[140].mxu0 %v1692_v12 }
 0x46c   :  { %v1626_v24 = vpop.f32.mrb[146].mxu1  ;;  %3649 = vmatprep.mubr.msk.bf16.mxu0 %vm4404_vm5, %v4403_v29  ;;  %3752 = vmatpush3.bf16.msra.mxu0 %v4092_v5 }
 0x46d   :  { %v1627_v28 = vadd.f32 %v4965_v26, %v1626_v24  ;;  %v3560_v33 = vpop.f32.mrb[147].mxu1  ;;  %v1672_v34 = vmax.f32 %v1624_v18, 0.0  ;;  %3753 = vmatprep.subr.bf16.mxu0 %v4403_v29 }
 0x46f   :  { %v1673_v36 = vmax.f32 %v1627_v28, 0.0 }
 0x470   :  { %3754 = vmatpush3.bf16.msra.mxu0 %v4093_v8 }
 0x471   :  { %v1693_v37 = vpack.c.bf16 %v1673_v36, %v1672_v34  ;;  %3755 = vmatprep.subr.bf16.mxu0 %v4403_v29 }
 0x472   :  { %v1631_v41 = vpop.f32.mrb[148].mxu1 }
 0x473   :  { %v1632_v44 = vadd.f32 %v4965_v26, %v1631_v41  ;;  %v3563_v48 = vpop.f32.mrb[149].mxu1  ;;  %3650 = vmatmul.mubr.bf16.gmra.mrb[144].mxu0 %v1693_v37 }
 0x474   :  { %v1634_v49 = vpop.f32.mrb[150].mxu1  ;;  %3653 = vmatprep.mubr.msk.bf16.mxu0 %vm4404_vm5, %v4403_v29 }
 0x475   :  { %v1635_v51 = vadd.f32 %v4965_v26, %v1634_v49  ;;  %v3564_v52 = vpop.f32.mrb[151].mxu1  ;;  %v1674_v56 = vmax.f32 %v1632_v44, 0.0  ;;  %v5051_v26 = vld [vmem:[#allocation14 + $0x2] ss:$0 sm:$0xff] }
 0x477   :  { %v1675_v61 = vmax.f32 %v1635_v51, 0.0  ;;  %v4094_v51 = vld [vmem:[#allocation13 + $0x118] sm:$0xff]  }
 0x478   :  { %3756 = vmatpush3.bf16.msra.mxu0 %v4094_v51 }
 0x479   :  { %v1694_v62 = vpack.c.bf16 %v1675_v61, %v1674_v56  ;;  %3757 = vmatprep.subr.bf16.mxu0 %v4403_v29 }
 0x47b   :  { %3654 = vmatmul.mubr.bf16.gmra.mrb[148].mxu0 %v1694_v62 }
 0x47c   :  { %3765 = vmatprep.mubr.msk.bf16.mxu0 %vm4404_vm5, %v4403_v29 }
 0x4be   :  { %v1799_v9 = vpop.f32.mrb[76].mxu0 }
 0x4bf   :  { %v1800_v12 = vadd.f32 %v5051_v26, %v1799_v9  ;;  %v3583_v16 = vpop.f32.mrb[77].mxu0 }
 0x4c0   :  { %v1802_v18 = vpop.f32.mrb[78].mxu0 }
 0x4c1   :  { %v1803_v22 = vadd.f32 %v5051_v26, %v1802_v18  ;;  %v3584_v24 = vpop.f32.mrb[79].mxu0  ;;  %v1950_v28 = vmax.f32 %v1800_v12, 0.0 }
 0x4c3   :  { %v1951_v33 = vmax.f32 %v1803_v22, 0.0 }
 0x4c5   :  { %v1988_v34 = vpack.c.bf16 %v1951_v33, %v1950_v28 }
 0x4c6   :  { %v1807_v36 = vpop.f32.mrb[80].mxu0 }
 0x4c7   :  { %v1808_v37 = vadd.f32 %v5051_v26, %v1807_v36  ;;  %v3587_v41 = vpop.f32.mrb[81].mxu0  ;;  %3674 = vmatmul.mubr.bf16.vlgmr.msra.gmra.mrb[152].mxu1 %v1988_v34  ;;  %v4095_v34 = vld [vmem:[#allocation13 + $0x120] sm:$0xff]  }
 0x4c8   :  { %v1810_v44 = vpop.f32.mrb[82].mxu0  ;;  %3677 = vmatprep.mubr.msk.bf16.mxu1 %vm4404_vm5, %v4403_v29  ;;  %3758 = vmatpush3.bf16.msra.mxu0 %v4095_v34 }
 0x4c9   :  { %v1811_v48 = vadd.f32 %v5051_v26, %v1810_v44  ;;  %v3588_v49 = vpop.f32.mrb[83].mxu0  ;;  %v1952_v52 = vmax.f32 %v1808_v37, 0.0  ;;  %v4096_v44 = vld [vmem:[#allocation13 + $0x128] sm:$0xff]   ;;  %3759 = vmatprep.subr.bf16.mxu0 %v4403_v29 }
 0x4cb   :  { %v1953_v56 = vmax.f32 %v1811_v48, 0.0 }
 0x4cc   :  { %3760 = vmatpush3.bf16.msra.mxu0 %v4096_v44 }
 0x4cd   :  { %v1989_v61 = vpack.c.bf16 %v1953_v56, %v1952_v52  ;;  %v4097_v52 = vld [vmem:[#allocation13 + $0x130] sm:$0xff]   ;;  %3761 = vmatprep.subr.bf16.mxu0 %v4403_v29 }
 0x4ce   :  { %v1815_v62 = vpop.f32.mrb[84].mxu0 }
 0x4cf   :  { %v1816_v4 = vadd.f32 %v5051_v26, %v1815_v62  ;;  %v3591_v5 = vpop.f32.mrb[85].mxu0  ;;  %3678 = vmatmul.mubr.bf16.gmra.mrb[156].mxu1 %v1989_v61 }
 0x4d0   :  { %v1818_v8 = vpop.f32.mrb[86].mxu0  ;;  %3681 = vmatprep.mubr.msk.bf16.mxu1 %vm4404_vm5, %v4403_v29  ;;  %3762 = vmatpush3.bf16.msra.mxu0 %v4097_v52 }
 0x4d1   :  { %v1819_v9 = vadd.f32 %v5051_v26, %v1818_v8  ;;  %v3592_v12 = vpop.f32.mrb[87].mxu0  ;;  %v1954_v16 = vmax.f32 %v1816_v4, 0.0  ;;  %3763 = vmatprep.subr.bf16.mxu0 %v4403_v29 }
 0x4d3   :  { %v1955_v18 = vmax.f32 %v1819_v9, 0.0  ;;  %v4098_v9 = vld [vmem:[#allocation13 + $0x138] sm:$0xff]  }
 0x4d4   :  { %3764 = vmatpush3.bf16.msra.mxu0 %v4098_v9 }
 0x4d5   :  { %v1990_v22 = vpack.c.bf16 %v1955_v18, %v1954_v16  ;;  %3841 = vmatprep.subr.bf16.mxu0 %v4403_v29 }
 0x4d6   :  { %v1823_v24 = vpop.f32.mrb[88].mxu0 }
 0x4d7   :  { %v1824_v28 = vadd.f32 %v5051_v26, %v1823_v24  ;;  %v3595_v33 = vpop.f32.mrb[89].mxu0  ;;  %3682 = vmatmul.mubr.bf16.gmra.mrb[160].mxu1 %v1990_v22 }
 0x4d8   :  { %v1826_v36 = vpop.f32.mrb[90].mxu0  ;;  %3685 = vmatprep.mubr.msk.bf16.mxu1 %vm4404_vm5, %v4403_v29 }
 0x4d9   :  { %v1827_v37 = vadd.f32 %v5051_v26, %v1826_v36  ;;  %v3596_v41 = vpop.f32.mrb[91].mxu0  ;;  %v1956_v48 = vmax.f32 %v1824_v28, 0.0 }
 0x4db   :  { %v1957_v49 = vmax.f32 %v1827_v37, 0.0 }
 0x4dd   :  { %v1991_v51 = vpack.c.bf16 %v1957_v49, %v1956_v48 }
 0x4de   :  { %v1831_v56 = vpop.f32.mrb[92].mxu0 }
 0x4df   :  { %v1832_v61 = vadd.f32 %v5051_v26, %v1831_v56  ;;  %v3599_v62 = vpop.f32.mrb[93].mxu0  ;;  %3686 = vmatmul.mubr.bf16.gmra.mrb[164].mxu1 %v1991_v51 }
 0x4e0   :  { %v1834_v4 = vpop.f32.mrb[94].mxu0  ;;  %3689 = vmatprep.mubr.msk.bf16.mxu1 %vm4404_vm5, %v4403_v29 }
 0x4e1   :  { %v1835_v5 = vadd.f32 %v5051_v26, %v1834_v4  ;;  %v3600_v8 = vpop.f32.mrb[95].mxu0  ;;  %v1958_v12 = vmax.f32 %v1832_v61, 0.0 }
 0x4e3   :  { %v1959_v16 = vmax.f32 %v1835_v5, 0.0 }
 0x4e5   :  { %v1992_v18 = vpack.c.bf16 %v1959_v16, %v1958_v12 }
 0x4e6   :  { %v1839_v22 = vpop.f32.mrb[96].mxu0 }
 0x4e7   :  { %v1840_v24 = vadd.f32 %v5051_v26, %v1839_v22  ;;  %v3603_v28 = vpop.f32.mrb[97].mxu0  ;;  %3690 = vmatmul.mubr.bf16.gmra.mrb[168].mxu1 %v1992_v18 }
 0x4e8   :  { %v1842_v33 = vpop.f32.mrb[98].mxu0  ;;  %3693 = vmatprep.mubr.msk.bf16.mxu1 %vm4404_vm5, %v4403_v29 }
 0x4e9   :  { %v1843_v34 = vadd.f32 %v5051_v26, %v1842_v33  ;;  %v3604_v36 = vpop.f32.mrb[99].mxu0  ;;  %v1960_v37 = vmax.f32 %v1840_v24, 0.0 }
 0x4eb   :  { %v1961_v41 = vmax.f32 %v1843_v34, 0.0 }
 0x4ed   :  { %v1993_v44 = vpack.c.bf16 %v1961_v41, %v1960_v37 }
 0x4ee   :  { %v1847_v48 = vpop.f32.mrb[100].mxu0 }
 0x4ef   :  { %v1848_v49 = vadd.f32 %v5051_v26, %v1847_v48  ;;  %v3607_v51 = vpop.f32.mrb[101].mxu0  ;;  %3694 = vmatmul.mubr.bf16.gmra.mrb[172].mxu1 %v1993_v44 }
 0x4f0   :  { %v1850_v52 = vpop.f32.mrb[102].mxu0  ;;  %3697 = vmatprep.mubr.msk.bf16.mxu1 %vm4404_vm5, %v4403_v29 }
 0x4f1   :  { %v1851_v56 = vadd.f32 %v5051_v26, %v1850_v52  ;;  %v3608_v61 = vpop.f32.mrb[103].mxu0  ;;  %v1962_v62 = vmax.f32 %v1848_v49, 0.0 }
 0x4f3   :  { %v1963_v4 = vmax.f32 %v1851_v56, 0.0 }
 0x4f5   :  { %v1994_v5 = vpack.c.bf16 %v1963_v4, %v1962_v62 }
 0x4f6   :  { %v1855_v8 = vpop.f32.mrb[104].mxu0 }
 0x4f7   :  { %v1856_v9 = vadd.f32 %v5051_v26, %v1855_v8  ;;  %v3611_v12 = vpop.f32.mrb[105].mxu0  ;;  %3698 = vmatmul.mubr.bf16.gmra.mrb[176].mxu1 %v1994_v5 }
 0x4f8   :  { %v1858_v16 = vpop.f32.mrb[106].mxu0  ;;  %3701 = vmatprep.mubr.msk.bf16.mxu1 %vm4404_vm5, %v4403_v29 }
 0x4f9   :  { %v1859_v18 = vadd.f32 %v5051_v26, %v1858_v16  ;;  %v3612_v22 = vpop.f32.mrb[107].mxu0  ;;  %v1964_v24 = vmax.f32 %v1856_v9, 0.0 }
 0x4fb   :  { %v1965_v28 = vmax.f32 %v1859_v18, 0.0 }
 0x4fd   :  { %v1995_v33 = vpack.c.bf16 %v1965_v28, %v1964_v24 }
 0x4fe   :  { %v1863_v34 = vpop.f32.mrb[108].mxu0 }
 0x4ff   :  { %v1864_v36 = vadd.f32 %v5051_v26, %v1863_v34  ;;  %v3615_v37 = vpop.f32.mrb[109].mxu0  ;;  %3702 = vmatmul.mubr.bf16.gmra.mrb[180].mxu1 %v1995_v33 }
 0x500   :  { %v1866_v41 = vpop.f32.mrb[110].mxu0  ;;  %3705 = vmatprep.mubr.msk.bf16.mxu1 %vm4404_vm5, %v4403_v29 }
 0x501   :  { %v1867_v44 = vadd.f32 %v5051_v26, %v1866_v41  ;;  %v3616_v48 = vpop.f32.mrb[111].mxu0  ;;  %v1966_v49 = vmax.f32 %v1864_v36, 0.0 }
 0x503   :  { %v1967_v51 = vmax.f32 %v1867_v44, 0.0 }
 0x505   :  { %v1996_v52 = vpack.c.bf16 %v1967_v51, %v1966_v49 }
 0x506   :  { %v1871_v56 = vpop.f32.mrb[112].mxu0 }
 0x507   :  { %v1872_v61 = vadd.f32 %v5051_v26, %v1871_v56  ;;  %v3619_v62 = vpop.f32.mrb[113].mxu0  ;;  %3706 = vmatmul.mubr.bf16.gmra.mrb[184].mxu1 %v1996_v52 }
 0x508   :  { %v1874_v4 = vpop.f32.mrb[114].mxu0  ;;  %3709 = vmatprep.mubr.msk.bf16.mxu1 %vm4404_vm5, %v4403_v29 }
 0x509   :  { %v1875_v5 = vadd.f32 %v5051_v26, %v1874_v4  ;;  %v3620_v8 = vpop.f32.mrb[115].mxu0  ;;  %v1968_v9 = vmax.f32 %v1872_v61, 0.0 }
 0x50b   :  { %v1969_v12 = vmax.f32 %v1875_v5, 0.0 }
 0x50d   :  { %v1997_v16 = vpack.c.bf16 %v1969_v12, %v1968_v9 }
 0x50e   :  { %v1879_v18 = vpop.f32.mrb[116].mxu0 }
 0x50f   :  { %v1880_v22 = vadd.f32 %v5051_v26, %v1879_v18  ;;  %v3623_v24 = vpop.f32.mrb[117].mxu0  ;;  %3710 = vmatmul.mubr.bf16.gmra.mrb[188].mxu1 %v1997_v16 }
 0x510   :  { %v1882_v28 = vpop.f32.mrb[118].mxu0  ;;  %3713 = vmatprep.mubr.msk.bf16.mxu1 %vm4404_vm5, %v4403_v29 }
 0x511   :  { %v1883_v33 = vadd.f32 %v5051_v26, %v1882_v28  ;;  %v3624_v34 = vpop.f32.mrb[119].mxu0  ;;  %v1970_v36 = vmax.f32 %v1880_v22, 0.0 }
 0x513   :  { %v1971_v37 = vmax.f32 %v1883_v33, 0.0 }
 0x515   :  { %v1998_v41 = vpack.c.bf16 %v1971_v37, %v1970_v36 }
 0x516   :  { %v1887_v44 = vpop.f32.mrb[120].mxu0 }
 0x517   :  { %v1888_v48 = vadd.f32 %v5051_v26, %v1887_v44  ;;  %v3627_v49 = vpop.f32.mrb[121].mxu0  ;;  %3714 = vmatmul.mubr.bf16.gmra.mrb[192].mxu1 %v1998_v41 }
 0x518   :  { %v1890_v51 = vpop.f32.mrb[122].mxu0  ;;  %3717 = vmatprep.mubr.msk.bf16.mxu1 %vm4404_vm5, %v4403_v29 }
 0x519   :  { %v1891_v52 = vadd.f32 %v5051_v26, %v1890_v51  ;;  %v3628_v56 = vpop.f32.mrb[123].mxu0  ;;  %v1972_v61 = vmax.f32 %v1888_v48, 0.0 }
 0x51b   :  { %v1973_v62 = vmax.f32 %v1891_v52, 0.0 }
 0x51d   :  { %v1999_v4 = vpack.c.bf16 %v1973_v62, %v1972_v61 }
 0x51e   :  { %v1895_v5 = vpop.f32.mrb[124].mxu0 }
 0x51f   :  { %v1896_v8 = vadd.f32 %v5051_v26, %v1895_v5  ;;  %v3631_v9 = vpop.f32.mrb[125].mxu0  ;;  %3718 = vmatmul.mubr.bf16.gmra.mrb[196].mxu1 %v1999_v4 }
 0x520   :  { %v1898_v12 = vpop.f32.mrb[126].mxu0  ;;  %3721 = vmatprep.mubr.msk.bf16.mxu1 %vm4404_vm5, %v4403_v29 }
 0x521   :  { %v1899_v16 = vadd.f32 %v5051_v26, %v1898_v12  ;;  %v3632_v18 = vpop.f32.mrb[127].mxu0  ;;  %v1974_v22 = vmax.f32 %v1896_v8, 0.0 }
 0x523   :  { %v1975_v24 = vmax.f32 %v1899_v16, 0.0 }
 0x525   :  { %v2000_v28 = vpack.c.bf16 %v1975_v24, %v1974_v22 }
 0x526   :  { %v1903_v33 = vpop.f32.mrb[128].mxu0 }
 0x527   :  { %v1904_v34 = vadd.f32 %v5051_v26, %v1903_v33  ;;  %v3635_v36 = vpop.f32.mrb[129].mxu0  ;;  %3722 = vmatmul.mubr.bf16.gmra.mrb[200].mxu1 %v2000_v28 }
 0x528   :  { %v1906_v37 = vpop.f32.mrb[130].mxu0  ;;  %3725 = vmatprep.mubr.msk.bf16.mxu1 %vm4404_vm5, %v4403_v29 }
 0x529   :  { %v1907_v41 = vadd.f32 %v5051_v26, %v1906_v37  ;;  %v3636_v44 = vpop.f32.mrb[131].mxu0  ;;  %v1976_v48 = vmax.f32 %v1904_v34, 0.0 }
 0x52b   :  { %v1977_v49 = vmax.f32 %v1907_v41, 0.0 }
 0x52d   :  { %v2001_v51 = vpack.c.bf16 %v1977_v49, %v1976_v48 }
 0x52e   :  { %v1911_v52 = vpop.f32.mrb[132].mxu0 }
 0x52f   :  { %v1912_v56 = vadd.f32 %v5051_v26, %v1911_v52  ;;  %v3639_v61 = vpop.f32.mrb[133].mxu0  ;;  %3726 = vmatmul.mubr.bf16.gmra.mrb[204].mxu1 %v2001_v51 }
 0x530   :  { %v1914_v62 = vpop.f32.mrb[134].mxu0  ;;  %3729 = vmatprep.mubr.msk.bf16.mxu1 %vm4404_vm5, %v4403_v29 }
 0x531   :  { %v1915_v4 = vadd.f32 %v5051_v26, %v1914_v62  ;;  %v3640_v5 = vpop.f32.mrb[135].mxu0  ;;  %v1978_v8 = vmax.f32 %v1912_v56, 0.0 }
 0x533   :  { %v1979_v9 = vmax.f32 %v1915_v4, 0.0 }
 0x535   :  { %v2002_v12 = vpack.c.bf16 %v1979_v9, %v1978_v8 }
 0x536   :  { %v1919_v16 = vpop.f32.mrb[136].mxu0 }
 0x537   :  { %v1920_v18 = vadd.f32 %v5051_v26, %v1919_v16  ;;  %v3643_v22 = vpop.f32.mrb[137].mxu0  ;;  %3730 = vmatmul.mubr.bf16.gmra.mrb[208].mxu1 %v2002_v12 }
 0x538   :  { %v1922_v24 = vpop.f32.mrb[138].mxu0  ;;  %3733 = vmatprep.mubr.msk.bf16.mxu1 %vm4404_vm5, %v4403_v29 }
 0x539   :  { %v1923_v28 = vadd.f32 %v5051_v26, %v1922_v24  ;;  %v3644_v33 = vpop.f32.mrb[139].mxu0  ;;  %v1980_v34 = vmax.f32 %v1920_v18, 0.0 }
 0x53b   :  { %v1981_v36 = vmax.f32 %v1923_v28, 0.0 }
 0x53d   :  { %v2003_v37 = vpack.c.bf16 %v1981_v36, %v1980_v34 }
 0x53e   :  { %v1927_v41 = vpop.f32.mrb[140].mxu0 }
 0x53f   :  { %v1928_v44 = vadd.f32 %v5051_v26, %v1927_v41  ;;  %v3647_v48 = vpop.f32.mrb[141].mxu0  ;;  %3734 = vmatmul.mubr.bf16.gmra.mrb[212].mxu1 %v2003_v37 }
 0x540   :  { %v1930_v49 = vpop.f32.mrb[142].mxu0  ;;  %3737 = vmatprep.mubr.msk.bf16.mxu1 %vm4404_vm5, %v4403_v29 }
 0x541   :  { %v1931_v51 = vadd.f32 %v5051_v26, %v1930_v49  ;;  %v3648_v52 = vpop.f32.mrb[143].mxu0  ;;  %v1982_v56 = vmax.f32 %v1928_v44, 0.0 }
 0x542   :  { %v4100_v52 = vld [vmem:[#allocation16 + $0x8] sm:$0xff]  }
 0x543   :  { %v1983_v61 = vmax.f32 %v1931_v51, 0.0  ;;  %v4099_v51 = vld [vmem:[#allocation16] sm:$0xff]  }
 0x544   :  { %3941 = vmatpush3.bf16.msra.mxu1 %v4099_v51 }
 0x545   :  { %v2004_v62 = vpack.c.bf16 %v1983_v61, %v1982_v56  ;;  %3934 = vmatprep.subr.bf16.mxu1 %v4403_v29  ;;  %v940_v56 = vadd.f32 %v4691_v63, %v4717_v30  ;;  %v944_v30 = vadd.f32 %v4691_v63, %v4723_v39 }
 0x546   :  { %v1935_v4 = vpop.f32.mrb[144].mxu0 }
 0x547   :  { %v1936_v5 = vadd.f32 %v5051_v26, %v1935_v4  ;;  %v3651_v8 = vpop.f32.mrb[145].mxu0  ;;  %3738 = vmatmul.mubr.bf16.gmra.mrb[216].mxu1 %v2004_v62  ;;  %v5138_v62 = vld [vmem:[#allocation14 + $0x3] ss:$0 sm:$0xff]  ;;  %v942_v4 = vadd.f32 %v4691_v63, %v4720_v0  ;;  %v946_v0 = vadd.f32 %v4691_v63, %v4728_v43  ;;  %v948_v43 = vadd.f32 %v4691_v63, %v4733_v50 }
 0x548   :  { %v1938_v9 = vpop.f32.mrb[146].mxu0  ;;  %3741 = vmatprep.mubr.msk.bf16.mxu1 %vm4404_vm5, %v4403_v29  ;;  %3942 = vmatpush3.bf16.msra.mxu1 %v4100_v52 }
 0x549   :  { %v1939_v12 = vadd.f32 %v5051_v26, %v1938_v9  ;;  %v3652_v16 = vpop.f32.mrb[147].mxu0  ;;  %v1984_v18 = vmax.f32 %v1936_v5, 0.0  ;;  %3935 = vmatprep.subr.bf16.mxu1 %v4403_v29 }
 0x54b   :  { %v1985_v22 = vmax.f32 %v1939_v12, 0.0 }
 0x54d   :  { %v2005_v24 = vpack.c.bf16 %v1985_v22, %v1984_v18 }
 0x54e   :  { %v1943_v28 = vpop.f32.mrb[148].mxu0 }
 0x54f   :  { %v1944_v33 = vadd.f32 %v5051_v26, %v1943_v28  ;;  %v3655_v34 = vpop.f32.mrb[149].mxu0  ;;  %3742 = vmatmul.mubr.bf16.gmra.mrb[220].mxu1 %v2005_v24 }
 0x550   :  { %v1946_v36 = vpop.f32.mrb[150].mxu0  ;;  %3745 = vmatprep.mubr.msk.bf16.mxu1 %vm4404_vm5, %v4403_v29 }
 0x551   :  { %v1947_v37 = vadd.f32 %v5051_v26, %v1946_v36  ;;  %v3656_v41 = vpop.f32.mrb[151].mxu0  ;;  %v1986_v44 = vmax.f32 %v1944_v33, 0.0  ;;  %v4101_v26 = vld [vmem:[#allocation16 + $0x10] sm:$0xff]  }
 0x552   :  { %3943 = vmatpush3.bf16.msra.mxu1 %v4101_v26 }
 0x553   :  { %v1987_v48 = vmax.f32 %v1947_v37, 0.0  ;;  %3936 = vmatprep.subr.bf16.mxu1 %v4403_v29 }
 0x555   :  { %v2006_v49 = vpack.c.bf16 %v1987_v48, %v1986_v44 }
 0x557   :  { %3746 = vmatmul.mubr.bf16.gmra.mrb[224].mxu1 %v2006_v49 }
 0x558   :  { %3861 = vmatprep.mubr.msk.bf16.mxu1 %vm4404_vm5, %v4403_v29 }
 0x59a   :  { %v2106_v61 = vpop.f32.mrb[152].mxu1 }
 0x59b   :  { %v2107_v5 = vadd.f32 %v2106_v61, %v940_v56  ;;  %v3675_v8 = vpop.f32.mrb[153].mxu1 }
 0x59c   :  { %v2109_v9 = vpop.f32.mrb[154].mxu1 }
 0x59d   :  { %v2262_v12 = vadd.f32 %v5138_v62, %v2107_v5  ;;  %v2110_v16 = vadd.f32 %v2109_v9, %v942_v4  ;;  %v3676_v18 = vpop.f32.mrb[155].mxu1  ;;  %v950_v5 = vadd.f32 %v4691_v63, %v4738_v54  ;;  %v952_v54 = vadd.f32 %v4691_v63, %v4743_v60 }
 0x59f   :  { %v2263_v22 = vadd.f32 %v5138_v62, %v2110_v16  ;;  %v2300_v24 = vmax.f32 %v2262_v12, 0.0 }
 0x5a1   :  { %v2301_v28 = vmax.f32 %v2263_v22, 0.0 }
 0x5a2   :  { %v2114_v33 = vpop.f32.mrb[156].mxu1 }
 0x5a3   :  { %v2338_v34 = vpack.c.bf16 %v2301_v28, %v2300_v24  ;;  %v2115_v36 = vadd.f32 %v2114_v33, %v944_v30  ;;  %v3679_v37 = vpop.f32.mrb[157].mxu1  ;;  %v954_v33 = vadd.f32 %v4691_v63, %v4748_v2  ;;  %v956_v2 = vadd.f32 %v4691_v63, %v4753_v10 }
 0x5a4   :  { %v2117_v41 = vpop.f32.mrb[158].mxu1 }
 0x5a5   :  { %v2264_v44 = vadd.f32 %v5138_v62, %v2115_v36  ;;  %v2118_v48 = vadd.f32 %v2117_v41, %v946_v0  ;;  %v3680_v49 = vpop.f32.mrb[159].mxu1  ;;  %3766 = vmatmul.mubr.bf16.vlgmr.msra.gmra.mrb[152].mxu0 %v2338_v34 }
 0x5a6   :  { %3769 = vmatprep.mubr.msk.bf16.mxu0 %vm4404_vm5, %v4403_v29  ;;  %3842 = vmatpush3.bf16.msra.mxu0 %v4099_v51  ;;  %v4104_v49 = vld [vmem:[#allocation16 + $0x28] sm:$0xff]  }
 0x5a7   :  { %v2265_v39 = vadd.f32 %v5138_v62, %v2118_v48  ;;  %3843 = vmatprep.subr.bf16.mxu0 %v4403_v29  ;;  %v2302_v56 = vmax.f32 %v2264_v44, 0.0  ;;  %v4103_v44 = vld [vmem:[#allocation16 + $0x20] sm:$0xff]  }
 0x5a9   :  { %v2303_v61 = vmax.f32 %v2265_v39, 0.0 }
 0x5aa   :  { %v2122_v4 = vpop.f32.mrb[160].mxu1  ;;  %3844 = vmatpush3.bf16.msra.mxu0 %v4100_v52  ;;  %v4102_v52 = vld [vmem:[#allocation16 + $0x18] sm:$0xff]  }
 0x5ab   :  { %v2123_v8 = vadd.f32 %v2122_v4, %v948_v43  ;;  %v3683_v9 = vpop.f32.mrb[161].mxu1  ;;  %v2339_v12 = vpack.c.bf16 %v2303_v61, %v2302_v56  ;;  %3845 = vmatprep.subr.bf16.mxu0 %v4403_v29  ;;  %3944 = vmatpush3.bf16.msra.mxu1 %v4102_v52  ;;  %v958_v61 = vadd.f32 %v4691_v63, %v4758_v13 }
 0x5ac   :  { %v2125_v51 = vpop.f32.mrb[162].mxu1  ;;  %3937 = vmatprep.subr.bf16.mxu1 %v4403_v29  ;;  %v4105_v9 = vld [vmem:[#allocation16 + $0x30] sm:$0xff]  }
 0x5ad   :  { %v2266_v16 = vadd.f32 %v5138_v62, %v2123_v8  ;;  %v2126_v18 = vadd.f32 %v2125_v51, %v950_v5  ;;  %v3684_v22 = vpop.f32.mrb[163].mxu1  ;;  %3770 = vmatmul.mubr.bf16.gmra.mrb[156].mxu0 %v2339_v12 }
 0x5ae   :  { %3773 = vmatprep.mubr.msk.bf16.mxu0 %vm4404_vm5, %v4403_v29  ;;  %3846 = vmatpush3.bf16.msra.mxu0 %v4101_v26  ;;  %v960_v22 = vadd.f32 %v4691_v63, %v4763_v20 }
 0x5af   :  { %v2267_v50 = vadd.f32 %v5138_v62, %v2126_v18  ;;  %3847 = vmatprep.subr.bf16.mxu0 %v4403_v29  ;;  %v2304_v30 = vmax.f32 %v2266_v16, 0.0  ;;  %3945 = vmatpush3.bf16.msra.mxu1 %v4103_v44  ;;  %v4106_v18 = vld [vmem:[#allocation16 + $0x38] sm:$0xff]  }
 0x5b0   :  { %3938 = vmatprep.subr.bf16.mxu1 %v4403_v29 }
 0x5b1   :  { %v2305_v24 = vmax.f32 %v2267_v50, 0.0 }
 0x5b2   :  { %v2130_v28 = vpop.f32.mrb[164].mxu1  ;;  %3848 = vmatpush3.bf16.msra.mxu0 %v4102_v52 }
 0x5b3   :  { %v2131_v0 = vadd.f32 %v2130_v28, %v952_v54  ;;  %v3687_v26 = vpop.f32.mrb[165].mxu1  ;;  %v2340_v34 = vpack.c.bf16 %v2305_v24, %v2304_v30  ;;  %3849 = vmatprep.subr.bf16.mxu0 %v4403_v29  ;;  %3946 = vmatpush3.bf16.msra.mxu1 %v4104_v49  ;;  %v962_v30 = vadd.f32 %v4691_v63, %v4768_v23 }
 0x5b4   :  { %v2133_v36 = vpop.f32.mrb[166].mxu1  ;;  %3939 = vmatprep.subr.bf16.mxu1 %v4403_v29 }
 0x5b5   :  { %v2268_v37 = vadd.f32 %v5138_v62, %v2131_v0  ;;  %v2134_v41 = vadd.f32 %v2133_v36, %v954_v33  ;;  %v3688_v60 = vpop.f32.mrb[167].mxu1  ;;  %3774 = vmatmul.mubr.bf16.gmra.mrb[160].mxu0 %v2340_v34 }
 0x5b6   :  { %3777 = vmatprep.mubr.msk.bf16.mxu0 %vm4404_vm5, %v4403_v29  ;;  %3850 = vmatpush3.bf16.msra.mxu0 %v4103_v44  ;;  %v966_v44 = vadd.f32 %v4691_v63, %v4776_v35 }
 0x5b7   :  { %v2269_v48 = vadd.f32 %v5138_v62, %v2134_v41  ;;  %3851 = vmatprep.subr.bf16.mxu0 %v4403_v29  ;;  %v2306_v39 = vmax.f32 %v2268_v37, 0.0  ;;  %3947 = vmatpush3.bf16.msra.mxu1 %v4105_v9  ;;  %v964_v37 = vadd.f32 %v4691_v63, %v4771_v32 }
 0x5b8   :  { %3940 = vmatprep.subr.bf16.mxu1 %v4403_v29 }
 0x5b9   :  { %v2307_v43 = vmax.f32 %v2269_v48, 0.0 }
 0x5ba   :  { %v2138_v56 = vpop.f32.mrb[168].mxu1  ;;  %3852 = vmatpush3.bf16.msra.mxu0 %v4104_v49 }
 0x5bb   :  { %v2139_v4 = vadd.f32 %v2138_v56, %v956_v2  ;;  %v3691_v5 = vpop.f32.mrb[169].mxu1  ;;  %v2341_v8 = vpack.c.bf16 %v2307_v43, %v2306_v39  ;;  %3853 = vmatprep.subr.bf16.mxu0 %v4403_v29  ;;  %3948 = vmatpush3.bf16.msra.mxu1 %v4106_v18 }
 0x5bc   :  { %v2141_v12 = vpop.f32.mrb[170].mxu1 }
 0x5bd   :  { %v2270_v51 = vadd.f32 %v5138_v62, %v2139_v4  ;;  %v2142_v10 = vadd.f32 %v2141_v12, %v958_v61  ;;  %v3692_v16 = vpop.f32.mrb[171].mxu1  ;;  %3778 = vmatmul.mubr.bf16.gmra.mrb[164].mxu0 %v2341_v8  ;;  %v968_v4 = vadd.f32 %v4691_v63, %v4779_v42 }
 0x5be   :  { %3781 = vmatprep.mubr.msk.bf16.mxu0 %vm4404_vm5, %v4403_v29  ;;  %3854 = vmatpush3.bf16.msra.mxu0 %v4105_v9  ;;  %v970_v9 = vadd.f32 %v4691_v63, %v4784_v46 }
 0x5bf   :  { %v2271_v13 = vadd.f32 %v5138_v62, %v2142_v10  ;;  %3855 = vmatprep.subr.bf16.mxu0 %v4403_v29  ;;  %v2308_v50 = vmax.f32 %v2270_v51, 0.0 }
 0x5c1   :  { %v2309_v52 = vmax.f32 %v2271_v13, 0.0 }
 0x5c2   :  { %v2146_v54 = vpop.f32.mrb[172].mxu1  ;;  %3856 = vmatpush3.bf16.msra.mxu0 %v4106_v18 }
 0x5c3   :  { %v2147_v24 = vadd.f32 %v2146_v54, %v960_v22  ;;  %v3695_v28 = vpop.f32.mrb[173].mxu1  ;;  %v2342_v33 = vpack.c.bf16 %v2309_v52, %v2308_v50  ;;  %v972_v50 = vadd.f32 %v4691_v63, %v4787_v53 }
 0x5c4   :  { %v2149_v0 = vpop.f32.mrb[174].mxu1 }
 0x5c5   :  { %v2272_v26 = vadd.f32 %v5138_v62, %v2147_v24  ;;  %v2150_v34 = vadd.f32 %v2149_v0, %v962_v30  ;;  %v3696_v36 = vpop.f32.mrb[175].mxu1  ;;  %3782 = vmatmul.mubr.bf16.gmra.mrb[168].mxu0 %v2342_v33  ;;  %v974_v30 = vadd.f32 %v4691_v63, %v4792_v57 }
 0x5c6   :  { %3785 = vmatprep.mubr.msk.bf16.mxu0 %vm4404_vm5, %v4403_v29 }
 0x5c7   :  { %v2273_v20 = vadd.f32 %v5138_v62, %v2150_v34  ;;  %v2310_v23 = vmax.f32 %v2272_v26, 0.0 }
 0x5c9   :  { %v2311_v41 = vmax.f32 %v2273_v20, 0.0  ;;  %v976_v20 = vadd.f32 %v4691_v63, %v4795_v3 }
 0x5ca   :  { %v2154_v60 = vpop.f32.mrb[176].mxu1 }
 0x5cb   :  { %v2155_v48 = vadd.f32 %v2154_v60, %v964_v37  ;;  %v3699_v49 = vpop.f32.mrb[177].mxu1  ;;  %v2343_v2 = vpack.c.bf16 %v2311_v41, %v2310_v23  ;;  %v978_v41 = vadd.f32 %v4691_v63, %v4800_v6 }
 0x5cc   :  { %v2157_v39 = vpop.f32.mrb[178].mxu1 }
 0x5cd   :  { %v2274_v43 = vadd.f32 %v5138_v62, %v2155_v48  ;;  %v2158_v56 = vadd.f32 %v2157_v39, %v966_v44  ;;  %v3700_v61 = vpop.f32.mrb[179].mxu1  ;;  %3786 = vmatmul.mubr.bf16.gmra.mrb[172].mxu0 %v2343_v2 }
 0x5ce   :  { %3789 = vmatprep.mubr.msk.bf16.mxu0 %vm4404_vm5, %v4403_v29 }
 0x5cf   :  { %v2275_v32 = vadd.f32 %v5138_v62, %v2158_v56  ;;  %v2312_v5 = vmax.f32 %v2274_v43, 0.0  ;;  %v980_v56 = vadd.f32 %v4691_v63, %v4803_v14 }
 0x5d1   :  { %v2313_v8 = vmax.f32 %v2275_v32, 0.0 }
 0x5d2   :  { %v2162_v35 = vpop.f32.mrb[180].mxu1 }
 0x5d3   :  { %v2163_v12 = vadd.f32 %v2162_v35, %v968_v4  ;;  %v3703_v51 = vpop.f32.mrb[181].mxu1  ;;  %v2344_v10 = vpack.c.bf16 %v2313_v8, %v2312_v5  ;;  %v982_v4 = vadd.f32 %v4691_v63, %v4808_v17 }
 0x5d4   :  { %v2165_v16 = vpop.f32.mrb[182].mxu1 }
 0x5d5   :  { %v2276_v13 = vadd.f32 %v5138_v62, %v2163_v12  ;;  %v2166_v18 = vadd.f32 %v2165_v16, %v970_v9  ;;  %v3704_v22 = vpop.f32.mrb[183].mxu1  ;;  %3790 = vmatmul.mubr.bf16.gmra.mrb[176].mxu0 %v2344_v10  ;;  %v984_v16 = vadd.f32 %v4691_v63, %v4811_v25 }
 0x5d6   :  { %3793 = vmatprep.mubr.msk.bf16.mxu0 %vm4404_vm5, %v4403_v29  ;;  %v986_v22 = vadd.f32 %v4691_v63, %v4816_v31 }
 0x5d7   :  { %v2277_v42 = vadd.f32 %v5138_v62, %v2166_v18  ;;  %v2314_v52 = vmax.f32 %v2276_v13, 0.0 }
 0x5d9   :  { %v2315_v54 = vmax.f32 %v2277_v42, 0.0 }
 0x5da   :  { %v2170_v46 = vpop.f32.mrb[184].mxu1 }
 0x5db   :  { %v2171_v24 = vadd.f32 %v2170_v46, %v972_v50  ;;  %v3707_v28 = vpop.f32.mrb[185].mxu1  ;;  %v2345_v33 = vpack.c.bf16 %v2315_v54, %v2314_v52 }
 0x5dc   :  { %v2173_v0 = vpop.f32.mrb[186].mxu1  ;;  %v988_v28 = vadd.f32 %v4691_v63, %v4819_v40 }
 0x5dd   :  { %v2278_v26 = vadd.f32 %v5138_v62, %v2171_v24  ;;  %v2174_v34 = vadd.f32 %v2173_v0, %v974_v30  ;;  %v3708_v36 = vpop.f32.mrb[187].mxu1  ;;  %3794 = vmatmul.mubr.bf16.gmra.mrb[180].mxu0 %v2345_v33 }
 0x5de   :  { %3797 = vmatprep.mubr.msk.bf16.mxu0 %vm4404_vm5, %v4403_v29 }
 0x5df   :  { %v2279_v53 = vadd.f32 %v5138_v62, %v2174_v34  ;;  %v2316_v37 = vmax.f32 %v2278_v26, 0.0  ;;  %v990_v26 = vadd.f32 %v4691_v63, %v4824_v45 }
 0x5e1   :  { %v2317_v23 = vmax.f32 %v2279_v53, 0.0 }
 0x5e2   :  { %v2178_v57 = vpop.f32.mrb[188].mxu1 }
 0x5e3   :  { %v2179_v60 = vadd.f32 %v2178_v57, %v976_v20  ;;  %v3711_v44 = vpop.f32.mrb[189].mxu1  ;;  %v2346_v48 = vpack.c.bf16 %v2317_v23, %v2316_v37 }
 0x5e4   :  { %v2181_v49 = vpop.f32.mrb[190].mxu1 }
 0x5e5   :  { %v2280_v2 = vadd.f32 %v5138_v62, %v2179_v60  ;;  %v2182_v39 = vadd.f32 %v2181_v49, %v978_v41  ;;  %v3712_v43 = vpop.f32.mrb[191].mxu1  ;;  %3798 = vmatmul.mubr.bf16.gmra.mrb[184].mxu0 %v2346_v48  ;;  %v992_v41 = vadd.f32 %v4691_v63, %v4827_v55  ;;  %v994_v48 = vadd.f32 %v4691_v63, %v4832_v59 }
 0x5e6   :  { %3801 = vmatprep.mubr.msk.bf16.mxu0 %vm4404_vm5, %v4403_v29 }
 0x5e7   :  { %v2281_v3 = vadd.f32 %v5138_v62, %v2182_v39  ;;  %v2318_v61 = vmax.f32 %v2280_v2, 0.0 }
 0x5e9   :  { %v2319_v32 = vmax.f32 %v2281_v3, 0.0 }
 0x5ea   :  { %v2186_v6 = vpop.f32.mrb[192].mxu1 }
 0x5eb   :  { %v2187_v5 = vadd.f32 %v2186_v6, %v980_v56  ;;  %v3715_v8 = vpop.f32.mrb[193].mxu1  ;;  %v2347_v35 = vpack.c.bf16 %v2319_v32, %v2318_v61  ;;  %v996_v32 = vadd.f32 %v4691_v63, %v4835_v7 }
 0x5ec   :  { %v2189_v9 = vpop.f32.mrb[194].mxu1 }
 0x5ed   :  { %v2282_v12 = vadd.f32 %v5138_v62, %v2187_v5  ;;  %v2190_v51 = vadd.f32 %v2189_v9, %v982_v4  ;;  %v3716_v10 = vpop.f32.mrb[195].mxu1  ;;  %3802 = vmatmul.mubr.bf16.gmra.mrb[188].mxu0 %v2347_v35  ;;  %v998_v5 = vadd.f32 %v4691_v63, %v4840_v11 }
 0x5ee   :  { %3805 = vmatprep.mubr.msk.bf16.mxu0 %vm4404_vm5, %v4403_v29 }
 0x5ef   :  { %v2283_v14 = vadd.f32 %v5138_v62, %v2190_v51  ;;  %v2320_v13 = vmax.f32 %v2282_v12, 0.0 }
 0x5f1   :  { %v2321_v18 = vmax.f32 %v2283_v14, 0.0 }
 0x5f2   :  { %v2194_v17 = vpop.f32.mrb[196].mxu1 }
 0x5f3   :  { %v2195_v42 = vadd.f32 %v2194_v17, %v984_v16  ;;  %v3719_v50 = vpop.f32.mrb[197].mxu1  ;;  %v2348_v52 = vpack.c.bf16 %v2321_v18, %v2320_v13  ;;  %v1000_v16 = vadd.f32 %v4691_v63, %v4843_v21  ;;  %v1002_v17 = vadd.f32 %v4691_v63, %v4848_v27 }
 0x5f4   :  { %v2197_v54 = vpop.f32.mrb[198].mxu1 }
 0x5f5   :  { %v2284_v46 = vadd.f32 %v5138_v62, %v2195_v42  ;;  %v2198_v30 = vadd.f32 %v2197_v54, %v986_v22  ;;  %v3720_v24 = vpop.f32.mrb[199].mxu1  ;;  %3806 = vmatmul.mubr.bf16.gmra.mrb[192].mxu0 %v2348_v52 }
 0x5f6   :  { %3809 = vmatprep.mubr.msk.bf16.mxu0 %vm4404_vm5, %v4403_v29  ;;  %v1004_v24 = vadd.f32 %v4691_v63, %v4851_v38 }
 0x5f7   :  { %v2285_v25 = vadd.f32 %v5138_v62, %v2198_v30  ;;  %v2322_v33 = vmax.f32 %v2284_v46, 0.0 }
 0x5f9   :  { %v2323_v0 = vmax.f32 %v2285_v25, 0.0 }
 0x5fa   :  { %v2202_v31 = vpop.f32.mrb[200].mxu1 }
 0x5fb   :  { %v2203_v34 = vadd.f32 %v2202_v31, %v988_v28  ;;  %v3723_v36 = vpop.f32.mrb[201].mxu1  ;;  %v2349_v53 = vpack.c.bf16 %v2323_v0, %v2322_v33  ;;  %v1006_v33 = vadd.f32 %v4691_v63, %v4856_v47 }
 0x5fc   :  { %v2205_v20 = vpop.f32.mrb[202].mxu1 }
 0x5fd   :  { %v2286_v37 = vadd.f32 %v5138_v62, %v2203_v34  ;;  %v2206_v23 = vadd.f32 %v2205_v20, %v990_v26  ;;  %v3724_v57 = vpop.f32.mrb[203].mxu1  ;;  %3810 = vmatmul.mubr.bf16.gmra.mrb[196].mxu0 %v2349_v53 }
 0x5fe   :  { %3813 = vmatprep.mubr.msk.bf16.mxu0 %vm4404_vm5, %v4403_v29 }
 0x5ff   :  { %v2287_v40 = vadd.f32 %v5138_v62, %v2206_v23  ;;  %v2324_v60 = vmax.f32 %v2286_v37, 0.0  ;;  %v1008_v37 = vadd.f32 %v4691_v63, %v4859_v58 }
 0x601   :  { %v2325_v44 = vmax.f32 %v2287_v40, 0.0  ;;  %v1010_v40 = vadd.f32 %v4691_v63, %v4864_v1 }
 0x602   :  { %v2210_v45 = vpop.f32.mrb[204].mxu1 }
 0x603   :  { %v2211_v49 = vadd.f32 %v2210_v45, %v992_v41  ;;  %v3727_v2 = vpop.f32.mrb[205].mxu1  ;;  %v2350_v39 = vpack.c.bf16 %v2325_v44, %v2324_v60 }
 0x604   :  { %v2213_v43 = vpop.f32.mrb[206].mxu1 }
 0x605   :  { %v2288_v3 = vadd.f32 %v5138_v62, %v2211_v49  ;;  %v2214_v56 = vadd.f32 %v2213_v43, %v994_v48  ;;  %v3728_v61 = vpop.f32.mrb[207].mxu1  ;;  %3814 = vmatmul.mubr.bf16.gmra.mrb[200].mxu0 %v2350_v39  ;;  %v1012_v39 = vadd.f32 %v4691_v63, %v4867_v15 }
 0x606   :  { %3817 = vmatprep.mubr.msk.bf16.mxu0 %vm4404_vm5, %v4403_v29 }
 0x607   :  { %v2289_v55 = vadd.f32 %v5138_v62, %v2214_v56  ;;  %v2326_v6 = vmax.f32 %v2288_v3, 0.0  ;;  %v1014_v56 = vadd.f32 %v4691_v63, %v4872_v19  ;;  %v5302_v63 = vld [vmem:[#allocation14 + $0x4] ss:$0 sm:$0xff] }
 0x609   :  { %v2327_v4 = vmax.f32 %v2289_v55, 0.0 }
 0x60a   :  { %v2218_v59 = vpop.f32.mrb[208].mxu1 }
 0x60b   :  { %v2219_v8 = vadd.f32 %v2218_v59, %v996_v32  ;;  %v3731_v35 = vpop.f32.mrb[209].mxu1  ;;  %v2351_v9 = vpack.c.bf16 %v2327_v4, %v2326_v6 }
 0x60c   :  { %v2221_v12 = vpop.f32.mrb[210].mxu1 }
 0x60d   :  { %v2290_v51 = vadd.f32 %v5138_v62, %v2219_v8  ;;  %v2222_v10 = vadd.f32 %v2221_v12, %v998_v5  ;;  %v3732_v14 = vpop.f32.mrb[211].mxu1  ;;  %3818 = vmatmul.mubr.bf16.gmra.mrb[204].mxu0 %v2351_v9 }
 0x60e   :  { %3821 = vmatprep.mubr.msk.bf16.mxu0 %vm4404_vm5, %v4403_v29 }
 0x60f   :  { %v2291_v7 = vadd.f32 %v5138_v62, %v2222_v10  ;;  %v2328_v13 = vmax.f32 %v2290_v51, 0.0 }
 0x611   :  { %v2329_v18 = vmax.f32 %v2291_v7, 0.0 }
 0x612   :  { %v2226_v11 = vpop.f32.mrb[212].mxu1 }
 0x613   :  { %v2227_v22 = vadd.f32 %v2226_v11, %v1000_v16  ;;  %v3735_v42 = vpop.f32.mrb[213].mxu1  ;;  %v2352_v50 = vpack.c.bf16 %v2329_v18, %v2328_v13 }
 0x614   :  { %v2229_v52 = vpop.f32.mrb[214].mxu1 }
 0x615   :  { %v2292_v54 = vadd.f32 %v5138_v62, %v2227_v22  ;;  %v2230_v46 = vadd.f32 %v2229_v52, %v1002_v17  ;;  %v3736_v30 = vpop.f32.mrb[215].mxu1  ;;  %3822 = vmatmul.mubr.bf16.gmra.mrb[208].mxu0 %v2352_v50 }
 0x616   :  { %3825 = vmatprep.mubr.msk.bf16.mxu0 %vm4404_vm5, %v4403_v29 }
 0x617   :  { %v2293_v21 = vadd.f32 %v5138_v62, %v2230_v46  ;;  %v2330_v25 = vmax.f32 %v2292_v54, 0.0 }
 0x619   :  { %v2331_v28 = vmax.f32 %v2293_v21, 0.0 }
 0x61a   :  { %v2234_v27 = vpop.f32.mrb[216].mxu1 }
 0x61b   :  { %v2235_v0 = vadd.f32 %v2234_v27, %v1004_v24  ;;  %v3739_v31 = vpop.f32.mrb[217].mxu1  ;;  %v2353_v26 = vpack.c.bf16 %v2331_v28, %v2330_v25 }
 0x61c   :  { %v2237_v34 = vpop.f32.mrb[218].mxu1 }
 0x61d   :  { %v2294_v36 = vadd.f32 %v5138_v62, %v2235_v0  ;;  %v2238_v53 = vadd.f32 %v2237_v34, %v1006_v33  ;;  %v3740_v20 = vpop.f32.mrb[219].mxu1  ;;  %3826 = vmatmul.mubr.bf16.gmra.mrb[212].mxu0 %v2353_v26 }
 0x61e   :  { %3829 = vmatprep.mubr.msk.bf16.mxu0 %vm4404_vm5, %v4403_v29 }
 0x61f   :  { %v2295_v38 = vadd.f32 %v5138_v62, %v2238_v53  ;;  %v2332_v23 = vmax.f32 %v2294_v36, 0.0 }
 0x621   :  { %v2333_v57 = vmax.f32 %v2295_v38, 0.0 }
 0x622   :  { %v2242_v47 = vpop.f32.mrb[220].mxu1 }
 0x623   :  { %v2243_v41 = vadd.f32 %v2242_v47, %v1008_v37  ;;  %v3743_v60 = vpop.f32.mrb[221].mxu1  ;;  %v2354_v44 = vpack.c.bf16 %v2333_v57, %v2332_v23 }
 0x624   :  { %v2245_v45 = vpop.f32.mrb[222].mxu1 }
 0x625   :  { %v2296_v48 = vadd.f32 %v5138_v62, %v2243_v41  ;;  %v2246_v49 = vadd.f32 %v2245_v45, %v1010_v40  ;;  %v3744_v2 = vpop.f32.mrb[223].mxu1  ;;  %3830 = vmatmul.mubr.bf16.gmra.mrb[216].mxu0 %v2354_v44 }
 0x626   :  { %3833 = vmatprep.mubr.msk.bf16.mxu0 %vm4404_vm5, %v4403_v29 }
 0x627   :  { %v2297_v58 = vadd.f32 %v5138_v62, %v2246_v49  ;;  %v2334_v43 = vmax.f32 %v2296_v48, 0.0 }
 0x629   :  { %v2335_v3 = vmax.f32 %v2297_v58, 0.0 }
 0x62a   :  { %v2250_v1 = vpop.f32.mrb[224].mxu1 }
 0x62b   :  { %v2251_v61 = vadd.f32 %v2250_v1, %v1012_v39  ;;  %v3747_v55 = vpop.f32.mrb[225].mxu1  ;;  %v2355_v32 = vpack.c.bf16 %v2335_v3, %v2334_v43 }
 0x62c   :  { %v2253_v6 = vpop.f32.mrb[226].mxu1 }
 0x62d   :  { %v2298_v4 = vadd.f32 %v5138_v62, %v2251_v61  ;;  %v2254_v59 = vadd.f32 %v2253_v6, %v1014_v56  ;;  %v3748_v5 = vpop.f32.mrb[227].mxu1  ;;  %3834 = vmatmul.mubr.bf16.gmra.mrb[220].mxu0 %v2355_v32 }
 0x62e   :  { %3837 = vmatprep.mubr.msk.bf16.mxu0 %vm4404_vm5, %v4403_v29 }
 0x62f   :  { %v2299_v15 = vadd.f32 %v5138_v62, %v2254_v59  ;;  %v2336_v8 = vmax.f32 %v2298_v4, 0.0 }
 0x631   :  { %v2337_v35 = vmax.f32 %v2299_v15, 0.0 }
 0x633   :  { %v2356_v9 = vpack.c.bf16 %v2337_v35, %v2336_v8 }
 0x635   :  { %3838 = vmatmul.mubr.bf16.gmra.mrb[224].mxu0 %v2356_v9 }
 0x636   :  { %3857 = vmatprep.mubr.msk.bf16.mxu0 %vm4404_vm5, %v4403_v29 }
 0x678   :  { %v2461_v19 = vpop.f32.mrb[152].mxu0 }
 0x679   :  { %v2462_v12 = vadd.f32 %v5302_v63, %v2461_v19  ;;  %v3767_v51 = vpop.f32.mrb[153].mxu0 }
 0x67a   :  { %v2464_v10 = vpop.f32.mrb[154].mxu0 }
 0x67b   :  { %v2465_v14 = vadd.f32 %v5302_v63, %v2464_v10  ;;  %v3768_v7 = vpop.f32.mrb[155].mxu0  ;;  %v2612_v16 = vmax.f32 %v2462_v12, 0.0 }
 0x67d   :  { %v2613_v13 = vmax.f32 %v2465_v14, 0.0 }
 0x67f   :  { %v2650_v62 = vpack.c.bf16 %v2613_v13, %v2612_v16 }
 0x680   :  { %v2469_v18 = vpop.f32.mrb[156].mxu0 }
 0x681   :  { %v2470_v11 = vadd.f32 %v5302_v63, %v2469_v18  ;;  %v3771_v17 = vpop.f32.mrb[157].mxu0  ;;  %3858 = vmatmul.mubr.bf16.vlgmr.msra.gmra.mrb[228].mxu0 %v2650_v62 }
 0x682   :  { %v2472_v22 = vpop.f32.mrb[158].mxu0 }
 0x683   :  { %v2473_v42 = vadd.f32 %v5302_v63, %v2472_v22  ;;  %v3772_v50 = vpop.f32.mrb[159].mxu0  ;;  %v2614_v52 = vmax.f32 %v2470_v11, 0.0 }
 0x685   :  { %v2615_v54 = vmax.f32 %v2473_v42, 0.0 }
 0x687   :  { %v2651_v46 = vpack.c.bf16 %v2615_v54, %v2614_v52 }
 0x688   :  { %v2477_v30 = vpop.f32.mrb[160].mxu0 }
 0x689   :  { %v2478_v21 = vadd.f32 %v5302_v63, %v2477_v30  ;;  %v3775_v24 = vpop.f32.mrb[161].mxu0  ;;  %3862 = vmatmul.mubr.bf16.vlgmr.msra.gmra.mrb[228].mxu1 %v2651_v46 }
 0x68a   :  { %v2480_v25 = vpop.f32.mrb[162].mxu0  ;;  %3865 = vmatprep.mubr.msk.bf16.mxu1 %vm4404_vm5, %v4403_v29 }
 0x68b   :  { %v2481_v28 = vadd.f32 %v5302_v63, %v2480_v25  ;;  %v3776_v27 = vpop.f32.mrb[163].mxu0  ;;  %v2616_v33 = vmax.f32 %v2478_v21, 0.0 }
 0x68d   :  { %v2617_v0 = vmax.f32 %v2481_v28, 0.0 }
 0x68f   :  { %v2652_v31 = vpack.c.bf16 %v2617_v0, %v2616_v33 }
 0x690   :  { %v2485_v26 = vpop.f32.mrb[164].mxu0 }
 0x691   :  { %v2486_v34 = vadd.f32 %v5302_v63, %v2485_v26  ;;  %v3779_v36 = vpop.f32.mrb[165].mxu0  ;;  %3866 = vmatmul.mubr.bf16.gmra.mrb[232].mxu1 %v2652_v31 }
 0x692   :  { %v2488_v53 = vpop.f32.mrb[166].mxu0  ;;  %3869 = vmatprep.mubr.msk.bf16.mxu1 %vm4404_vm5, %v4403_v29 }
 0x693   :  { %v2489_v20 = vadd.f32 %v5302_v63, %v2488_v53  ;;  %v3780_v38 = vpop.f32.mrb[167].mxu0  ;;  %v2618_v37 = vmax.f32 %v2486_v34, 0.0 }
 0x695   :  { %v2619_v23 = vmax.f32 %v2489_v20, 0.0 }
 0x697   :  { %v2653_v57 = vpack.c.bf16 %v2619_v23, %v2618_v37 }
 0x698   :  { %v2493_v47 = vpop.f32.mrb[168].mxu0 }
 0x699   :  { %v2494_v40 = vadd.f32 %v5302_v63, %v2493_v47  ;;  %v3783_v41 = vpop.f32.mrb[169].mxu0  ;;  %3870 = vmatmul.mubr.bf16.gmra.mrb[236].mxu1 %v2653_v57 }
 0x69a   :  { %v2496_v60 = vpop.f32.mrb[170].mxu0  ;;  %3873 = vmatprep.mubr.msk.bf16.mxu1 %vm4404_vm5, %v4403_v29 }
 0x69b   :  { %v2497_v44 = vadd.f32 %v5302_v63, %v2496_v60  ;;  %v3784_v45 = vpop.f32.mrb[171].mxu0  ;;  %v2620_v48 = vmax.f32 %v2494_v40, 0.0 }
 0x69d   :  { %v2621_v49 = vmax.f32 %v2497_v44, 0.0 }
 0x69f   :  { %v2654_v2 = vpack.c.bf16 %v2621_v49, %v2620_v48 }
 0x6a0   :  { %v2501_v58 = vpop.f32.mrb[172].mxu0 }
 0x6a1   :  { %v2502_v39 = vadd.f32 %v5302_v63, %v2501_v58  ;;  %v3787_v43 = vpop.f32.mrb[173].mxu0  ;;  %3874 = vmatmul.mubr.bf16.gmra.mrb[240].mxu1 %v2654_v2 }
 0x6a2   :  { %v2504_v3 = vpop.f32.mrb[174].mxu0  ;;  %3877 = vmatprep.mubr.msk.bf16.mxu1 %vm4404_vm5, %v4403_v29 }
 0x6a3   :  { %v2505_v1 = vadd.f32 %v5302_v63, %v2504_v3  ;;  %v3788_v56 = vpop.f32.mrb[175].mxu0  ;;  %v2622_v61 = vmax.f32 %v2502_v39, 0.0 }
 0x6a5   :  { %v2623_v55 = vmax.f32 %v2505_v1, 0.0 }
 0x6a7   :  { %v2655_v32 = vpack.c.bf16 %v2623_v55, %v2622_v61 }
 0x6a8   :  { %v2509_v6 = vpop.f32.mrb[176].mxu0 }
 0x6a9   :  { %v2510_v4 = vadd.f32 %v5302_v63, %v2509_v6  ;;  %v3791_v59 = vpop.f32.mrb[177].mxu0  ;;  %3878 = vmatmul.mubr.bf16.gmra.mrb[244].mxu1 %v2655_v32 }
 0x6aa   :  { %v2512_v5 = vpop.f32.mrb[178].mxu0  ;;  %3881 = vmatprep.mubr.msk.bf16.mxu1 %vm4404_vm5, %v4403_v29 }
 0x6ab   :  { %v2513_v15 = vadd.f32 %v5302_v63, %v2512_v5  ;;  %v3792_v8 = vpop.f32.mrb[179].mxu0  ;;  %v2624_v35 = vmax.f32 %v2510_v4, 0.0 }
 0x6ad   :  { %v2625_v9 = vmax.f32 %v2513_v15, 0.0 }
 0x6af   :  { %v2656_v19 = vpack.c.bf16 %v2625_v9, %v2624_v35 }
 0x6b0   :  { %v2517_v12 = vpop.f32.mrb[180].mxu0 }
 0x6b1   :  { %v2518_v51 = vadd.f32 %v5302_v63, %v2517_v12  ;;  %v3795_v10 = vpop.f32.mrb[181].mxu0  ;;  %3882 = vmatmul.mubr.bf16.gmra.mrb[248].mxu1 %v2656_v19 }
 0x6b2   :  { %v2520_v14 = vpop.f32.mrb[182].mxu0  ;;  %3885 = vmatprep.mubr.msk.bf16.mxu1 %vm4404_vm5, %v4403_v29 }
 0x6b3   :  { %v2521_v7 = vadd.f32 %v5302_v63, %v2520_v14  ;;  %v3796_v16 = vpop.f32.mrb[183].mxu0  ;;  %v2626_v13 = vmax.f32 %v2518_v51, 0.0 }
 0x6b5   :  { %v2627_v62 = vmax.f32 %v2521_v7, 0.0 }
 0x6b7   :  { %v2657_v18 = vpack.c.bf16 %v2627_v62, %v2626_v13 }
 0x6b8   :  { %v2525_v11 = vpop.f32.mrb[184].mxu0 }
 0x6b9   :  { %v2526_v17 = vadd.f32 %v5302_v63, %v2525_v11  ;;  %v3799_v22 = vpop.f32.mrb[185].mxu0  ;;  %3886 = vmatmul.mubr.bf16.gmra.mrb[252].mxu1 %v2657_v18 }
 0x6ba   :  { %v2528_v42 = vpop.f32.mrb[186].mxu0  ;;  %3889 = vmatprep.mubr.msk.bf16.mxu1 %vm4404_vm5, %v4403_v29 }
 0x6bb   :  { %v2529_v50 = vadd.f32 %v5302_v63, %v2528_v42  ;;  %v3800_v52 = vpop.f32.mrb[187].mxu0  ;;  %v2628_v54 = vmax.f32 %v2526_v17, 0.0 }
 0x6bd   :  { %v2629_v46 = vmax.f32 %v2529_v50, 0.0 }
 0x6bf   :  { %v2658_v30 = vpack.c.bf16 %v2629_v46, %v2628_v54 }
 0x6c0   :  { %v2533_v21 = vpop.f32.mrb[188].mxu0 }
 0x6c1   :  { %v2534_v24 = vadd.f32 %v5302_v63, %v2533_v21  ;;  %v3803_v25 = vpop.f32.mrb[189].mxu0  ;;  %3890 = vmatmul.mubr.bf16.gmra.mrb[0].mxu1 %v2658_v30 }
 0x6c2   :  { %v2536_v28 = vpop.f32.mrb[190].mxu0  ;;  %3893 = vmatprep.mubr.msk.bf16.mxu1 %vm4404_vm5, %v4403_v29 }
 0x6c3   :  { %v2537_v27 = vadd.f32 %v5302_v63, %v2536_v28  ;;  %v3804_v33 = vpop.f32.mrb[191].mxu0  ;;  %v2630_v0 = vmax.f32 %v2534_v24, 0.0 }
 0x6c5   :  { %v2631_v31 = vmax.f32 %v2537_v27, 0.0 }
 0x6c7   :  { %v2659_v26 = vpack.c.bf16 %v2631_v31, %v2630_v0 }
 0x6c8   :  { %v2541_v34 = vpop.f32.mrb[192].mxu0 }
 0x6c9   :  { %v2542_v36 = vadd.f32 %v5302_v63, %v2541_v34  ;;  %v3807_v53 = vpop.f32.mrb[193].mxu0  ;;  %3894 = vmatmul.mubr.bf16.gmra.mrb[4].mxu1 %v2659_v26 }
 0x6ca   :  { %v2544_v20 = vpop.f32.mrb[194].mxu0  ;;  %3897 = vmatprep.mubr.msk.bf16.mxu1 %vm4404_vm5, %v4403_v29 }
 0x6cb   :  { %v2545_v38 = vadd.f32 %v5302_v63, %v2544_v20  ;;  %v3808_v37 = vpop.f32.mrb[195].mxu0  ;;  %v2632_v23 = vmax.f32 %v2542_v36, 0.0 }
 0x6cd   :  { %v2633_v57 = vmax.f32 %v2545_v38, 0.0 }
 0x6cf   :  { %v2660_v47 = vpack.c.bf16 %v2633_v57, %v2632_v23 }
 0x6d0   :  { %v2549_v40 = vpop.f32.mrb[196].mxu0 }
 0x6d1   :  { %v2550_v41 = vadd.f32 %v5302_v63, %v2549_v40  ;;  %v3811_v60 = vpop.f32.mrb[197].mxu0  ;;  %3898 = vmatmul.mubr.bf16.gmra.mrb[8].mxu1 %v2660_v47 }
 0x6d2   :  { %v2552_v44 = vpop.f32.mrb[198].mxu0  ;;  %3901 = vmatprep.mubr.msk.bf16.mxu1 %vm4404_vm5, %v4403_v29 }
 0x6d3   :  { %v2553_v45 = vadd.f32 %v5302_v63, %v2552_v44  ;;  %v3812_v48 = vpop.f32.mrb[199].mxu0  ;;  %v2634_v49 = vmax.f32 %v2550_v41, 0.0 }
 0x6d5   :  { %v2635_v2 = vmax.f32 %v2553_v45, 0.0 }
 0x6d7   :  { %v2661_v58 = vpack.c.bf16 %v2635_v2, %v2634_v49 }
 0x6d8   :  { %v2557_v39 = vpop.f32.mrb[200].mxu0 }
 0x6d9   :  { %v2558_v43 = vadd.f32 %v5302_v63, %v2557_v39  ;;  %v3815_v3 = vpop.f32.mrb[201].mxu0  ;;  %3902 = vmatmul.mubr.bf16.gmra.mrb[12].mxu1 %v2661_v58 }
 0x6da   :  { %v2560_v1 = vpop.f32.mrb[202].mxu0  ;;  %3905 = vmatprep.mubr.msk.bf16.mxu1 %vm4404_vm5, %v4403_v29 }
 0x6db   :  { %v2561_v56 = vadd.f32 %v5302_v63, %v2560_v1  ;;  %v3816_v61 = vpop.f32.mrb[203].mxu0  ;;  %v2636_v55 = vmax.f32 %v2558_v43, 0.0  ;;  %v5376_v43 = vld [vmem:[#allocation17] ss:$0 sm:$0xff] }
 0x6dc   :  { %v2964_v1 = vld [vmem:[#allocation7] sm:$0xff] }
 0x6dd   :  { %v2637_v32 = vmax.f32 %v2561_v56, 0.0 }
 0x6df   :  { %v2662_v6 = vpack.c.bf16 %v2637_v32, %v2636_v55  ;;  %v2965_v32 = vld [vmem:[#allocation7 + $0x8] sm:$0xff] }
 0x6e0   :  { %v2565_v4 = vpop.f32.mrb[204].mxu0 }
 0x6e1   :  { %v2566_v59 = vadd.f32 %v5302_v63, %v2565_v4  ;;  %v3819_v5 = vpop.f32.mrb[205].mxu0  ;;  %3906 = vmatmul.mubr.bf16.gmra.mrb[16].mxu1 %v2662_v6 }
 0x6e2   :  { %v2568_v15 = vpop.f32.mrb[206].mxu0  ;;  %3909 = vmatprep.mubr.msk.bf16.mxu1 %vm4404_vm5, %v4403_v29  ;;  %v2966_v5 = vld [vmem:[#allocation7 + $0x10] sm:$0xff] }
 0x6e3   :  { %v2569_v8 = vadd.f32 %v5302_v63, %v2568_v15  ;;  %v3820_v35 = vpop.f32.mrb[207].mxu0  ;;  %v2638_v9 = vmax.f32 %v2566_v59, 0.0 }
 0x6e5   :  { %v2639_v19 = vmax.f32 %v2569_v8, 0.0 }
 0x6e7   :  { %v2663_v12 = vpack.c.bf16 %v2639_v19, %v2638_v9  ;;  %v2967_v9 = vld [vmem:[#allocation7 + $0x18] sm:$0xff] }
 0x6e8   :  { %v2573_v51 = vpop.f32.mrb[208].mxu0 }
 0x6e9   :  { %v2574_v10 = vadd.f32 %v5302_v63, %v2573_v51  ;;  %v3823_v14 = vpop.f32.mrb[209].mxu0  ;;  %3910 = vmatmul.mubr.bf16.gmra.mrb[20].mxu1 %v2663_v12 }
 0x6ea   :  { %v2576_v7 = vpop.f32.mrb[210].mxu0  ;;  %3913 = vmatprep.mubr.msk.bf16.mxu1 %vm4404_vm5, %v4403_v29 }
 0x6eb   :  { %v2577_v16 = vadd.f32 %v5302_v63, %v2576_v7  ;;  %v3824_v13 = vpop.f32.mrb[211].mxu0  ;;  %v2640_v62 = vmax.f32 %v2574_v10, 0.0  ;;  %v2968_v7 = vld [vmem:[#allocation7 + $0x20] sm:$0xff] }
 0x6ed   :  { %v2641_v18 = vmax.f32 %v2577_v16, 0.0 }
 0x6ef   :  { %v2664_v11 = vpack.c.bf16 %v2641_v18, %v2640_v62  ;;  %v2969_v18 = vld [vmem:[#allocation7 + $0x28] sm:$0xff] }
 0x6f0   :  { %v2581_v17 = vpop.f32.mrb[212].mxu0 }
 0x6f1   :  { %v2582_v22 = vadd.f32 %v5302_v63, %v2581_v17  ;;  %v3827_v42 = vpop.f32.mrb[213].mxu0  ;;  %3914 = vmatmul.mubr.bf16.gmra.mrb[24].mxu1 %v2664_v11 }
 0x6f2   :  { %v2584_v50 = vpop.f32.mrb[214].mxu0  ;;  %3917 = vmatprep.mubr.msk.bf16.mxu1 %vm4404_vm5, %v4403_v29 }
 0x6f3   :  { %v2585_v52 = vadd.f32 %v5302_v63, %v2584_v50  ;;  %v3828_v54 = vpop.f32.mrb[215].mxu0  ;;  %v2642_v46 = vmax.f32 %v2582_v22, 0.0 }
 0x6f5   :  { %v2643_v30 = vmax.f32 %v2585_v52, 0.0  ;;  %v2970_v52 = vld [vmem:[#allocation7 + $0x30] sm:$0xff] }
 0x6f7   :  { %v2665_v21 = vpack.c.bf16 %v2643_v30, %v2642_v46 }
 0x6f8   :  { %v2589_v24 = vpop.f32.mrb[216].mxu0 }
 0x6f9   :  { %v2590_v25 = vadd.f32 %v5302_v63, %v2589_v24  ;;  %v3831_v28 = vpop.f32.mrb[217].mxu0  ;;  %3918 = vmatmul.mubr.bf16.gmra.mrb[28].mxu1 %v2665_v21  ;;  %v2971_v21 = vld [vmem:[#allocation7 + $0x38] sm:$0xff] }
 0x6fa   :  { %v2592_v27 = vpop.f32.mrb[218].mxu0  ;;  %3921 = vmatprep.mubr.msk.bf16.mxu1 %vm4404_vm5, %v4403_v29 }
 0x6fb   :  { %v2593_v33 = vadd.f32 %v5302_v63, %v2592_v27  ;;  %v3832_v0 = vpop.f32.mrb[219].mxu0  ;;  %v2644_v31 = vmax.f32 %v2590_v25, 0.0 }
 0x6fc   :  { %v2972_v0 = vld [vmem:[#allocation7 + $0x40] sm:$0xff] }
 0x6fd   :  { %v2645_v26 = vmax.f32 %v2593_v33, 0.0 }
 0x6ff   :  { %v2666_v34 = vpack.c.bf16 %v2645_v26, %v2644_v31 }
 0x700   :  { %v2597_v36 = vpop.f32.mrb[220].mxu0 }
 0x701   :  { %v2598_v53 = vadd.f32 %v5302_v63, %v2597_v36  ;;  %v3835_v20 = vpop.f32.mrb[221].mxu0  ;;  %3922 = vmatmul.mubr.bf16.gmra.mrb[32].mxu1 %v2666_v34  ;;  %v2973_v36 = vld [vmem:[#allocation7 + $0x48] sm:$0xff] }
 0x702   :  { %v2600_v38 = vpop.f32.mrb[222].mxu0  ;;  %3925 = vmatprep.mubr.msk.bf16.mxu1 %vm4404_vm5, %v4403_v29 }
 0x703   :  { %v2601_v37 = vadd.f32 %v5302_v63, %v2600_v38  ;;  %v3836_v23 = vpop.f32.mrb[223].mxu0  ;;  %v2646_v57 = vmax.f32 %v2598_v53, 0.0 }
 0x705   :  { %v2647_v47 = vmax.f32 %v2601_v37, 0.0 }
 0x707   :  { %v2667_v40 = vpack.c.bf16 %v2647_v47, %v2646_v57  ;;  %v2974_v57 = vld [vmem:[#allocation7 + $0x50] sm:$0xff] }
 0x708   :  { %v2605_v41 = vpop.f32.mrb[224].mxu0 }
 0x709   :  { %v2606_v60 = vadd.f32 %v5302_v63, %v2605_v41  ;;  %v3839_v44 = vpop.f32.mrb[225].mxu0  ;;  %3926 = vmatmul.mubr.bf16.gmra.mrb[36].mxu1 %v2667_v40 }
 0x70a   :  { %v2608_v45 = vpop.f32.mrb[226].mxu0  ;;  %3929 = vmatprep.mubr.msk.bf16.mxu1 %vm4404_vm5, %v4403_v29 }
 0x70b   :  { %v2609_v48 = vadd.f32 %v5302_v63, %v2608_v45  ;;  %v3840_v49 = vpop.f32.mrb[227].mxu0  ;;  %v2648_v2 = vmax.f32 %v2606_v60, 0.0  ;;  %v2975_v60 = vld [vmem:[#allocation7 + $0x58] sm:$0xff] }
 0x70d   :  { %v2649_v58 = vmax.f32 %v2609_v48, 0.0 }
 0x70f   :  { %v2668_v39 = vpack.c.bf16 %v2649_v58, %v2648_v2  ;;  %v2976_v58 = vld [vmem:[#allocation7 + $0x60] sm:$0xff] }
 0x711   :  { %3930 = vmatmul.mubr.bf16.gmra.mrb[40].mxu1 %v2668_v39 }
 0x754   :  { %v2774_v3 = vpop.f32.mrb[228].mxu0 }
 0x755   :  { %v2775_v56 = vadd.f32 %v5376_v43, %v2774_v3  ;;  %v3859_v61 = vpop.f32.mrb[229].mxu0 }
 0x756   :  { %v2777_v55 = vpop.f32.mrb[230].mxu0 }
 0x757   :  { %2925 = vst.msk [vmem:[#allocation20] sm:$0xff] %vm301_vm2, %v2775_v56  ;;  %v3002_v6 = vadd.f32 %v2964_v1, %v2775_v56  ;;  %v2778_v29 = vadd.f32 %v5376_v43, %v2777_v55  ;;  %v3860_v63 = vpop.f32.mrb[231].mxu0  ;;  %v2977_v56 = vld [vmem:[#allocation7 + $0x68] sm:$0xff] }
 0x758   :  { %v2978_v63 = vld [vmem:[#allocation7 + $0x70] sm:$0xff] }
 0x759   :  { %3040 = vst.msk [vmem:[#allocation19] sm:$0xff] %vm301_vm2, %v3002_v6  ;;  %2926 = vst.msk [vmem:[#allocation20 + $0x8] sm:$0xff] %vm301_vm2, %v2778_v29  ;;  %v3003_v4 = vadd.f32 %v2965_v32, %v2778_v29 }
 0x75b   :  { %3041 = vst.msk [vmem:[#allocation19 + $0x8] sm:$0xff] %vm301_vm2, %v3003_v4 }
 0x75c   :  { %v2782_v59 = vpop.f32.mrb[228].mxu1 }
 0x75d   :  { %v2783_v15 = vadd.f32 %v5376_v43, %v2782_v59  ;;  %v3863_v8 = vpop.f32.mrb[229].mxu1 }
 0x75e   :  { %v2785_v35 = vpop.f32.mrb[230].mxu1 }
 0x75f   :  { %2927 = vst.msk [vmem:[#allocation20 + $0x10] sm:$0xff] %vm301_vm2, %v2783_v15  ;;  %v3004_v19 = vadd.f32 %v2966_v5, %v2783_v15  ;;  %v2786_v12 = vadd.f32 %v5376_v43, %v2785_v35  ;;  %v3864_v51 = vpop.f32.mrb[231].mxu1  ;;  %v2979_v15 = vld [vmem:[#allocation7 + $0x78] sm:$0xff] }
 0x760   :  { %v2980_v51 = vld [vmem:[#allocation7 + $0x80] sm:$0xff] }
 0x761   :  { %3042 = vst.msk [vmem:[#allocation19 + $0x10] sm:$0xff] %vm301_vm2, %v3004_v19  ;;  %2928 = vst.msk [vmem:[#allocation20 + $0x18] sm:$0xff] %vm301_vm2, %v2786_v12  ;;  %v3005_v10 = vadd.f32 %v2967_v9, %v2786_v12 }
 0x763   :  { %3043 = vst.msk [vmem:[#allocation19 + $0x18] sm:$0xff] %vm301_vm2, %v3005_v10 }
 0x764   :  { %v2790_v14 = vpop.f32.mrb[232].mxu1 }
 0x765   :  { %v2791_v16 = vadd.f32 %v5376_v43, %v2790_v14  ;;  %v3867_v13 = vpop.f32.mrb[233].mxu1 }
 0x766   :  { %v2793_v62 = vpop.f32.mrb[234].mxu1 }
 0x767   :  { %2929 = vst.msk [vmem:[#allocation20 + $0x20] sm:$0xff] %vm301_vm2, %v2791_v16  ;;  %v3006_v11 = vadd.f32 %v2968_v7, %v2791_v16  ;;  %v2794_v17 = vadd.f32 %v5376_v43, %v2793_v62  ;;  %v3868_v22 = vpop.f32.mrb[235].mxu1  ;;  %v2981_v16 = vld [vmem:[#allocation7 + $0x88] sm:$0xff] }
 0x768   :  { %v2982_v22 = vld [vmem:[#allocation7 + $0x90] sm:$0xff] }
 0x769   :  { %3044 = vst.msk [vmem:[#allocation19 + $0x20] sm:$0xff] %vm301_vm2, %v3006_v11  ;;  %2930 = vst.msk [vmem:[#allocation20 + $0x28] sm:$0xff] %vm301_vm2, %v2794_v17  ;;  %v3007_v42 = vadd.f32 %v2969_v18, %v2794_v17 }
 0x76b   :  { %3045 = vst.msk [vmem:[#allocation19 + $0x28] sm:$0xff] %vm301_vm2, %v3007_v42 }
 0x76c   :  { %v2798_v50 = vpop.f32.mrb[236].mxu1 }
 0x76d   :  { %v2799_v54 = vadd.f32 %v5376_v43, %v2798_v50  ;;  %v3871_v46 = vpop.f32.mrb[237].mxu1 }
 0x76e   :  { %v2801_v30 = vpop.f32.mrb[238].mxu1 }
 0x76f   :  { %2931 = vst.msk [vmem:[#allocation20 + $0x30] sm:$0xff] %vm301_vm2, %v2799_v54  ;;  %v3008_v24 = vadd.f32 %v2970_v52, %v2799_v54  ;;  %v2802_v25 = vadd.f32 %v5376_v43, %v2801_v30  ;;  %v3872_v28 = vpop.f32.mrb[239].mxu1  ;;  %v2983_v54 = vld [vmem:[#allocation7 + $0x98] sm:$0xff] }
 0x770   :  { %v2984_v28 = vld [vmem:[#allocation7 + $0xa0] sm:$0xff] }
 0x771   :  { %3046 = vst.msk [vmem:[#allocation19 + $0x30] sm:$0xff] %vm301_vm2, %v3008_v24  ;;  %2932 = vst.msk [vmem:[#allocation20 + $0x38] sm:$0xff] %vm301_vm2, %v2802_v25  ;;  %v3009_v27 = vadd.f32 %v2971_v21, %v2802_v25 }
 0x773   :  { %3047 = vst.msk [vmem:[#allocation19 + $0x38] sm:$0xff] %vm301_vm2, %v3009_v27 }
 0x774   :  { %v2806_v33 = vpop.f32.mrb[240].mxu1 }
 0x775   :  { %v2807_v31 = vadd.f32 %v5376_v43, %v2806_v33  ;;  %v3875_v26 = vpop.f32.mrb[241].mxu1 }
 0x776   :  { %v2809_v34 = vpop.f32.mrb[242].mxu1 }
 0x777   :  { %2933 = vst.msk [vmem:[#allocation20 + $0x40] sm:$0xff] %vm301_vm2, %v2807_v31  ;;  %v3010_v53 = vadd.f32 %v2972_v0, %v2807_v31  ;;  %v2810_v20 = vadd.f32 %v5376_v43, %v2809_v34  ;;  %v3876_v38 = vpop.f32.mrb[243].mxu1  ;;  %v2985_v31 = vld [vmem:[#allocation7 + $0xa8] sm:$0xff] }
 0x778   :  { %v2986_v38 = vld [vmem:[#allocation7 + $0xb0] sm:$0xff] }
 0x779   :  { %3048 = vst.msk [vmem:[#allocation19 + $0x40] sm:$0xff] %vm301_vm2, %v3010_v53  ;;  %2934 = vst.msk [vmem:[#allocation20 + $0x48] sm:$0xff] %vm301_vm2, %v2810_v20  ;;  %v3011_v37 = vadd.f32 %v2973_v36, %v2810_v20 }
 0x77b   :  { %3049 = vst.msk [vmem:[#allocation19 + $0x48] sm:$0xff] %vm301_vm2, %v3011_v37 }
 0x77c   :  { %v2814_v23 = vpop.f32.mrb[244].mxu1 }
 0x77d   :  { %v2815_v47 = vadd.f32 %v5376_v43, %v2814_v23  ;;  %v3879_v40 = vpop.f32.mrb[245].mxu1 }
 0x77e   :  { %v2817_v41 = vpop.f32.mrb[246].mxu1 }
 0x77f   :  { %2935 = vst.msk [vmem:[#allocation20 + $0x50] sm:$0xff] %vm301_vm2, %v2815_v47  ;;  %v3012_v44 = vadd.f32 %v2974_v57, %v2815_v47  ;;  %v2818_v45 = vadd.f32 %v5376_v43, %v2817_v41  ;;  %v3880_v48 = vpop.f32.mrb[247].mxu1  ;;  %v2987_v47 = vld [vmem:[#allocation7 + $0xb8] sm:$0xff] }
 0x780   :  { %v2988_v48 = vld [vmem:[#allocation7 + $0xc0] sm:$0xff] }
 0x781   :  { %3050 = vst.msk [vmem:[#allocation19 + $0x50] sm:$0xff] %vm301_vm2, %v3012_v44  ;;  %2936 = vst.msk [vmem:[#allocation20 + $0x58] sm:$0xff] %vm301_vm2, %v2818_v45  ;;  %v3013_v49 = vadd.f32 %v2975_v60, %v2818_v45 }
 0x783   :  { %3051 = vst.msk [vmem:[#allocation19 + $0x58] sm:$0xff] %vm301_vm2, %v3013_v49 }
 0x784   :  { %v2822_v2 = vpop.f32.mrb[248].mxu1 }
 0x785   :  { %v2823_v39 = vadd.f32 %v5376_v43, %v2822_v2  ;;  %v3883_v3 = vpop.f32.mrb[249].mxu1 }
 0x786   :  { %v2825_v1 = vpop.f32.mrb[250].mxu1 }
 0x787   :  { %2937 = vst.msk [vmem:[#allocation20 + $0x60] sm:$0xff] %vm301_vm2, %v2823_v39  ;;  %v3014_v61 = vadd.f32 %v2976_v58, %v2823_v39  ;;  %v2826_v55 = vadd.f32 %v5376_v43, %v2825_v1  ;;  %v3884_v32 = vpop.f32.mrb[251].mxu1  ;;  %v2989_v39 = vld [vmem:[#allocation7 + $0xc8] sm:$0xff] }
 0x788   :  { %v2990_v32 = vld [vmem:[#allocation7 + $0xd0] sm:$0xff] }
 0x789   :  { %3052 = vst.msk [vmem:[#allocation19 + $0x60] sm:$0xff] %vm301_vm2, %v3014_v61  ;;  %2938 = vst.msk [vmem:[#allocation20 + $0x68] sm:$0xff] %vm301_vm2, %v2826_v55  ;;  %v3015_v6 = vadd.f32 %v2977_v56, %v2826_v55 }
 0x78b   :  { %3053 = vst.msk [vmem:[#allocation19 + $0x68] sm:$0xff] %vm301_vm2, %v3015_v6 }
 0x78c   :  { %v2830_v29 = vpop.f32.mrb[252].mxu1 }
 0x78d   :  { %v2831_v4 = vadd.f32 %v5376_v43, %v2830_v29  ;;  %v3887_v59 = vpop.f32.mrb[253].mxu1 }
 0x78e   :  { %v2833_v5 = vpop.f32.mrb[254].mxu1 }
 0x78f   :  { %2939 = vst.msk [vmem:[#allocation20 + $0x70] sm:$0xff] %vm301_vm2, %v2831_v4  ;;  %v3016_v8 = vadd.f32 %v2978_v63, %v2831_v4  ;;  %v2834_v35 = vadd.f32 %v5376_v43, %v2833_v5  ;;  %v3888_v9 = vpop.f32.mrb[255].mxu1  ;;  %v2991_v4 = vld [vmem:[#allocation7 + $0xd8] sm:$0xff] }
 0x790   :  { %v2992_v9 = vld [vmem:[#allocation7 + $0xe0] sm:$0xff] }
 0x791   :  { %3054 = vst.msk [vmem:[#allocation19 + $0x70] sm:$0xff] %vm301_vm2, %v3016_v8  ;;  %2940 = vst.msk [vmem:[#allocation20 + $0x78] sm:$0xff] %vm301_vm2, %v2834_v35  ;;  %v3017_v19 = vadd.f32 %v2979_v15, %v2834_v35 }
 0x793   :  { %3055 = vst.msk [vmem:[#allocation19 + $0x78] sm:$0xff] %vm301_vm2, %v3017_v19 }
 0x794   :  { %v2838_v12 = vpop.f32.mrb[0].mxu1 }
 0x795   :  { %v2839_v10 = vadd.f32 %v5376_v43, %v2838_v12  ;;  %v3891_v14 = vpop.f32.mrb[1].mxu1 }
 0x796   :  { %v2841_v7 = vpop.f32.mrb[2].mxu1 }
 0x797   :  { %2941 = vst.msk [vmem:[#allocation20 + $0x80] sm:$0xff] %vm301_vm2, %v2839_v10  ;;  %v3018_v13 = vadd.f32 %v2980_v51, %v2839_v10  ;;  %v2842_v62 = vadd.f32 %v5376_v43, %v2841_v7  ;;  %v3892_v18 = vpop.f32.mrb[3].mxu1  ;;  %v2993_v10 = vld [vmem:[#allocation7 + $0xe8] sm:$0xff] }
 0x798   :  { %v2994_v18 = vld [vmem:[#allocation7 + $0xf0] sm:$0xff] }
 0x799   :  { %3056 = vst.msk [vmem:[#allocation19 + $0x80] sm:$0xff] %vm301_vm2, %v3018_v13  ;;  %2942 = vst.msk [vmem:[#allocation20 + $0x88] sm:$0xff] %vm301_vm2, %v2842_v62  ;;  %v3019_v11 = vadd.f32 %v2981_v16, %v2842_v62 }
 0x79b   :  { %3057 = vst.msk [vmem:[#allocation19 + $0x88] sm:$0xff] %vm301_vm2, %v3019_v11 }
 0x79c   :  { %v2846_v17 = vpop.f32.mrb[4].mxu1 }
 0x79d   :  { %v2847_v42 = vadd.f32 %v5376_v43, %v2846_v17  ;;  %v3895_v50 = vpop.f32.mrb[5].mxu1 }
 0x79e   :  { %v2849_v52 = vpop.f32.mrb[6].mxu1 }
 0x79f   :  { %2943 = vst.msk [vmem:[#allocation20 + $0x90] sm:$0xff] %vm301_vm2, %v2847_v42  ;;  %v3020_v46 = vadd.f32 %v2982_v22, %v2847_v42  ;;  %v2850_v30 = vadd.f32 %v5376_v43, %v2849_v52  ;;  %v3896_v21 = vpop.f32.mrb[7].mxu1  ;;  %v2995_v42 = vld [vmem:[#allocation7 + $0xf8] sm:$0xff] }
 0x7a0   :  { %v2996_v21 = vld [vmem:[#allocation7 + $0x100] sm:$0xff] }
 0x7a1   :  { %3058 = vst.msk [vmem:[#allocation19 + $0x90] sm:$0xff] %vm301_vm2, %v3020_v46  ;;  %2944 = vst.msk [vmem:[#allocation20 + $0x98] sm:$0xff] %vm301_vm2, %v2850_v30  ;;  %v3021_v24 = vadd.f32 %v2983_v54, %v2850_v30 }
 0x7a3   :  { %3059 = vst.msk [vmem:[#allocation19 + $0x98] sm:$0xff] %vm301_vm2, %v3021_v24 }
 0x7a4   :  { %v2854_v25 = vpop.f32.mrb[8].mxu1 }
 0x7a5   :  { %v2855_v27 = vadd.f32 %v5376_v43, %v2854_v25  ;;  %v3899_v33 = vpop.f32.mrb[9].mxu1 }
 0x7a6   :  { %v2857_v0 = vpop.f32.mrb[10].mxu1 }
 0x7a7   :  { %2945 = vst.msk [vmem:[#allocation20 + $0xa0] sm:$0xff] %vm301_vm2, %v2855_v27  ;;  %v3022_v26 = vadd.f32 %v2984_v28, %v2855_v27  ;;  %v2858_v34 = vadd.f32 %v5376_v43, %v2857_v0  ;;  %v3900_v36 = vpop.f32.mrb[11].mxu1  ;;  %v2997_v27 = vld [vmem:[#allocation7 + $0x108] sm:$0xff] }
 0x7a8   :  { %v2998_v36 = vld [vmem:[#allocation7 + $0x110] sm:$0xff] }
 0x7a9   :  { %3060 = vst.msk [vmem:[#allocation19 + $0xa0] sm:$0xff] %vm301_vm2, %v3022_v26  ;;  %2946 = vst.msk [vmem:[#allocation20 + $0xa8] sm:$0xff] %vm301_vm2, %v2858_v34  ;;  %v3023_v53 = vadd.f32 %v2985_v31, %v2858_v34 }
 0x7ab   :  { %3061 = vst.msk [vmem:[#allocation19 + $0xa8] sm:$0xff] %vm301_vm2, %v3023_v53 }
 0x7ac   :  { %v2862_v20 = vpop.f32.mrb[12].mxu1 }
 0x7ad   :  { %v2863_v37 = vadd.f32 %v5376_v43, %v2862_v20  ;;  %v3903_v23 = vpop.f32.mrb[13].mxu1 }
 0x7ae   :  { %v2865_v57 = vpop.f32.mrb[14].mxu1 }
 0x7af   :  { %2947 = vst.msk [vmem:[#allocation20 + $0xb0] sm:$0xff] %vm301_vm2, %v2863_v37  ;;  %v3024_v40 = vadd.f32 %v2986_v38, %v2863_v37  ;;  %v2866_v41 = vadd.f32 %v5376_v43, %v2865_v57  ;;  %v3904_v60 = vpop.f32.mrb[15].mxu1  ;;  %v2999_v37 = vld [vmem:[#allocation7 + $0x118] sm:$0xff] }
 0x7b0   :  { %v3000_v60 = vld [vmem:[#allocation7 + $0x120] sm:$0xff] }
 0x7b1   :  { %3062 = vst.msk [vmem:[#allocation19 + $0xb0] sm:$0xff] %vm301_vm2, %v3024_v40  ;;  %2948 = vst.msk [vmem:[#allocation20 + $0xb8] sm:$0xff] %vm301_vm2, %v2866_v41  ;;  %v3025_v44 = vadd.f32 %v2987_v47, %v2866_v41 }
 0x7b3   :  { %3063 = vst.msk [vmem:[#allocation19 + $0xb8] sm:$0xff] %vm301_vm2, %v3025_v44 }
 0x7b4   :  { %v2870_v45 = vpop.f32.mrb[16].mxu1 }
 0x7b5   :  { %v2871_v49 = vadd.f32 %v5376_v43, %v2870_v45  ;;  %v3907_v2 = vpop.f32.mrb[17].mxu1 }
 0x7b6   :  { %v2873_v58 = vpop.f32.mrb[18].mxu1 }
 0x7b7   :  { %2949 = vst.msk [vmem:[#allocation20 + $0xc0] sm:$0xff] %vm301_vm2, %v2871_v49  ;;  %v3026_v3 = vadd.f32 %v2988_v48, %v2871_v49  ;;  %v2874_v1 = vadd.f32 %v5376_v43, %v2873_v58  ;;  %v3908_v56 = vpop.f32.mrb[19].mxu1  ;;  %v3001_v49 = vld [vmem:[#allocation7 + $0x128] sm:$0xf] }
 0x7b9   :  { %3064 = vst.msk [vmem:[#allocation19 + $0xc0] sm:$0xff] %vm301_vm2, %v3026_v3  ;;  %2950 = vst.msk [vmem:[#allocation20 + $0xc8] sm:$0xff] %vm301_vm2, %v2874_v1  ;;  %v3027_v61 = vadd.f32 %v2989_v39, %v2874_v1 }
 0x7bb   :  { %3065 = vst.msk [vmem:[#allocation19 + $0xc8] sm:$0xff] %vm301_vm2, %v3027_v61 }
 0x7bc   :  { %v2878_v55 = vpop.f32.mrb[20].mxu1 }
 0x7bd   :  { %v2879_v6 = vadd.f32 %v5376_v43, %v2878_v55  ;;  %v3911_v29 = vpop.f32.mrb[21].mxu1 }
 0x7be   :  { %v2881_v63 = vpop.f32.mrb[22].mxu1 }
 0x7bf   :  { %2951 = vst.msk [vmem:[#allocation20 + $0xd0] sm:$0xff] %vm301_vm2, %v2879_v6  ;;  %v3028_v59 = vadd.f32 %v2990_v32, %v2879_v6  ;;  %v2882_v5 = vadd.f32 %v5376_v43, %v2881_v63  ;;  %v3912_v15 = vpop.f32.mrb[23].mxu1 }
 0x7c1   :  { %3066 = vst.msk [vmem:[#allocation19 + $0xd0] sm:$0xff] %vm301_vm2, %v3028_v59  ;;  %2952 = vst.msk [vmem:[#allocation20 + $0xd8] sm:$0xff] %vm301_vm2, %v2882_v5  ;;  %v3029_v8 = vadd.f32 %v2991_v4, %v2882_v5 }
 0x7c3   :  { %3067 = vst.msk [vmem:[#allocation19 + $0xd8] sm:$0xff] %vm301_vm2, %v3029_v8 }
 0x7c4   :  { %v2886_v35 = vpop.f32.mrb[24].mxu1 }
 0x7c5   :  { %v2887_v19 = vadd.f32 %v5376_v43, %v2886_v35  ;;  %v3915_v12 = vpop.f32.mrb[25].mxu1 }
 0x7c6   :  { %v2889_v51 = vpop.f32.mrb[26].mxu1 }
 0x7c7   :  { %2953 = vst.msk [vmem:[#allocation20 + $0xe0] sm:$0xff] %vm301_vm2, %v2887_v19  ;;  %v3030_v14 = vadd.f32 %v2992_v9, %v2887_v19  ;;  %v2890_v7 = vadd.f32 %v5376_v43, %v2889_v51  ;;  %v3916_v16 = vpop.f32.mrb[27].mxu1 }
 0x7c9   :  { %3068 = vst.msk [vmem:[#allocation19 + $0xe0] sm:$0xff] %vm301_vm2, %v3030_v14  ;;  %2954 = vst.msk [vmem:[#allocation20 + $0xe8] sm:$0xff] %vm301_vm2, %v2890_v7  ;;  %v3031_v13 = vadd.f32 %v2993_v10, %v2890_v7 }
 0x7cb   :  { %3069 = vst.msk [vmem:[#allocation19 + $0xe8] sm:$0xff] %vm301_vm2, %v3031_v13 }
 0x7cc   :  { %v2894_v62 = vpop.f32.mrb[28].mxu1 }
 0x7cd   :  { %v2895_v11 = vadd.f32 %v5376_v43, %v2894_v62  ;;  %v3919_v17 = vpop.f32.mrb[29].mxu1 }
 0x7ce   :  { %v2897_v22 = vpop.f32.mrb[30].mxu1 }
 0x7cf   :  { %2955 = vst.msk [vmem:[#allocation20 + $0xf0] sm:$0xff] %vm301_vm2, %v2895_v11  ;;  %v3032_v50 = vadd.f32 %v2994_v18, %v2895_v11  ;;  %v2898_v52 = vadd.f32 %v5376_v43, %v2897_v22  ;;  %v3920_v54 = vpop.f32.mrb[31].mxu1 }
 0x7d1   :  { %3070 = vst.msk [vmem:[#allocation19 + $0xf0] sm:$0xff] %vm301_vm2, %v3032_v50  ;;  %2956 = vst.msk [vmem:[#allocation20 + $0xf8] sm:$0xff] %vm301_vm2, %v2898_v52  ;;  %v3033_v46 = vadd.f32 %v2995_v42, %v2898_v52 }
 0x7d3   :  { %3071 = vst.msk [vmem:[#allocation19 + $0xf8] sm:$0xff] %vm301_vm2, %v3033_v46 }
 0x7d4   :  { %v2902_v30 = vpop.f32.mrb[32].mxu1 }
 0x7d5   :  { %v2903_v24 = vadd.f32 %v5376_v43, %v2902_v30  ;;  %v3923_v25 = vpop.f32.mrb[33].mxu1 }
 0x7d6   :  { %v2905_v28 = vpop.f32.mrb[34].mxu1 }
 0x7d7   :  { %2957 = vst.msk [vmem:[#allocation20 + $0x100] sm:$0xff] %vm301_vm2, %v2903_v24  ;;  %v3034_v33 = vadd.f32 %v2996_v21, %v2903_v24  ;;  %v2906_v0 = vadd.f32 %v5376_v43, %v2905_v28  ;;  %v3924_v31 = vpop.f32.mrb[35].mxu1 }
 0x7d9   :  { %3072 = vst.msk [vmem:[#allocation19 + $0x100] sm:$0xff] %vm301_vm2, %v3034_v33  ;;  %2958 = vst.msk [vmem:[#allocation20 + $0x108] sm:$0xff] %vm301_vm2, %v2906_v0  ;;  %v3035_v26 = vadd.f32 %v2997_v27, %v2906_v0 }
 0x7db   :  { %3073 = vst.msk [vmem:[#allocation19 + $0x108] sm:$0xff] %vm301_vm2, %v3035_v26 }
 0x7dc   :  { %v2910_v34 = vpop.f32.mrb[36].mxu1 }
 0x7dd   :  { %v2911_v53 = vadd.f32 %v5376_v43, %v2910_v34  ;;  %v3927_v20 = vpop.f32.mrb[37].mxu1 }
 0x7de   :  { %v2913_v38 = vpop.f32.mrb[38].mxu1 }
 0x7df   :  { %2959 = vst.msk [vmem:[#allocation20 + $0x110] sm:$0xff] %vm301_vm2, %v2911_v53  ;;  %v3036_v23 = vadd.f32 %v2998_v36, %v2911_v53  ;;  %v2914_v57 = vadd.f32 %v5376_v43, %v2913_v38  ;;  %v3928_v47 = vpop.f32.mrb[39].mxu1 }
 0x7e1   :  { %3074 = vst.msk [vmem:[#allocation19 + $0x110] sm:$0xff] %vm301_vm2, %v3036_v23  ;;  %2960 = vst.msk [vmem:[#allocation20 + $0x118] sm:$0xff] %vm301_vm2, %v2914_v57  ;;  %v3037_v40 = vadd.f32 %v2999_v37, %v2914_v57 }
 0x7e3   :  { %3075 = vst.msk [vmem:[#allocation19 + $0x118] sm:$0xff] %vm301_vm2, %v3037_v40 }
 0x7e4   :  { %v2918_v41 = vpop.f32.mrb[40].mxu1 }
 0x7e5   :  { %v2919_v44 = vadd.f32 %v5376_v43, %v2918_v41  ;;  %v3931_v45 = vpop.f32.mrb[41].mxu1 }
 0x7e6   :  { %v2921_v48 = vpop.f32.mrb[42].mxu1 }
 0x7e7   :  { %2961 = vst.msk [vmem:[#allocation20 + $0x120] sm:$0xff] %vm301_vm2, %v2919_v44  ;;  %v3038_v2 = vadd.f32 %v3000_v60, %v2919_v44  ;;  %v2922_v58 = vadd.f32 %v5376_v43, %v2921_v48  ;;  %v3932_v39 = vpop.f32.mrb[43].mxu1 }
 0x7e9   :  { %3076 = vst.msk [vmem:[#allocation19 + $0x120] sm:$0xff] %vm301_vm2, %v3038_v2  ;;  %v3039_v3 = vadd.f32 %v3001_v49, %v2922_v58 }
 0x7ea   :  { %2963 = vst.msk [vmem:[#allocation20 + $0x128] sm:$0xf] %vm2962_vm6, %v2922_v58 }
 0x7eb   :  { %4338 = shalt.err (!%p4335_p0)
}
 0x7ec   :  { %s4339_s7 = scalar_lea.hbm %s5540_s11, 4864 }
 0x7ed   :  { %p4340_p1 = scmp.ne.s32.totalorder %s5540_s11, %s4339_s7  ;;  %p4343_p2 = scmp.lt.u32.totalorder %s4339_s7, %s5540_s11 }
 0x7ef   :  { %p4345_p3 = pnand %p4343_p2, %p4340_p1 }
 0x7f1   :  { %4348 = shalt.err (!%p4345_p3)
}
 0x7f2   :  { %3101 = dma.vmem_to_hbm [thread:$0]  %s3096_s13, 4864, %s5540_s11, [#allocation21], %s4389_s29, %s4389_s29, %s4390_s30   ;;  %3077 = vst.msk [vmem:[#allocation19 + $0x128] sm:$0xf] %vm2962_vm6, %v3039_v3 }
 0x7f3   :  { %s4349_s3 = scalar_lea.vmem %s5491_s20, 4864  ;;  %p4354_p5 = scmp.lt.s32.totalorder %s5491_s20, %s5491_s20 }
 0x7f4   :  { %p4350_p4 = scmp.ne.s32.totalorder %s5491_s20, %s4349_s3  ;;  %p4355_p6 = scmp.lt.s32.totalorder %s4349_s3, %s4349_s3 }
 0x7f6   :  { %p4356_p7 = por %p4355_p6, %p4354_p5 }
 0x7f8   :  { %p4357_p8 = pnand %p4356_p7, %p4350_p4 }
 0x7fa   :  { %4360 = shalt.err (!%p4357_p8)
}
 0x7fb   :  { %s4361_s26 = scalar_lea.hbm %s5539_s10, 4864 }
 0x7fc   :  { %p4362_p9 = scmp.ne.s32.totalorder %s5539_s10, %s4361_s26  ;;  %p4365_p10 = scmp.lt.u32.totalorder %s4361_s26, %s5539_s10 }
 0x7fe   :  { %p4367_p11 = pnand %p4365_p10, %p4362_p9 }
 0x800   :  { %4370 = shalt.err (!%p4367_p11)
}
 0x801   :  { %3089 = dma.vmem_to_hbm [thread:$0]  %s5491_s20, 4864, %s5539_s10, [#allocation4], %s4389_s29, %s4389_s29, %s4390_s30  }
 0x802   :  { %4383 = dma.done.wait [#allocation4], 4864  }
 0x803   :  { %4384 = vsyncadd [#allocation4], 4294962432 }
 0x804   :  { %4385 = dma.done.wait [#allocation21], 4864  }
 0x805   :  { %4386 = vsyncadd [#allocation21], 4294962432 }
 0x806   :  { %3108 = vsyncpa [#allocation3], 1 }
 0x807   :  { %3109 = vsyncpa [#allocation6], 1 }
 0x808   :  { %3110 = vsyncpa [#allocation9], 1 }
 0x809   :  { %3111 = vsyncpa [#allocation12], 1 }
 0x80a   :  { %3112 = vsyncpa [#allocation15], 1 }
 0x80b   :  { %3113 = vsyncpa [#allocation18], 1 }
 0x80c   :  { %3114 = vsyncpa [#allocation4], 1 }
 0x80d   :  { %3115 = vsyncpa [#allocation21], 1 }

</bundles_post_ra>
